<compile_context>
chip_gen: v7x
topology: tpu7x:2x2x1
jax: 0.10.0
libtpu: 0.0.40
codegen_flags: <defaults>
</compile_context>

<pallas_src>
import jax
import jax.numpy as jnp
from jax.experimental import pallas as pl
from jax.experimental.pallas import tpu as pltpu

KSIZE = 7
PAD = 3


# ----------------------------------------------------------------------------
# Fused CBAM kernel factory: one batch element per grid step.
# ----------------------------------------------------------------------------
def _make_cbam_kernel(C, Cr, H, W):
    HW = H * W
    inv_hw = 1.0 / float(HW)
    inv_c = 1.0 / float(C)

    def kernel(x_ref, w1t_ref, w2_ref, b2_ref, b1_ref, cw_ref, cb_ref,
               o_ref, pad_ref, sflat_ref):
        x = x_ref[0]                                            # (C, HW) lane-dense

        # ---------------- ChannelGate ----------------
        # Single lane-axis reductions; mean = sum * 1/(H*W) (no divides).
        avg = jnp.sum(x, axis=1, keepdims=True) * inv_hw        # (C, 1)
        mx = jnp.max(x, axis=1, keepdims=True)                  # (C, 1)
        cols = jnp.concatenate([avg, mx], axis=1)               # (C, 2) both pools batched

        # Tiny shared MLP on the VPU (broadcast-mul + reduce; Cr is small/static).
        w1t = w1t_ref[...]                                       # (C, Cr) == W1^T
        w2 = w2_ref[...]                                         # (C, Cr)
        att = jnp.zeros((C, 2), jnp.float32) + b2_ref[...]       # (C, 2)
        for r in range(Cr):
            hr = jnp.sum(w1t[:, r:r + 1] * cols, axis=0, keepdims=True) + b1_ref[r]
            hr = jnp.maximum(hr, 0.0)                            # (1, 2)
            att = att + w2[:, r:r + 1] * hr                      # rank-1 update
        scale_c = jax.nn.sigmoid(att[:, 0:1] + att[:, 1:2])      # (C, 1)
        xg = x * scale_c                                          # (C, HW) lane-dense

        # ---------------- SpatialGate ----------------
        # Channel-wise max / mean, still lane-dense (reduce over sublanes).
        cmax = jnp.max(xg, axis=0, keepdims=True)                 # (1, HW)
        cmean = jnp.sum(xg, axis=0, keepdims=True) * inv_c        # (1, HW)

        # Zero-padded 2-D maps in a pre-zeroed VMEM scratch (no concatenates,
        # no in-kernel reshape): scatter the flat maps row by row.
        pad_ref[...] = jnp.zeros_like(pad_ref)
        for h in range(H):
            pad_ref[0, PAD + h:PAD + h + 1, PAD:PAD + W] = cmax[:, h * W:(h + 1) * W]
            pad_ref[1, PAD + h:PAD + h + 1, PAD:PAD + W] = cmean[:, h * W:(h + 1) * W]

        # Hoist the kw (lane-direction) shifts out of the tap loop:
        # 7 column-shifted copies per map instead of 98 misaligned slices.
        colmax = [pad_ref[0, :, kw:kw + W] for kw in range(KSIZE)]    # (RP, W) each
        colmean = [pad_ref[1, :, kw:kw + W] for kw in range(KSIZE)]

        # 7x7 conv: one independent partial accumulator per kh (breaks the
        # 98-long serial FMA chain); inner slices are sublane-offset only.
        parts = []
        for kh in range(KSIZE):
            base = kh * KSIZE
            p = cw_ref[base] * colmax[0][kh:kh + H, :]
            p = p + cw_ref[49 + base] * colmean[0][kh:kh + H, :]
            for kw in range(1, KSIZE):
                p = p + cw_ref[base + kw] * colmax[kw][kh:kh + H, :]
                p = p + cw_ref[49 + base + kw] * colmean[kw][kh:kh + H, :]
            parts.append(p)
        conv = parts[0]
        for p in parts[1:]:
            conv = conv + p
        scale2d = jax.nn.sigmoid(conv + cb_ref[0])                # (H, W)

        # Re-flatten the spatial scale to (1, HW) through a small scratch so the
        # final scaling and the output store stay lane-dense.
        for h in range(H):
            sflat_ref[0:1, h * W:(h + 1) * W] = scale2d[h:h + 1, :]
        o_ref[0] = (xg * sflat_ref[...]).astype(o_ref.dtype)

    return kernel


# ----------------------------------------------------------------------------
# Wrapper
# ----------------------------------------------------------------------------
def cbam_forward(x, w1, b1, w2, b2, conv_w, conv_b):
    B, C, H, W = x.shape
    Cr = w1.shape[0]
    HW = H * W
    RP = ((H + 2 * PAD + 7) // 8) * 8                      # pad-scratch rows (sublane mult)
    LP = ((max(W + 2 * PAD, 128) + 127) // 128) * 128      # pad-scratch lanes

    # Lane-dense layout: (B, C, H, W) -> (B, C, H*W) (free relabel for NCHW).
    x_flat = x.reshape(B, C, HW).astype(jnp.float32)
    w1t = jnp.transpose(w1).astype(jnp.float32)             # (C, Cr)
    w2f = w2.astype(jnp.float32)                            # (C, Cr)
    b2f = b2.reshape(C, 1).astype(jnp.float32)
    b1f = b1.reshape(Cr).astype(jnp.float32)                # SMEM, 1-D
    cwf = conv_w.reshape(2 * KSIZE * KSIZE).astype(jnp.float32)   # SMEM, 1-D
    cbf = conv_b.reshape(1).astype(jnp.float32)             # SMEM, 1-D

    kernel = _make_cbam_kernel(C, Cr, H, W)

    # grid=(B,) "parallel": uses both v7x TensorCores when B >= 2; on single-TC
    # v5e/v6e it is a short sequential loop over tiny (32 KiB) blocks.
    # TODO(synk): add spatial (H*W) tiling + a channel-stat pre-pass for video
    # resolutions where a full (C, H*W) block would not fit v7x's 64 MiB VMEM.
    out_flat = pl.pallas_call(
        kernel,
        out_shape=jax.ShapeDtypeStruct((B, C, HW), jnp.float32),
        grid=(B,),
        in_specs=[
            pl.BlockSpec((1, C, HW), lambda b: (b, 0, 0)),
            pl.BlockSpec((C, Cr), lambda b: (0, 0)),
            pl.BlockSpec((C, Cr), lambda b: (0, 0)),
            pl.BlockSpec((C, 1), lambda b: (0, 0)),
            pl.BlockSpec(memory_space=pltpu.MemorySpace.SMEM),   # b1
            pl.BlockSpec(memory_space=pltpu.MemorySpace.SMEM),   # conv weights (98,)
            pl.BlockSpec(memory_space=pltpu.MemorySpace.SMEM),   # conv bias (1,)
        ],
        out_specs=pl.BlockSpec((1, C, HW), lambda b: (b, 0, 0)),
        scratch_shapes=[
            pltpu.VMEM((2, RP, LP), jnp.float32),    # zero-padded conv input maps
            pltpu.VMEM((1, HW), jnp.float32),        # flat spatial scale
        ],
        compiler_params=pltpu.CompilerParams(
            dimension_semantics=("parallel",)),
    )(x_flat, w1t, w2f, b2f, b1f, cwf, cbf)
    return out_flat.reshape(B, C, H, W)


# ----------------------------------------------------------------------------
# Pure-JAX reference (mirrors the PyTorch module) for correctness checking.
# ----------------------------------------------------------------------------
def cbam_ref(x, w1, b1, w2, b2, conv_w, conv_b):
    avg = jnp.mean(x, axis=(2, 3))                 # (B, C)
    mx = jnp.max(x, axis=(2, 3))                   # (B, C)

    def mlp(v):
        h = jax.nn.relu(v @ w1.T + b1[:, 0])
        return h @ w2.T + b2[:, 0]

    att = mlp(avg) + mlp(mx)
    scale_c = jax.nn.sigmoid(att)[:, :, None, None]
    xg = x * scale_c

    cmax = jnp.max(xg, axis=1, keepdims=True)
    cmean = jnp.mean(xg, axis=1, keepdims=True)
    comp = jnp.concatenate([cmax, cmean], axis=1)  # (B, 2, H, W)
    conv = jax.lax.conv_general_dilated(
        comp, conv_w[None], window_strides=(1, 1),
        padding=((PAD, PAD), (PAD, PAD)),
        dimension_numbers=('NCHW', 'OIHW', 'NCHW'))
    conv = conv + conv_b[0, 0]
    return xg * jax.nn.sigmoid(conv)


if __name__ == "__main__":
    key = jax.random.PRNGKey(0)
    ks = jax.random.split(key, 7)
    B, C, H, W = 2, 32, 16, 16          # gate_channels=32 so C//16 = 2
    Cr = C // 16

    x = jax.random.normal(ks[0], (B, C, H, W), dtype=jnp.float32)
    w1 = jax.random.normal(ks[1], (Cr, C), dtype=jnp.float32) * 0.2
    b1 = jax.random.normal(ks[2], (Cr, 1), dtype=jnp.float32) * 0.1
    w2 = jax.random.normal(ks[3], (C, Cr), dtype=jnp.float32) * 0.2
    b2 = jax.random.normal(ks[4], (C, 1), dtype=jnp.float32) * 0.1
    cw = jax.random.normal(ks[5], (2, KSIZE, KSIZE), dtype=jnp.float32) * 0.1
    cb = jax.random.normal(ks[6], (1, 1), dtype=jnp.float32) * 0.1

    out = cbam_forward(x, w1, b1, w2, b2, cw, cb)
    out = jax.block_until_ready(out)
    assert out.shape == (B, C, H, W), out.shape

    ref = jax.block_until_ready(cbam_ref(x, w1, b1, w2, b2, cw, cb))
    err = float(jnp.max(jnp.abs(out - ref)))
    assert err < 1e-4, err

    print("KERNEL_OK")
</pallas_src>

<mosaic_0001>
module attributes {stable_mosaic.version = 11 : i64} {
  func.func @kernel(%arg0: i32, %arg1: memref<1x32x256xf32, #tpu.memory_space<vmem>>, %arg2: memref<32x2xf32, #tpu.memory_space<vmem>>, %arg3: memref<32x2xf32, #tpu.memory_space<vmem>>, %arg4: memref<32x1xf32, #tpu.memory_space<vmem>>, %arg5: memref<2xf32, #tpu.memory_space<smem>>, %arg6: memref<98xf32, #tpu.memory_space<smem>>, %arg7: memref<1xf32, #tpu.memory_space<smem>>, %arg8: memref<1x32x256xf32, #tpu.memory_space<vmem>>, %arg9: memref<2x24x128xf32, #tpu.memory_space<vmem>>, %arg10: memref<1x256xf32, #tpu.memory_space<vmem>>) attributes {dimension_semantics = [#tpu.dimension_semantics<parallel>], iteration_bounds = array<i64: 2>, scalar_prefetch = 0 : i64, scratch_operands = 2 : i64, tpu.core_type = #tpu.core_type<tc>, window_params = [{transform_indices = @transform_0, window_bounds = array<i64: 1, 32, 256>}, {pipeline_mode = #tpu.pipeline_mode<synchronous>, transform_indices = @transform_1, window_bounds = array<i64: 32, 2>}, {pipeline_mode = #tpu.pipeline_mode<synchronous>, transform_indices = @transform_2, window_bounds = array<i64: 32, 2>}, {pipeline_mode = #tpu.pipeline_mode<synchronous>, transform_indices = @transform_3, window_bounds = array<i64: 32, 1>}, {transform_indices = @transform_4, window_bounds = array<i64: 2>}, {transform_indices = @transform_5, window_bounds = array<i64: 98>}, {transform_indices = @transform_6, window_bounds = array<i64: 1>}, {transform_indices = @transform_7, window_bounds = array<i64: 1, 32, 256>}]} {
    %c0 = arith.constant 0 : index
    %c0_0 = arith.constant 0 : index
    %c0_1 = arith.constant 0 : index
    %0 = vector.load %arg1[%c0, %c0_0, %c0_1] : memref<1x32x256xf32, #tpu.memory_space<vmem>>, vector<1x32x256xf32>
    %1 = vector.shape_cast %0 : vector<1x32x256xf32> to vector<32x256xf32>
    %cst = arith.constant dense<0.000000e+00> : vector<32xf32>
    %2 = vector.multi_reduction <add>, %1, %cst [1] : vector<32x256xf32> to vector<32xf32>
    %3 = vector.shape_cast %2 : vector<32xf32> to vector<32x1xf32>
    %cst_2 = arith.constant 3.906250e-03 : f32
    %4 = vector.broadcast %cst_2 : f32 to vector<32x1xf32>
    %5 = arith.mulf %3, %4 : vector<32x1xf32>
    %cst_3 = arith.constant dense<0xFF800000> : vector<32xf32>
    %6 = vector.multi_reduction <maximumf>, %1, %cst_3 [1] : vector<32x256xf32> to vector<32xf32>
    %7 = vector.shape_cast %6 : vector<32xf32> to vector<32x1xf32>
    %8 = tpu.concatenate %5, %7 in 1 : vector<32x1xf32>, vector<32x1xf32> -> vector<32x2xf32>
    %c0_4 = arith.constant 0 : index
    %c0_5 = arith.constant 0 : index
    %9 = vector.load %arg2[%c0_4, %c0_5] : memref<32x2xf32, #tpu.memory_space<vmem>>, vector<32x2xf32>
    %c0_6 = arith.constant 0 : index
    %c0_7 = arith.constant 0 : index
    %10 = vector.load %arg3[%c0_6, %c0_7] : memref<32x2xf32, #tpu.memory_space<vmem>>, vector<32x2xf32>
    %cst_8 = arith.constant 0.000000e+00 : f32
    %11 = vector.broadcast %cst_8 : f32 to vector<32x2xf32>
    %c0_9 = arith.constant 0 : index
    %c0_10 = arith.constant 0 : index
    %12 = vector.load %arg4[%c0_9, %c0_10] : memref<32x1xf32, #tpu.memory_space<vmem>>, vector<32x1xf32>
    %13 = vector.broadcast %12 : vector<32x1xf32> to vector<32x2xf32>
    %14 = arith.addf %11, %13 : vector<32x2xf32>
    %15 = vector.extract_strided_slice %9 {offsets = [0, 0], sizes = [32, 1], strides = [1, 1]} : vector<32x2xf32> to vector<32x1xf32>
    %16 = vector.broadcast %15 : vector<32x1xf32> to vector<32x2xf32>
    %17 = arith.mulf %16, %8 : vector<32x2xf32>
    %cst_11 = arith.constant dense<0.000000e+00> : vector<2xf32>
    %18 = vector.multi_reduction <add>, %17, %cst_11 [0] : vector<32x2xf32> to vector<2xf32>
    %19 = vector.shape_cast %18 : vector<2xf32> to vector<1x2xf32>
    %c0_12 = arith.constant 0 : index
    %20 = memref.load %arg5[%c0_12] : memref<2xf32, #tpu.memory_space<smem>>
    %21 = vector.broadcast %20 : f32 to vector<1x2xf32>
    %22 = arith.addf %19, %21 : vector<1x2xf32>
    %cst_13 = arith.constant 0.000000e+00 : f32
    %23 = vector.broadcast %cst_13 : f32 to vector<1x2xf32>
    %24 = arith.maximumf %22, %23 : vector<1x2xf32>
    %25 = vector.extract_strided_slice %10 {offsets = [0, 0], sizes = [32, 1], strides = [1, 1]} : vector<32x2xf32> to vector<32x1xf32>
    %26 = vector.broadcast %25 : vector<32x1xf32> to vector<32x2xf32>
    %27 = vector.broadcast %24 : vector<1x2xf32> to vector<32x2xf32>
    %28 = arith.mulf %26, %27 : vector<32x2xf32>
    %29 = arith.addf %14, %28 : vector<32x2xf32>
    %30 = vector.extract_strided_slice %9 {offsets = [0, 1], sizes = [32, 1], strides = [1, 1]} : vector<32x2xf32> to vector<32x1xf32>
    %31 = vector.broadcast %30 : vector<32x1xf32> to vector<32x2xf32>
    %32 = arith.mulf %31, %8 : vector<32x2xf32>
    %cst_14 = arith.constant dense<0.000000e+00> : vector<2xf32>
    %33 = vector.multi_reduction <add>, %32, %cst_14 [0] : vector<32x2xf32> to vector<2xf32>
    %34 = vector.shape_cast %33 : vector<2xf32> to vector<1x2xf32>
    %c1 = arith.constant 1 : index
    %35 = memref.load %arg5[%c1] : memref<2xf32, #tpu.memory_space<smem>>
    %36 = vector.broadcast %35 : f32 to vector<1x2xf32>
    %37 = arith.addf %34, %36 : vector<1x2xf32>
    %cst_15 = arith.constant 0.000000e+00 : f32
    %38 = vector.broadcast %cst_15 : f32 to vector<1x2xf32>
    %39 = arith.maximumf %37, %38 : vector<1x2xf32>
    %40 = vector.extract_strided_slice %10 {offsets = [0, 1], sizes = [32, 1], strides = [1, 1]} : vector<32x2xf32> to vector<32x1xf32>
    %41 = vector.broadcast %40 : vector<32x1xf32> to vector<32x2xf32>
    %42 = vector.broadcast %39 : vector<1x2xf32> to vector<32x2xf32>
    %43 = arith.mulf %41, %42 : vector<32x2xf32>
    %44 = arith.addf %29, %43 : vector<32x2xf32>
    %45 = vector.extract_strided_slice %44 {offsets = [0, 0], sizes = [32, 1], strides = [1, 1]} : vector<32x2xf32> to vector<32x1xf32>
    %46 = vector.extract_strided_slice %44 {offsets = [0, 1], sizes = [32, 1], strides = [1, 1]} : vector<32x2xf32> to vector<32x1xf32>
    %47 = arith.addf %45, %46 : vector<32x1xf32>
    %48 = arith.negf %47 : vector<32x1xf32>
    %49 = math.exp %48 : vector<32x1xf32>
    %cst_16 = arith.constant 1.000000e+00 : f32
    %50 = vector.broadcast %cst_16 : f32 to vector<32x1xf32>
    %51 = arith.addf %50, %49 : vector<32x1xf32>
    %52 = arith.divf %50, %51 : vector<32x1xf32>
    %53 = vector.broadcast %52 : vector<32x1xf32> to vector<32x256xf32>
    %54 = arith.mulf %1, %53 : vector<32x256xf32>
    %cst_17 = arith.constant dense<0xFF800000> : vector<256xf32>
    %55 = vector.multi_reduction <maximumf>, %54, %cst_17 [0] : vector<32x256xf32> to vector<256xf32>
    %56 = vector.shape_cast %55 : vector<256xf32> to vector<1x256xf32>
    %cst_18 = arith.constant dense<0.000000e+00> : vector<256xf32>
    %57 = vector.multi_reduction <add>, %54, %cst_18 [0] : vector<32x256xf32> to vector<256xf32>
    %58 = vector.shape_cast %57 : vector<256xf32> to vector<1x256xf32>
    %cst_19 = arith.constant 3.125000e-02 : f32
    %59 = vector.broadcast %cst_19 : f32 to vector<1x256xf32>
    %60 = arith.mulf %58, %59 : vector<1x256xf32>
    %cst_20 = arith.constant 0.000000e+00 : f32
    %61 = vector.broadcast %cst_20 : f32 to vector<2x24x128xf32>
    %c0_21 = arith.constant 0 : index
    %c0_22 = arith.constant 0 : index
    %c0_23 = arith.constant 0 : index
    %62 = vector.load %arg9[%c0_21, %c0_22, %c0_23] : memref<2x24x128xf32, #tpu.memory_space<vmem>>, vector<2x24x128xf32>
    tpu.vector_store %arg9[%c0_21, %c0_22, %c0_23], %61 {strides = array<i32>} : memref<2x24x128xf32, #tpu.memory_space<vmem>>, vector<2x24x128xf32>,
    %63 = vector.extract_strided_slice %56 {offsets = [0, 0], sizes = [1, 16], strides = [1, 1]} : vector<1x256xf32> to vector<1x16xf32>
    %c0_24 = arith.constant 0 : index
    %c3 = arith.constant 3 : index
    %c3_25 = arith.constant 3 : index
    %64 = vector.load %arg9[%c0_24, %c3, %c3_25] : memref<2x24x128xf32, #tpu.memory_space<vmem>>, vector<1x1x16xf32>
    %65 = vector.shape_cast %64 : vector<1x1x16xf32> to vector<1x16xf32>
    %66 = vector.shape_cast %63 : vector<1x16xf32> to vector<1x1x16xf32>
    tpu.vector_store %arg9[%c0_24, %c3, %c3_25], %66 {strides = array<i32>} : memref<2x24x128xf32, #tpu.memory_space<vmem>>, vector<1x1x16xf32>,
    %67 = vector.extract_strided_slice %60 {offsets = [0, 0], sizes = [1, 16], strides = [1, 1]} : vector<1x256xf32> to vector<1x16xf32>
    %c1_26 = arith.constant 1 : index
    %c3_27 = arith.constant 3 : index
    %c3_28 = arith.constant 3 : index
    %68 = vector.load %arg9[%c1_26, %c3_27, %c3_28] : memref<2x24x128xf32, #tpu.memory_space<vmem>>, vector<1x1x16xf32>
    %69 = vector.shape_cast %68 : vector<1x1x16xf32> to vector<1x16xf32>
    %70 = vector.shape_cast %67 : vector<1x16xf32> to vector<1x1x16xf32>
    tpu.vector_store %arg9[%c1_26, %c3_27, %c3_28], %70 {strides = array<i32>} : memref<2x24x128xf32, #tpu.memory_space<vmem>>, vector<1x1x16xf32>,
    %71 = vector.extract_strided_slice %56 {offsets = [0, 16], sizes = [1, 16], strides = [1, 1]} : vector<1x256xf32> to vector<1x16xf32>
    %c0_29 = arith.constant 0 : index
    %c4 = arith.constant 4 : index
    %c3_30 = arith.constant 3 : index
    %72 = vector.load %arg9[%c0_29, %c4, %c3_30] : memref<2x24x128xf32, #tpu.memory_space<vmem>>, vector<1x1x16xf32>
    %73 = vector.shape_cast %72 : vector<1x1x16xf32> to vector<1x16xf32>
    %74 = vector.shape_cast %71 : vector<1x16xf32> to vector<1x1x16xf32>
    tpu.vector_store %arg9[%c0_29, %c4, %c3_30], %74 {strides = array<i32>} : memref<2x24x128xf32, #tpu.memory_space<vmem>>, vector<1x1x16xf32>,
    %75 = vector.extract_strided_slice %60 {offsets = [0, 16], sizes = [1, 16], strides = [1, 1]} : vector<1x256xf32> to vector<1x16xf32>
    %c1_31 = arith.constant 1 : index
    %c4_32 = arith.constant 4 : index
    %c3_33 = arith.constant 3 : index
    %76 = vector.load %arg9[%c1_31, %c4_32, %c3_33] : memref<2x24x128xf32, #tpu.memory_space<vmem>>, vector<1x1x16xf32>
    %77 = vector.shape_cast %76 : vector<1x1x16xf32> to vector<1x16xf32>
    %78 = vector.shape_cast %75 : vector<1x16xf32> to vector<1x1x16xf32>
    tpu.vector_store %arg9[%c1_31, %c4_32, %c3_33], %78 {strides = array<i32>} : memref<2x24x128xf32, #tpu.memory_space<vmem>>, vector<1x1x16xf32>,
    %79 = vector.extract_strided_slice %56 {offsets = [0, 32], sizes = [1, 16], strides = [1, 1]} : vector<1x256xf32> to vector<1x16xf32>
    %c0_34 = arith.constant 0 : index
    %c5 = arith.constant 5 : index
    %c3_35 = arith.constant 3 : index
    %80 = vector.load %arg9[%c0_34, %c5, %c3_35] : memref<2x24x128xf32, #tpu.memory_space<vmem>>, vector<1x1x16xf32>
    %81 = vector.shape_cast %80 : vector<1x1x16xf32> to vector<1x16xf32>
    %82 = vector.shape_cast %79 : vector<1x16xf32> to vector<1x1x16xf32>
    tpu.vector_store %arg9[%c0_34, %c5, %c3_35], %82 {strides = array<i32>} : memref<2x24x128xf32, #tpu.memory_space<vmem>>, vector<1x1x16xf32>,
    %83 = vector.extract_strided_slice %60 {offsets = [0, 32], sizes = [1, 16], strides = [1, 1]} : vector<1x256xf32> to vector<1x16xf32>
    %c1_36 = arith.constant 1 : index
    %c5_37 = arith.constant 5 : index
    %c3_38 = arith.constant 3 : index
    %84 = vector.load %arg9[%c1_36, %c5_37, %c3_38] : memref<2x24x128xf32, #tpu.memory_space<vmem>>, vector<1x1x16xf32>
    %85 = vector.shape_cast %84 : vector<1x1x16xf32> to vector<1x16xf32>
    %86 = vector.shape_cast %83 : vector<1x16xf32> to vector<1x1x16xf32>
    tpu.vector_store %arg9[%c1_36, %c5_37, %c3_38], %86 {strides = array<i32>} : memref<2x24x128xf32, #tpu.memory_space<vmem>>, vector<1x1x16xf32>,
    %87 = vector.extract_strided_slice %56 {offsets = [0, 48], sizes = [1, 16], strides = [1, 1]} : vector<1x256xf32> to vector<1x16xf32>
    %c0_39 = arith.constant 0 : index
    %c6 = arith.constant 6 : index
    %c3_40 = arith.constant 3 : index
    %88 = vector.load %arg9[%c0_39, %c6, %c3_40] : memref<2x24x128xf32, #tpu.memory_space<vmem>>, vector<1x1x16xf32>
    %89 = vector.shape_cast %88 : vector<1x1x16xf32> to vector<1x16xf32>
    %90 = vector.shape_cast %87 : vector<1x16xf32> to vector<1x1x16xf32>
    tpu.vector_store %arg9[%c0_39, %c6, %c3_40], %90 {strides = array<i32>} : memref<2x24x128xf32, #tpu.memory_space<vmem>>, vector<1x1x16xf32>,
    %91 = vector.extract_strided_slice %60 {offsets = [0, 48], sizes = [1, 16], strides = [1, 1]} : vector<1x256xf32> to vector<1x16xf32>
    %c1_41 = arith.constant 1 : index
    %c6_42 = arith.constant 6 : index
    %c3_43 = arith.constant 3 : index
    %92 = vector.load %arg9[%c1_41, %c6_42, %c3_43] : memref<2x24x128xf32, #tpu.memory_space<vmem>>, vector<1x1x16xf32>
    %93 = vector.shape_cast %92 : vector<1x1x16xf32> to vector<1x16xf32>
    %94 = vector.shape_cast %91 : vector<1x16xf32> to vector<1x1x16xf32>
    tpu.vector_store %arg9[%c1_41, %c6_42, %c3_43], %94 {strides = array<i32>} : memref<2x24x128xf32, #tpu.memory_space<vmem>>, vector<1x1x16xf32>,
    %95 = vector.extract_strided_slice %56 {offsets = [0, 64], sizes = [1, 16], strides = [1, 1]} : vector<1x256xf32> to vector<1x16xf32>
    %c0_44 = arith.constant 0 : index
    %c7 = arith.constant 7 : index
    %c3_45 = arith.constant 3 : index
    %96 = vector.load %arg9[%c0_44, %c7, %c3_45] : memref<2x24x128xf32, #tpu.memory_space<vmem>>, vector<1x1x16xf32>
    %97 = vector.shape_cast %96 : vector<1x1x16xf32> to vector<1x16xf32>
    %98 = vector.shape_cast %95 : vector<1x16xf32> to vector<1x1x16xf32>
    tpu.vector_store %arg9[%c0_44, %c7, %c3_45], %98 {strides = array<i32>} : memref<2x24x128xf32, #tpu.memory_space<vmem>>, vector<1x1x16xf32>,
    %99 = vector.extract_strided_slice %60 {offsets = [0, 64], sizes = [1, 16], strides = [1, 1]} : vector<1x256xf32> to vector<1x16xf32>
    %c1_46 = arith.constant 1 : index
    %c7_47 = arith.constant 7 : index
    %c3_48 = arith.constant 3 : index
    %100 = vector.load %arg9[%c1_46, %c7_47, %c3_48] : memref<2x24x128xf32, #tpu.memory_space<vmem>>, vector<1x1x16xf32>
    %101 = vector.shape_cast %100 : vector<1x1x16xf32> to vector<1x16xf32>
    %102 = vector.shape_cast %99 : vector<1x16xf32> to vector<1x1x16xf32>
    tpu.vector_store %arg9[%c1_46, %c7_47, %c3_48], %102 {strides = array<i32>} : memref<2x24x128xf32, #tpu.memory_space<vmem>>, vector<1x1x16xf32>,
    %103 = vector.extract_strided_slice %56 {offsets = [0, 80], sizes = [1, 16], strides = [1, 1]} : vector<1x256xf32> to vector<1x16xf32>
    %c0_49 = arith.constant 0 : index
    %c8 = arith.constant 8 : index
    %c3_50 = arith.constant 3 : index
    %104 = vector.load %arg9[%c0_49, %c8, %c3_50] : memref<2x24x128xf32, #tpu.memory_space<vmem>>, vector<1x1x16xf32>
    %105 = vector.shape_cast %104 : vector<1x1x16xf32> to vector<1x16xf32>
    %106 = vector.shape_cast %103 : vector<1x16xf32> to vector<1x1x16xf32>
    tpu.vector_store %arg9[%c0_49, %c8, %c3_50], %106 {strides = array<i32>} : memref<2x24x128xf32, #tpu.memory_space<vmem>>, vector<1x1x16xf32>,
    %107 = vector.extract_strided_slice %60 {offsets = [0, 80], sizes = [1, 16], strides = [1, 1]} : vector<1x256xf32> to vector<1x16xf32>
    %c1_51 = arith.constant 1 : index
    %c8_52 = arith.constant 8 : index
    %c3_53 = arith.constant 3 : index
    %108 = vector.load %arg9[%c1_51, %c8_52, %c3_53] : memref<2x24x128xf32, #tpu.memory_space<vmem>>, vector<1x1x16xf32>
    %109 = vector.shape_cast %108 : vector<1x1x16xf32> to vector<1x16xf32>
    %110 = vector.shape_cast %107 : vector<1x16xf32> to vector<1x1x16xf32>
    tpu.vector_store %arg9[%c1_51, %c8_52, %c3_53], %110 {strides = array<i32>} : memref<2x24x128xf32, #tpu.memory_space<vmem>>, vector<1x1x16xf32>,
    %111 = vector.extract_strided_slice %56 {offsets = [0, 96], sizes = [1, 16], strides = [1, 1]} : vector<1x256xf32> to vector<1x16xf32>
    %c0_54 = arith.constant 0 : index
    %c9 = arith.constant 9 : index
    %c3_55 = arith.constant 3 : index
    %112 = vector.load %arg9[%c0_54, %c9, %c3_55] : memref<2x24x128xf32, #tpu.memory_space<vmem>>, vector<1x1x16xf32>
    %113 = vector.shape_cast %112 : vector<1x1x16xf32> to vector<1x16xf32>
    %114 = vector.shape_cast %111 : vector<1x16xf32> to vector<1x1x16xf32>
    tpu.vector_store %arg9[%c0_54, %c9, %c3_55], %114 {strides = array<i32>} : memref<2x24x128xf32, #tpu.memory_space<vmem>>, vector<1x1x16xf32>,
    %115 = vector.extract_strided_slice %60 {offsets = [0, 96], sizes = [1, 16], strides = [1, 1]} : vector<1x256xf32> to vector<1x16xf32>
    %c1_56 = arith.constant 1 : index
    %c9_57 = arith.constant 9 : index
    %c3_58 = arith.constant 3 : index
    %116 = vector.load %arg9[%c1_56, %c9_57, %c3_58] : memref<2x24x128xf32, #tpu.memory_space<vmem>>, vector<1x1x16xf32>
    %117 = vector.shape_cast %116 : vector<1x1x16xf32> to vector<1x16xf32>
    %118 = vector.shape_cast %115 : vector<1x16xf32> to vector<1x1x16xf32>
    tpu.vector_store %arg9[%c1_56, %c9_57, %c3_58], %118 {strides = array<i32>} : memref<2x24x128xf32, #tpu.memory_space<vmem>>, vector<1x1x16xf32>,
    %119 = vector.extract_strided_slice %56 {offsets = [0, 112], sizes = [1, 16], strides = [1, 1]} : vector<1x256xf32> to vector<1x16xf32>
    %c0_59 = arith.constant 0 : index
    %c10 = arith.constant 10 : index
    %c3_60 = arith.constant 3 : index
    %120 = vector.load %arg9[%c0_59, %c10, %c3_60] : memref<2x24x128xf32, #tpu.memory_space<vmem>>, vector<1x1x16xf32>
    %121 = vector.shape_cast %120 : vector<1x1x16xf32> to vector<1x16xf32>
    %122 = vector.shape_cast %119 : vector<1x16xf32> to vector<1x1x16xf32>
    tpu.vector_store %arg9[%c0_59, %c10, %c3_60], %122 {strides = array<i32>} : memref<2x24x128xf32, #tpu.memory_space<vmem>>, vector<1x1x16xf32>,
    %123 = vector.extract_strided_slice %60 {offsets = [0, 112], sizes = [1, 16], strides = [1, 1]} : vector<1x256xf32> to vector<1x16xf32>
    %c1_61 = arith.constant 1 : index
    %c10_62 = arith.constant 10 : index
    %c3_63 = arith.constant 3 : index
    %124 = vector.load %arg9[%c1_61, %c10_62, %c3_63] : memref<2x24x128xf32, #tpu.memory_space<vmem>>, vector<1x1x16xf32>
    %125 = vector.shape_cast %124 : vector<1x1x16xf32> to vector<1x16xf32>
    %126 = vector.shape_cast %123 : vector<1x16xf32> to vector<1x1x16xf32>
    tpu.vector_store %arg9[%c1_61, %c10_62, %c3_63], %126 {strides = array<i32>} : memref<2x24x128xf32, #tpu.memory_space<vmem>>, vector<1x1x16xf32>,
    %127 = vector.extract_strided_slice %56 {offsets = [0, 128], sizes = [1, 16], strides = [1, 1]} : vector<1x256xf32> to vector<1x16xf32>
    %c0_64 = arith.constant 0 : index
    %c11 = arith.constant 11 : index
    %c3_65 = arith.constant 3 : index
    %128 = vector.load %arg9[%c0_64, %c11, %c3_65] : memref<2x24x128xf32, #tpu.memory_space<vmem>>, vector<1x1x16xf32>
    %129 = vector.shape_cast %128 : vector<1x1x16xf32> to vector<1x16xf32>
    %130 = vector.shape_cast %127 : vector<1x16xf32> to vector<1x1x16xf32>
    tpu.vector_store %arg9[%c0_64, %c11, %c3_65], %130 {strides = array<i32>} : memref<2x24x128xf32, #tpu.memory_space<vmem>>, vector<1x1x16xf32>,
    %131 = vector.extract_strided_slice %60 {offsets = [0, 128], sizes = [1, 16], strides = [1, 1]} : vector<1x256xf32> to vector<1x16xf32>
    %c1_66 = arith.constant 1 : index
    %c11_67 = arith.constant 11 : index
    %c3_68 = arith.constant 3 : index
    %132 = vector.load %arg9[%c1_66, %c11_67, %c3_68] : memref<2x24x128xf32, #tpu.memory_space<vmem>>, vector<1x1x16xf32>
    %133 = vector.shape_cast %132 : vector<1x1x16xf32> to vector<1x16xf32>
    %134 = vector.shape_cast %131 : vector<1x16xf32> to vector<1x1x16xf32>
    tpu.vector_store %arg9[%c1_66, %c11_67, %c3_68], %134 {strides = array<i32>} : memref<2x24x128xf32, #tpu.memory_space<vmem>>, vector<1x1x16xf32>,
    %135 = vector.extract_strided_slice %56 {offsets = [0, 144], sizes = [1, 16], strides = [1, 1]} : vector<1x256xf32> to vector<1x16xf32>
    %c0_69 = arith.constant 0 : index
    %c12 = arith.constant 12 : index
    %c3_70 = arith.constant 3 : index
    %136 = vector.load %arg9[%c0_69, %c12, %c3_70] : memref<2x24x128xf32, #tpu.memory_space<vmem>>, vector<1x1x16xf32>
    %137 = vector.shape_cast %136 : vector<1x1x16xf32> to vector<1x16xf32>
    %138 = vector.shape_cast %135 : vector<1x16xf32> to vector<1x1x16xf32>
    tpu.vector_store %arg9[%c0_69, %c12, %c3_70], %138 {strides = array<i32>} : memref<2x24x128xf32, #tpu.memory_space<vmem>>, vector<1x1x16xf32>,
    %139 = vector.extract_strided_slice %60 {offsets = [0, 144], sizes = [1, 16], strides = [1, 1]} : vector<1x256xf32> to vector<1x16xf32>
    %c1_71 = arith.constant 1 : index
    %c12_72 = arith.constant 12 : index
    %c3_73 = arith.constant 3 : index
    %140 = vector.load %arg9[%c1_71, %c12_72, %c3_73] : memref<2x24x128xf32, #tpu.memory_space<vmem>>, vector<1x1x16xf32>
    %141 = vector.shape_cast %140 : vector<1x1x16xf32> to vector<1x16xf32>
    %142 = vector.shape_cast %139 : vector<1x16xf32> to vector<1x1x16xf32>
    tpu.vector_store %arg9[%c1_71, %c12_72, %c3_73], %142 {strides = array<i32>} : memref<2x24x128xf32, #tpu.memory_space<vmem>>, vector<1x1x16xf32>,
    %143 = vector.extract_strided_slice %56 {offsets = [0, 160], sizes = [1, 16], strides = [1, 1]} : vector<1x256xf32> to vector<1x16xf32>
    %c0_74 = arith.constant 0 : index
    %c13 = arith.constant 13 : index
    %c3_75 = arith.constant 3 : index
    %144 = vector.load %arg9[%c0_74, %c13, %c3_75] : memref<2x24x128xf32, #tpu.memory_space<vmem>>, vector<1x1x16xf32>
    %145 = vector.shape_cast %144 : vector<1x1x16xf32> to vector<1x16xf32>
    %146 = vector.shape_cast %143 : vector<1x16xf32> to vector<1x1x16xf32>
    tpu.vector_store %arg9[%c0_74, %c13, %c3_75], %146 {strides = array<i32>} : memref<2x24x128xf32, #tpu.memory_space<vmem>>, vector<1x1x16xf32>,
    %147 = vector.extract_strided_slice %60 {offsets = [0, 160], sizes = [1, 16], strides = [1, 1]} : vector<1x256xf32> to vector<1x16xf32>
    %c1_76 = arith.constant 1 : index
    %c13_77 = arith.constant 13 : index
    %c3_78 = arith.constant 3 : index
    %148 = vector.load %arg9[%c1_76, %c13_77, %c3_78] : memref<2x24x128xf32, #tpu.memory_space<vmem>>, vector<1x1x16xf32>
    %149 = vector.shape_cast %148 : vector<1x1x16xf32> to vector<1x16xf32>
    %150 = vector.shape_cast %147 : vector<1x16xf32> to vector<1x1x16xf32>
    tpu.vector_store %arg9[%c1_76, %c13_77, %c3_78], %150 {strides = array<i32>} : memref<2x24x128xf32, #tpu.memory_space<vmem>>, vector<1x1x16xf32>,
    %151 = vector.extract_strided_slice %56 {offsets = [0, 176], sizes = [1, 16], strides = [1, 1]} : vector<1x256xf32> to vector<1x16xf32>
    %c0_79 = arith.constant 0 : index
    %c14 = arith.constant 14 : index
    %c3_80 = arith.constant 3 : index
    %152 = vector.load %arg9[%c0_79, %c14, %c3_80] : memref<2x24x128xf32, #tpu.memory_space<vmem>>, vector<1x1x16xf32>
    %153 = vector.shape_cast %152 : vector<1x1x16xf32> to vector<1x16xf32>
    %154 = vector.shape_cast %151 : vector<1x16xf32> to vector<1x1x16xf32>
    tpu.vector_store %arg9[%c0_79, %c14, %c3_80], %154 {strides = array<i32>} : memref<2x24x128xf32, #tpu.memory_space<vmem>>, vector<1x1x16xf32>,
    %155 = vector.extract_strided_slice %60 {offsets = [0, 176], sizes = [1, 16], strides = [1, 1]} : vector<1x256xf32> to vector<1x16xf32>
    %c1_81 = arith.constant 1 : index
    %c14_82 = arith.constant 14 : index
    %c3_83 = arith.constant 3 : index
    %156 = vector.load %arg9[%c1_81, %c14_82, %c3_83] : memref<2x24x128xf32, #tpu.memory_space<vmem>>, vector<1x1x16xf32>
    %157 = vector.shape_cast %156 : vector<1x1x16xf32> to vector<1x16xf32>
    %158 = vector.shape_cast %155 : vector<1x16xf32> to vector<1x1x16xf32>
    tpu.vector_store %arg9[%c1_81, %c14_82, %c3_83], %158 {strides = array<i32>} : memref<2x24x128xf32, #tpu.memory_space<vmem>>, vector<1x1x16xf32>,
    %159 = vector.extract_strided_slice %56 {offsets = [0, 192], sizes = [1, 16], strides = [1, 1]} : vector<1x256xf32> to vector<1x16xf32>
    %c0_84 = arith.constant 0 : index
    %c15 = arith.constant 15 : index
    %c3_85 = arith.constant 3 : index
    %160 = vector.load %arg9[%c0_84, %c15, %c3_85] : memref<2x24x128xf32, #tpu.memory_space<vmem>>, vector<1x1x16xf32>
    %161 = vector.shape_cast %160 : vector<1x1x16xf32> to vector<1x16xf32>
    %162 = vector.shape_cast %159 : vector<1x16xf32> to vector<1x1x16xf32>
    tpu.vector_store %arg9[%c0_84, %c15, %c3_85], %162 {strides = array<i32>} : memref<2x24x128xf32, #tpu.memory_space<vmem>>, vector<1x1x16xf32>,
    %163 = vector.extract_strided_slice %60 {offsets = [0, 192], sizes = [1, 16], strides = [1, 1]} : vector<1x256xf32> to vector<1x16xf32>
    %c1_86 = arith.constant 1 : index
    %c15_87 = arith.constant 15 : index
    %c3_88 = arith.constant 3 : index
    %164 = vector.load %arg9[%c1_86, %c15_87, %c3_88] : memref<2x24x128xf32, #tpu.memory_space<vmem>>, vector<1x1x16xf32>
    %165 = vector.shape_cast %164 : vector<1x1x16xf32> to vector<1x16xf32>
    %166 = vector.shape_cast %163 : vector<1x16xf32> to vector<1x1x16xf32>
    tpu.vector_store %arg9[%c1_86, %c15_87, %c3_88], %166 {strides = array<i32>} : memref<2x24x128xf32, #tpu.memory_space<vmem>>, vector<1x1x16xf32>,
    %167 = vector.extract_strided_slice %56 {offsets = [0, 208], sizes = [1, 16], strides = [1, 1]} : vector<1x256xf32> to vector<1x16xf32>
    %c0_89 = arith.constant 0 : index
    %c16 = arith.constant 16 : index
    %c3_90 = arith.constant 3 : index
    %168 = vector.load %arg9[%c0_89, %c16, %c3_90] : memref<2x24x128xf32, #tpu.memory_space<vmem>>, vector<1x1x16xf32>
    %169 = vector.shape_cast %168 : vector<1x1x16xf32> to vector<1x16xf32>
    %170 = vector.shape_cast %167 : vector<1x16xf32> to vector<1x1x16xf32>
    tpu.vector_store %arg9[%c0_89, %c16, %c3_90], %170 {strides = array<i32>} : memref<2x24x128xf32, #tpu.memory_space<vmem>>, vector<1x1x16xf32>,
    %171 = vector.extract_strided_slice %60 {offsets = [0, 208], sizes = [1, 16], strides = [1, 1]} : vector<1x256xf32> to vector<1x16xf32>
    %c1_91 = arith.constant 1 : index
    %c16_92 = arith.constant 16 : index
    %c3_93 = arith.constant 3 : index
    %172 = vector.load %arg9[%c1_91, %c16_92, %c3_93] : memref<2x24x128xf32, #tpu.memory_space<vmem>>, vector<1x1x16xf32>
    %173 = vector.shape_cast %172 : vector<1x1x16xf32> to vector<1x16xf32>
    %174 = vector.shape_cast %171 : vector<1x16xf32> to vector<1x1x16xf32>
    tpu.vector_store %arg9[%c1_91, %c16_92, %c3_93], %174 {strides = array<i32>} : memref<2x24x128xf32, #tpu.memory_space<vmem>>, vector<1x1x16xf32>,
    %175 = vector.extract_strided_slice %56 {offsets = [0, 224], sizes = [1, 16], strides = [1, 1]} : vector<1x256xf32> to vector<1x16xf32>
    %c0_94 = arith.constant 0 : index
    %c17 = arith.constant 17 : index
    %c3_95 = arith.constant 3 : index
    %176 = vector.load %arg9[%c0_94, %c17, %c3_95] : memref<2x24x128xf32, #tpu.memory_space<vmem>>, vector<1x1x16xf32>
    %177 = vector.shape_cast %176 : vector<1x1x16xf32> to vector<1x16xf32>
    %178 = vector.shape_cast %175 : vector<1x16xf32> to vector<1x1x16xf32>
    tpu.vector_store %arg9[%c0_94, %c17, %c3_95], %178 {strides = array<i32>} : memref<2x24x128xf32, #tpu.memory_space<vmem>>, vector<1x1x16xf32>,
    %179 = vector.extract_strided_slice %60 {offsets = [0, 224], sizes = [1, 16], strides = [1, 1]} : vector<1x256xf32> to vector<1x16xf32>
    %c1_96 = arith.constant 1 : index
    %c17_97 = arith.constant 17 : index
    %c3_98 = arith.constant 3 : index
    %180 = vector.load %arg9[%c1_96, %c17_97, %c3_98] : memref<2x24x128xf32, #tpu.memory_space<vmem>>, vector<1x1x16xf32>
    %181 = vector.shape_cast %180 : vector<1x1x16xf32> to vector<1x16xf32>
    %182 = vector.shape_cast %179 : vector<1x16xf32> to vector<1x1x16xf32>
    tpu.vector_store %arg9[%c1_96, %c17_97, %c3_98], %182 {strides = array<i32>} : memref<2x24x128xf32, #tpu.memory_space<vmem>>, vector<1x1x16xf32>,
    %183 = vector.extract_strided_slice %56 {offsets = [0, 240], sizes = [1, 16], strides = [1, 1]} : vector<1x256xf32> to vector<1x16xf32>
    %c0_99 = arith.constant 0 : index
    %c18 = arith.constant 18 : index
    %c3_100 = arith.constant 3 : index
    %184 = vector.load %arg9[%c0_99, %c18, %c3_100] : memref<2x24x128xf32, #tpu.memory_space<vmem>>, vector<1x1x16xf32>
    %185 = vector.shape_cast %184 : vector<1x1x16xf32> to vector<1x16xf32>
    %186 = vector.shape_cast %183 : vector<1x16xf32> to vector<1x1x16xf32>
    tpu.vector_store %arg9[%c0_99, %c18, %c3_100], %186 {strides = array<i32>} : memref<2x24x128xf32, #tpu.memory_space<vmem>>, vector<1x1x16xf32>,
    %187 = vector.extract_strided_slice %60 {offsets = [0, 240], sizes = [1, 16], strides = [1, 1]} : vector<1x256xf32> to vector<1x16xf32>
    %c1_101 = arith.constant 1 : index
    %c18_102 = arith.constant 18 : index
    %c3_103 = arith.constant 3 : index
    %188 = vector.load %arg9[%c1_101, %c18_102, %c3_103] : memref<2x24x128xf32, #tpu.memory_space<vmem>>, vector<1x1x16xf32>
    %189 = vector.shape_cast %188 : vector<1x1x16xf32> to vector<1x16xf32>
    %190 = vector.shape_cast %187 : vector<1x16xf32> to vector<1x1x16xf32>
    tpu.vector_store %arg9[%c1_101, %c18_102, %c3_103], %190 {strides = array<i32>} : memref<2x24x128xf32, #tpu.memory_space<vmem>>, vector<1x1x16xf32>,
    %c0_104 = arith.constant 0 : index
    %c0_105 = arith.constant 0 : index
    %c0_106 = arith.constant 0 : index
    %191 = vector.load %arg9[%c0_104, %c0_105, %c0_106] : memref<2x24x128xf32, #tpu.memory_space<vmem>>, vector<1x24x16xf32>
    %192 = vector.shape_cast %191 : vector<1x24x16xf32> to vector<24x16xf32>
    %c0_107 = arith.constant 0 : index
    %c0_108 = arith.constant 0 : index
    %c1_109 = arith.constant 1 : index
    %193 = vector.load %arg9[%c0_107, %c0_108, %c1_109] : memref<2x24x128xf32, #tpu.memory_space<vmem>>, vector<1x24x16xf32>
    %194 = vector.shape_cast %193 : vector<1x24x16xf32> to vector<24x16xf32>
    %c0_110 = arith.constant 0 : index
    %c0_111 = arith.constant 0 : index
    %c2 = arith.constant 2 : index
    %195 = vector.load %arg9[%c0_110, %c0_111, %c2] : memref<2x24x128xf32, #tpu.memory_space<vmem>>, vector<1x24x16xf32>
    %196 = vector.shape_cast %195 : vector<1x24x16xf32> to vector<24x16xf32>
    %c0_112 = arith.constant 0 : index
    %c0_113 = arith.constant 0 : index
    %c3_114 = arith.constant 3 : index
    %197 = vector.load %arg9[%c0_112, %c0_113, %c3_114] : memref<2x24x128xf32, #tpu.memory_space<vmem>>, vector<1x24x16xf32>
    %198 = vector.shape_cast %197 : vector<1x24x16xf32> to vector<24x16xf32>
    %c0_115 = arith.constant 0 : index
    %c0_116 = arith.constant 0 : index
    %c4_117 = arith.constant 4 : index
    %199 = vector.load %arg9[%c0_115, %c0_116, %c4_117] : memref<2x24x128xf32, #tpu.memory_space<vmem>>, vector<1x24x16xf32>
    %200 = vector.shape_cast %199 : vector<1x24x16xf32> to vector<24x16xf32>
    %c0_118 = arith.constant 0 : index
    %c0_119 = arith.constant 0 : index
    %c5_120 = arith.constant 5 : index
    %201 = vector.load %arg9[%c0_118, %c0_119, %c5_120] : memref<2x24x128xf32, #tpu.memory_space<vmem>>, vector<1x24x16xf32>
    %202 = vector.shape_cast %201 : vector<1x24x16xf32> to vector<24x16xf32>
    %c0_121 = arith.constant 0 : index
    %c0_122 = arith.constant 0 : index
    %c6_123 = arith.constant 6 : index
    %203 = vector.load %arg9[%c0_121, %c0_122, %c6_123] : memref<2x24x128xf32, #tpu.memory_space<vmem>>, vector<1x24x16xf32>
    %204 = vector.shape_cast %203 : vector<1x24x16xf32> to vector<24x16xf32>
    %c1_124 = arith.constant 1 : index
    %c0_125 = arith.constant 0 : index
    %c0_126 = arith.constant 0 : index
    %205 = vector.load %arg9[%c1_124, %c0_125, %c0_126] : memref<2x24x128xf32, #tpu.memory_space<vmem>>, vector<1x24x16xf32>
    %206 = vector.shape_cast %205 : vector<1x24x16xf32> to vector<24x16xf32>
    %c1_127 = arith.constant 1 : index
    %c0_128 = arith.constant 0 : index
    %c1_129 = arith.constant 1 : index
    %207 = vector.load %arg9[%c1_127, %c0_128, %c1_129] : memref<2x24x128xf32, #tpu.memory_space<vmem>>, vector<1x24x16xf32>
    %208 = vector.shape_cast %207 : vector<1x24x16xf32> to vector<24x16xf32>
    %c1_130 = arith.constant 1 : index
    %c0_131 = arith.constant 0 : index
    %c2_132 = arith.constant 2 : index
    %209 = vector.load %arg9[%c1_130, %c0_131, %c2_132] : memref<2x24x128xf32, #tpu.memory_space<vmem>>, vector<1x24x16xf32>
    %210 = vector.shape_cast %209 : vector<1x24x16xf32> to vector<24x16xf32>
    %c1_133 = arith.constant 1 : index
    %c0_134 = arith.constant 0 : index
    %c3_135 = arith.constant 3 : index
    %211 = vector.load %arg9[%c1_133, %c0_134, %c3_135] : memref<2x24x128xf32, #tpu.memory_space<vmem>>, vector<1x24x16xf32>
    %212 = vector.shape_cast %211 : vector<1x24x16xf32> to vector<24x16xf32>
    %c1_136 = arith.constant 1 : index
    %c0_137 = arith.constant 0 : index
    %c4_138 = arith.constant 4 : index
    %213 = vector.load %arg9[%c1_136, %c0_137, %c4_138] : memref<2x24x128xf32, #tpu.memory_space<vmem>>, vector<1x24x16xf32>
    %214 = vector.shape_cast %213 : vector<1x24x16xf32> to vector<24x16xf32>
    %c1_139 = arith.constant 1 : index
    %c0_140 = arith.constant 0 : index
    %c5_141 = arith.constant 5 : index
    %215 = vector.load %arg9[%c1_139, %c0_140, %c5_141] : memref<2x24x128xf32, #tpu.memory_space<vmem>>, vector<1x24x16xf32>
    %216 = vector.shape_cast %215 : vector<1x24x16xf32> to vector<24x16xf32>
    %c1_142 = arith.constant 1 : index
    %c0_143 = arith.constant 0 : index
    %c6_144 = arith.constant 6 : index
    %217 = vector.load %arg9[%c1_142, %c0_143, %c6_144] : memref<2x24x128xf32, #tpu.memory_space<vmem>>, vector<1x24x16xf32>
    %218 = vector.shape_cast %217 : vector<1x24x16xf32> to vector<24x16xf32>
    %c0_145 = arith.constant 0 : index
    %219 = memref.load %arg6[%c0_145] : memref<98xf32, #tpu.memory_space<smem>>
    %220 = vector.extract_strided_slice %192 {offsets = [0, 0], sizes = [16, 16], strides = [1, 1]} : vector<24x16xf32> to vector<16x16xf32>
    %221 = vector.broadcast %219 : f32 to vector<16x16xf32>
    %222 = arith.mulf %221, %220 : vector<16x16xf32>
    %c49 = arith.constant 49 : index
    %223 = memref.load %arg6[%c49] : memref<98xf32, #tpu.memory_space<smem>>
    %224 = vector.extract_strided_slice %206 {offsets = [0, 0], sizes = [16, 16], strides = [1, 1]} : vector<24x16xf32> to vector<16x16xf32>
    %225 = vector.broadcast %223 : f32 to vector<16x16xf32>
    %226 = arith.mulf %225, %224 : vector<16x16xf32>
    %227 = arith.addf %222, %226 : vector<16x16xf32>
    %c1_146 = arith.constant 1 : index
    %228 = memref.load %arg6[%c1_146] : memref<98xf32, #tpu.memory_space<smem>>
    %229 = vector.extract_strided_slice %194 {offsets = [0, 0], sizes = [16, 16], strides = [1, 1]} : vector<24x16xf32> to vector<16x16xf32>
    %230 = vector.broadcast %228 : f32 to vector<16x16xf32>
    %231 = arith.mulf %230, %229 : vector<16x16xf32>
    %232 = arith.addf %227, %231 : vector<16x16xf32>
    %c50 = arith.constant 50 : index
    %233 = memref.load %arg6[%c50] : memref<98xf32, #tpu.memory_space<smem>>
    %234 = vector.extract_strided_slice %208 {offsets = [0, 0], sizes = [16, 16], strides = [1, 1]} : vector<24x16xf32> to vector<16x16xf32>
    %235 = vector.broadcast %233 : f32 to vector<16x16xf32>
    %236 = arith.mulf %235, %234 : vector<16x16xf32>
    %237 = arith.addf %232, %236 : vector<16x16xf32>
    %c2_147 = arith.constant 2 : index
    %238 = memref.load %arg6[%c2_147] : memref<98xf32, #tpu.memory_space<smem>>
    %239 = vector.extract_strided_slice %196 {offsets = [0, 0], sizes = [16, 16], strides = [1, 1]} : vector<24x16xf32> to vector<16x16xf32>
    %240 = vector.broadcast %238 : f32 to vector<16x16xf32>
    %241 = arith.mulf %240, %239 : vector<16x16xf32>
    %242 = arith.addf %237, %241 : vector<16x16xf32>
    %c51 = arith.constant 51 : index
    %243 = memref.load %arg6[%c51] : memref<98xf32, #tpu.memory_space<smem>>
    %244 = vector.extract_strided_slice %210 {offsets = [0, 0], sizes = [16, 16], strides = [1, 1]} : vector<24x16xf32> to vector<16x16xf32>
    %245 = vector.broadcast %243 : f32 to vector<16x16xf32>
    %246 = arith.mulf %245, %244 : vector<16x16xf32>
    %247 = arith.addf %242, %246 : vector<16x16xf32>
    %c3_148 = arith.constant 3 : index
    %248 = memref.load %arg6[%c3_148] : memref<98xf32, #tpu.memory_space<smem>>
    %249 = vector.extract_strided_slice %198 {offsets = [0, 0], sizes = [16, 16], strides = [1, 1]} : vector<24x16xf32> to vector<16x16xf32>
    %250 = vector.broadcast %248 : f32 to vector<16x16xf32>
    %251 = arith.mulf %250, %249 : vector<16x16xf32>
    %252 = arith.addf %247, %251 : vector<16x16xf32>
    %c52 = arith.constant 52 : index
    %253 = memref.load %arg6[%c52] : memref<98xf32, #tpu.memory_space<smem>>
    %254 = vector.extract_strided_slice %212 {offsets = [0, 0], sizes = [16, 16], strides = [1, 1]} : vector<24x16xf32> to vector<16x16xf32>
    %255 = vector.broadcast %253 : f32 to vector<16x16xf32>
    %256 = arith.mulf %255, %254 : vector<16x16xf32>
    %257 = arith.addf %252, %256 : vector<16x16xf32>
    %c4_149 = arith.constant 4 : index
    %258 = memref.load %arg6[%c4_149] : memref<98xf32, #tpu.memory_space<smem>>
    %259 = vector.extract_strided_slice %200 {offsets = [0, 0], sizes = [16, 16], strides = [1, 1]} : vector<24x16xf32> to vector<16x16xf32>
    %260 = vector.broadcast %258 : f32 to vector<16x16xf32>
    %261 = arith.mulf %260, %259 : vector<16x16xf32>
    %262 = arith.addf %257, %261 : vector<16x16xf32>
    %c53 = arith.constant 53 : index
    %263 = memref.load %arg6[%c53] : memref<98xf32, #tpu.memory_space<smem>>
    %264 = vector.extract_strided_slice %214 {offsets = [0, 0], sizes = [16, 16], strides = [1, 1]} : vector<24x16xf32> to vector<16x16xf32>
    %265 = vector.broadcast %263 : f32 to vector<16x16xf32>
    %266 = arith.mulf %265, %264 : vector<16x16xf32>
    %267 = arith.addf %262, %266 : vector<16x16xf32>
    %c5_150 = arith.constant 5 : index
    %268 = memref.load %arg6[%c5_150] : memref<98xf32, #tpu.memory_space<smem>>
    %269 = vector.extract_strided_slice %202 {offsets = [0, 0], sizes = [16, 16], strides = [1, 1]} : vector<24x16xf32> to vector<16x16xf32>
    %270 = vector.broadcast %268 : f32 to vector<16x16xf32>
    %271 = arith.mulf %270, %269 : vector<16x16xf32>
    %272 = arith.addf %267, %271 : vector<16x16xf32>
    %c54 = arith.constant 54 : index
    %273 = memref.load %arg6[%c54] : memref<98xf32, #tpu.memory_space<smem>>
    %274 = vector.extract_strided_slice %216 {offsets = [0, 0], sizes = [16, 16], strides = [1, 1]} : vector<24x16xf32> to vector<16x16xf32>
    %275 = vector.broadcast %273 : f32 to vector<16x16xf32>
    %276 = arith.mulf %275, %274 : vector<16x16xf32>
    %277 = arith.addf %272, %276 : vector<16x16xf32>
    %c6_151 = arith.constant 6 : index
    %278 = memref.load %arg6[%c6_151] : memref<98xf32, #tpu.memory_space<smem>>
    %279 = vector.extract_strided_slice %204 {offsets = [0, 0], sizes = [16, 16], strides = [1, 1]} : vector<24x16xf32> to vector<16x16xf32>
    %280 = vector.broadcast %278 : f32 to vector<16x16xf32>
    %281 = arith.mulf %280, %279 : vector<16x16xf32>
    %282 = arith.addf %277, %281 : vector<16x16xf32>
    %c55 = arith.constant 55 : index
    %283 = memref.load %arg6[%c55] : memref<98xf32, #tpu.memory_space<smem>>
    %284 = vector.extract_strided_slice %218 {offsets = [0, 0], sizes = [16, 16], strides = [1, 1]} : vector<24x16xf32> to vector<16x16xf32>
    %285 = vector.broadcast %283 : f32 to vector<16x16xf32>
    %286 = arith.mulf %285, %284 : vector<16x16xf32>
    %287 = arith.addf %282, %286 : vector<16x16xf32>
    %c7_152 = arith.constant 7 : index
    %288 = memref.load %arg6[%c7_152] : memref<98xf32, #tpu.memory_space<smem>>
    %289 = vector.extract_strided_slice %192 {offsets = [1, 0], sizes = [16, 16], strides = [1, 1]} : vector<24x16xf32> to vector<16x16xf32>
    %290 = vector.broadcast %288 : f32 to vector<16x16xf32>
    %291 = arith.mulf %290, %289 : vector<16x16xf32>
    %c56 = arith.constant 56 : index
    %292 = memref.load %arg6[%c56] : memref<98xf32, #tpu.memory_space<smem>>
    %293 = vector.extract_strided_slice %206 {offsets = [1, 0], sizes = [16, 16], strides = [1, 1]} : vector<24x16xf32> to vector<16x16xf32>
    %294 = vector.broadcast %292 : f32 to vector<16x16xf32>
    %295 = arith.mulf %294, %293 : vector<16x16xf32>
    %296 = arith.addf %291, %295 : vector<16x16xf32>
    %c8_153 = arith.constant 8 : index
    %297 = memref.load %arg6[%c8_153] : memref<98xf32, #tpu.memory_space<smem>>
    %298 = vector.extract_strided_slice %194 {offsets = [1, 0], sizes = [16, 16], strides = [1, 1]} : vector<24x16xf32> to vector<16x16xf32>
    %299 = vector.broadcast %297 : f32 to vector<16x16xf32>
    %300 = arith.mulf %299, %298 : vector<16x16xf32>
    %301 = arith.addf %296, %300 : vector<16x16xf32>
    %c57 = arith.constant 57 : index
    %302 = memref.load %arg6[%c57] : memref<98xf32, #tpu.memory_space<smem>>
    %303 = vector.extract_strided_slice %208 {offsets = [1, 0], sizes = [16, 16], strides = [1, 1]} : vector<24x16xf32> to vector<16x16xf32>
    %304 = vector.broadcast %302 : f32 to vector<16x16xf32>
    %305 = arith.mulf %304, %303 : vector<16x16xf32>
    %306 = arith.addf %301, %305 : vector<16x16xf32>
    %c9_154 = arith.constant 9 : index
    %307 = memref.load %arg6[%c9_154] : memref<98xf32, #tpu.memory_space<smem>>
    %308 = vector.extract_strided_slice %196 {offsets = [1, 0], sizes = [16, 16], strides = [1, 1]} : vector<24x16xf32> to vector<16x16xf32>
    %309 = vector.broadcast %307 : f32 to vector<16x16xf32>
    %310 = arith.mulf %309, %308 : vector<16x16xf32>
    %311 = arith.addf %306, %310 : vector<16x16xf32>
    %c58 = arith.constant 58 : index
    %312 = memref.load %arg6[%c58] : memref<98xf32, #tpu.memory_space<smem>>
    %313 = vector.extract_strided_slice %210 {offsets = [1, 0], sizes = [16, 16], strides = [1, 1]} : vector<24x16xf32> to vector<16x16xf32>
    %314 = vector.broadcast %312 : f32 to vector<16x16xf32>
    %315 = arith.mulf %314, %313 : vector<16x16xf32>
    %316 = arith.addf %311, %315 : vector<16x16xf32>
    %c10_155 = arith.constant 10 : index
    %317 = memref.load %arg6[%c10_155] : memref<98xf32, #tpu.memory_space<smem>>
    %318 = vector.extract_strided_slice %198 {offsets = [1, 0], sizes = [16, 16], strides = [1, 1]} : vector<24x16xf32> to vector<16x16xf32>
    %319 = vector.broadcast %317 : f32 to vector<16x16xf32>
    %320 = arith.mulf %319, %318 : vector<16x16xf32>
    %321 = arith.addf %316, %320 : vector<16x16xf32>
    %c59 = arith.constant 59 : index
    %322 = memref.load %arg6[%c59] : memref<98xf32, #tpu.memory_space<smem>>
    %323 = vector.extract_strided_slice %212 {offsets = [1, 0], sizes = [16, 16], strides = [1, 1]} : vector<24x16xf32> to vector<16x16xf32>
    %324 = vector.broadcast %322 : f32 to vector<16x16xf32>
    %325 = arith.mulf %324, %323 : vector<16x16xf32>
    %326 = arith.addf %321, %325 : vector<16x16xf32>
    %c11_156 = arith.constant 11 : index
    %327 = memref.load %arg6[%c11_156] : memref<98xf32, #tpu.memory_space<smem>>
    %328 = vector.extract_strided_slice %200 {offsets = [1, 0], sizes = [16, 16], strides = [1, 1]} : vector<24x16xf32> to vector<16x16xf32>
    %329 = vector.broadcast %327 : f32 to vector<16x16xf32>
    %330 = arith.mulf %329, %328 : vector<16x16xf32>
    %331 = arith.addf %326, %330 : vector<16x16xf32>
    %c60 = arith.constant 60 : index
    %332 = memref.load %arg6[%c60] : memref<98xf32, #tpu.memory_space<smem>>
    %333 = vector.extract_strided_slice %214 {offsets = [1, 0], sizes = [16, 16], strides = [1, 1]} : vector<24x16xf32> to vector<16x16xf32>
    %334 = vector.broadcast %332 : f32 to vector<16x16xf32>
    %335 = arith.mulf %334, %333 : vector<16x16xf32>
    %336 = arith.addf %331, %335 : vector<16x16xf32>
    %c12_157 = arith.constant 12 : index
    %337 = memref.load %arg6[%c12_157] : memref<98xf32, #tpu.memory_space<smem>>
    %338 = vector.extract_strided_slice %202 {offsets = [1, 0], sizes = [16, 16], strides = [1, 1]} : vector<24x16xf32> to vector<16x16xf32>
    %339 = vector.broadcast %337 : f32 to vector<16x16xf32>
    %340 = arith.mulf %339, %338 : vector<16x16xf32>
    %341 = arith.addf %336, %340 : vector<16x16xf32>
    %c61 = arith.constant 61 : index
    %342 = memref.load %arg6[%c61] : memref<98xf32, #tpu.memory_space<smem>>
    %343 = vector.extract_strided_slice %216 {offsets = [1, 0], sizes = [16, 16], strides = [1, 1]} : vector<24x16xf32> to vector<16x16xf32>
    %344 = vector.broadcast %342 : f32 to vector<16x16xf32>
    %345 = arith.mulf %344, %343 : vector<16x16xf32>
    %346 = arith.addf %341, %345 : vector<16x16xf32>
    %c13_158 = arith.constant 13 : index
    %347 = memref.load %arg6[%c13_158] : memref<98xf32, #tpu.memory_space<smem>>
    %348 = vector.extract_strided_slice %204 {offsets = [1, 0], sizes = [16, 16], strides = [1, 1]} : vector<24x16xf32> to vector<16x16xf32>
    %349 = vector.broadcast %347 : f32 to vector<16x16xf32>
    %350 = arith.mulf %349, %348 : vector<16x16xf32>
    %351 = arith.addf %346, %350 : vector<16x16xf32>
    %c62 = arith.constant 62 : index
    %352 = memref.load %arg6[%c62] : memref<98xf32, #tpu.memory_space<smem>>
    %353 = vector.extract_strided_slice %218 {offsets = [1, 0], sizes = [16, 16], strides = [1, 1]} : vector<24x16xf32> to vector<16x16xf32>
    %354 = vector.broadcast %352 : f32 to vector<16x16xf32>
    %355 = arith.mulf %354, %353 : vector<16x16xf32>
    %356 = arith.addf %351, %355 : vector<16x16xf32>
    %c14_159 = arith.constant 14 : index
    %357 = memref.load %arg6[%c14_159] : memref<98xf32, #tpu.memory_space<smem>>
    %358 = vector.extract_strided_slice %192 {offsets = [2, 0], sizes = [16, 16], strides = [1, 1]} : vector<24x16xf32> to vector<16x16xf32>
    %359 = vector.broadcast %357 : f32 to vector<16x16xf32>
    %360 = arith.mulf %359, %358 : vector<16x16xf32>
    %c63 = arith.constant 63 : index
    %361 = memref.load %arg6[%c63] : memref<98xf32, #tpu.memory_space<smem>>
    %362 = vector.extract_strided_slice %206 {offsets = [2, 0], sizes = [16, 16], strides = [1, 1]} : vector<24x16xf32> to vector<16x16xf32>
    %363 = vector.broadcast %361 : f32 to vector<16x16xf32>
    %364 = arith.mulf %363, %362 : vector<16x16xf32>
    %365 = arith.addf %360, %364 : vector<16x16xf32>
    %c15_160 = arith.constant 15 : index
    %366 = memref.load %arg6[%c15_160] : memref<98xf32, #tpu.memory_space<smem>>
    %367 = vector.extract_strided_slice %194 {offsets = [2, 0], sizes = [16, 16], strides = [1, 1]} : vector<24x16xf32> to vector<16x16xf32>
    %368 = vector.broadcast %366 : f32 to vector<16x16xf32>
    %369 = arith.mulf %368, %367 : vector<16x16xf32>
    %370 = arith.addf %365, %369 : vector<16x16xf32>
    %c64 = arith.constant 64 : index
    %371 = memref.load %arg6[%c64] : memref<98xf32, #tpu.memory_space<smem>>
    %372 = vector.extract_strided_slice %208 {offsets = [2, 0], sizes = [16, 16], strides = [1, 1]} : vector<24x16xf32> to vector<16x16xf32>
    %373 = vector.broadcast %371 : f32 to vector<16x16xf32>
    %374 = arith.mulf %373, %372 : vector<16x16xf32>
    %375 = arith.addf %370, %374 : vector<16x16xf32>
    %c16_161 = arith.constant 16 : index
    %376 = memref.load %arg6[%c16_161] : memref<98xf32, #tpu.memory_space<smem>>
    %377 = vector.extract_strided_slice %196 {offsets = [2, 0], sizes = [16, 16], strides = [1, 1]} : vector<24x16xf32> to vector<16x16xf32>
    %378 = vector.broadcast %376 : f32 to vector<16x16xf32>
    %379 = arith.mulf %378, %377 : vector<16x16xf32>
    %380 = arith.addf %375, %379 : vector<16x16xf32>
    %c65 = arith.constant 65 : index
    %381 = memref.load %arg6[%c65] : memref<98xf32, #tpu.memory_space<smem>>
    %382 = vector.extract_strided_slice %210 {offsets = [2, 0], sizes = [16, 16], strides = [1, 1]} : vector<24x16xf32> to vector<16x16xf32>
    %383 = vector.broadcast %381 : f32 to vector<16x16xf32>
    %384 = arith.mulf %383, %382 : vector<16x16xf32>
    %385 = arith.addf %380, %384 : vector<16x16xf32>
    %c17_162 = arith.constant 17 : index
    %386 = memref.load %arg6[%c17_162] : memref<98xf32, #tpu.memory_space<smem>>
    %387 = vector.extract_strided_slice %198 {offsets = [2, 0], sizes = [16, 16], strides = [1, 1]} : vector<24x16xf32> to vector<16x16xf32>
    %388 = vector.broadcast %386 : f32 to vector<16x16xf32>
    %389 = arith.mulf %388, %387 : vector<16x16xf32>
    %390 = arith.addf %385, %389 : vector<16x16xf32>
    %c66 = arith.constant 66 : index
    %391 = memref.load %arg6[%c66] : memref<98xf32, #tpu.memory_space<smem>>
    %392 = vector.extract_strided_slice %212 {offsets = [2, 0], sizes = [16, 16], strides = [1, 1]} : vector<24x16xf32> to vector<16x16xf32>
    %393 = vector.broadcast %391 : f32 to vector<16x16xf32>
    %394 = arith.mulf %393, %392 : vector<16x16xf32>
    %395 = arith.addf %390, %394 : vector<16x16xf32>
    %c18_163 = arith.constant 18 : index
    %396 = memref.load %arg6[%c18_163] : memref<98xf32, #tpu.memory_space<smem>>
    %397 = vector.extract_strided_slice %200 {offsets = [2, 0], sizes = [16, 16], strides = [1, 1]} : vector<24x16xf32> to vector<16x16xf32>
    %398 = vector.broadcast %396 : f32 to vector<16x16xf32>
    %399 = arith.mulf %398, %397 : vector<16x16xf32>
    %400 = arith.addf %395, %399 : vector<16x16xf32>
    %c67 = arith.constant 67 : index
    %401 = memref.load %arg6[%c67] : memref<98xf32, #tpu.memory_space<smem>>
    %402 = vector.extract_strided_slice %214 {offsets = [2, 0], sizes = [16, 16], strides = [1, 1]} : vector<24x16xf32> to vector<16x16xf32>
    %403 = vector.broadcast %401 : f32 to vector<16x16xf32>
    %404 = arith.mulf %403, %402 : vector<16x16xf32>
    %405 = arith.addf %400, %404 : vector<16x16xf32>
    %c19 = arith.constant 19 : index
    %406 = memref.load %arg6[%c19] : memref<98xf32, #tpu.memory_space<smem>>
    %407 = vector.extract_strided_slice %202 {offsets = [2, 0], sizes = [16, 16], strides = [1, 1]} : vector<24x16xf32> to vector<16x16xf32>
    %408 = vector.broadcast %406 : f32 to vector<16x16xf32>
    %409 = arith.mulf %408, %407 : vector<16x16xf32>
    %410 = arith.addf %405, %409 : vector<16x16xf32>
    %c68 = arith.constant 68 : index
    %411 = memref.load %arg6[%c68] : memref<98xf32, #tpu.memory_space<smem>>
    %412 = vector.extract_strided_slice %216 {offsets = [2, 0], sizes = [16, 16], strides = [1, 1]} : vector<24x16xf32> to vector<16x16xf32>
    %413 = vector.broadcast %411 : f32 to vector<16x16xf32>
    %414 = arith.mulf %413, %412 : vector<16x16xf32>
    %415 = arith.addf %410, %414 : vector<16x16xf32>
    %c20 = arith.constant 20 : index
    %416 = memref.load %arg6[%c20] : memref<98xf32, #tpu.memory_space<smem>>
    %417 = vector.extract_strided_slice %204 {offsets = [2, 0], sizes = [16, 16], strides = [1, 1]} : vector<24x16xf32> to vector<16x16xf32>
    %418 = vector.broadcast %416 : f32 to vector<16x16xf32>
    %419 = arith.mulf %418, %417 : vector<16x16xf32>
    %420 = arith.addf %415, %419 : vector<16x16xf32>
    %c69 = arith.constant 69 : index
    %421 = memref.load %arg6[%c69] : memref<98xf32, #tpu.memory_space<smem>>
    %422 = vector.extract_strided_slice %218 {offsets = [2, 0], sizes = [16, 16], strides = [1, 1]} : vector<24x16xf32> to vector<16x16xf32>
    %423 = vector.broadcast %421 : f32 to vector<16x16xf32>
    %424 = arith.mulf %423, %422 : vector<16x16xf32>
    %425 = arith.addf %420, %424 : vector<16x16xf32>
    %c21 = arith.constant 21 : index
    %426 = memref.load %arg6[%c21] : memref<98xf32, #tpu.memory_space<smem>>
    %427 = vector.extract_strided_slice %192 {offsets = [3, 0], sizes = [16, 16], strides = [1, 1]} : vector<24x16xf32> to vector<16x16xf32>
    %428 = vector.broadcast %426 : f32 to vector<16x16xf32>
    %429 = arith.mulf %428, %427 : vector<16x16xf32>
    %c70 = arith.constant 70 : index
    %430 = memref.load %arg6[%c70] : memref<98xf32, #tpu.memory_space<smem>>
    %431 = vector.extract_strided_slice %206 {offsets = [3, 0], sizes = [16, 16], strides = [1, 1]} : vector<24x16xf32> to vector<16x16xf32>
    %432 = vector.broadcast %430 : f32 to vector<16x16xf32>
    %433 = arith.mulf %432, %431 : vector<16x16xf32>
    %434 = arith.addf %429, %433 : vector<16x16xf32>
    %c22 = arith.constant 22 : index
    %435 = memref.load %arg6[%c22] : memref<98xf32, #tpu.memory_space<smem>>
    %436 = vector.extract_strided_slice %194 {offsets = [3, 0], sizes = [16, 16], strides = [1, 1]} : vector<24x16xf32> to vector<16x16xf32>
    %437 = vector.broadcast %435 : f32 to vector<16x16xf32>
    %438 = arith.mulf %437, %436 : vector<16x16xf32>
    %439 = arith.addf %434, %438 : vector<16x16xf32>
    %c71 = arith.constant 71 : index
    %440 = memref.load %arg6[%c71] : memref<98xf32, #tpu.memory_space<smem>>
    %441 = vector.extract_strided_slice %208 {offsets = [3, 0], sizes = [16, 16], strides = [1, 1]} : vector<24x16xf32> to vector<16x16xf32>
    %442 = vector.broadcast %440 : f32 to vector<16x16xf32>
    %443 = arith.mulf %442, %441 : vector<16x16xf32>
    %444 = arith.addf %439, %443 : vector<16x16xf32>
    %c23 = arith.constant 23 : index
    %445 = memref.load %arg6[%c23] : memref<98xf32, #tpu.memory_space<smem>>
    %446 = vector.extract_strided_slice %196 {offsets = [3, 0], sizes = [16, 16], strides = [1, 1]} : vector<24x16xf32> to vector<16x16xf32>
    %447 = vector.broadcast %445 : f32 to vector<16x16xf32>
    %448 = arith.mulf %447, %446 : vector<16x16xf32>
    %449 = arith.addf %444, %448 : vector<16x16xf32>
    %c72 = arith.constant 72 : index
    %450 = memref.load %arg6[%c72] : memref<98xf32, #tpu.memory_space<smem>>
    %451 = vector.extract_strided_slice %210 {offsets = [3, 0], sizes = [16, 16], strides = [1, 1]} : vector<24x16xf32> to vector<16x16xf32>
    %452 = vector.broadcast %450 : f32 to vector<16x16xf32>
    %453 = arith.mulf %452, %451 : vector<16x16xf32>
    %454 = arith.addf %449, %453 : vector<16x16xf32>
    %c24 = arith.constant 24 : index
    %455 = memref.load %arg6[%c24] : memref<98xf32, #tpu.memory_space<smem>>
    %456 = vector.extract_strided_slice %198 {offsets = [3, 0], sizes = [16, 16], strides = [1, 1]} : vector<24x16xf32> to vector<16x16xf32>
    %457 = vector.broadcast %455 : f32 to vector<16x16xf32>
    %458 = arith.mulf %457, %456 : vector<16x16xf32>
    %459 = arith.addf %454, %458 : vector<16x16xf32>
    %c73 = arith.constant 73 : index
    %460 = memref.load %arg6[%c73] : memref<98xf32, #tpu.memory_space<smem>>
    %461 = vector.extract_strided_slice %212 {offsets = [3, 0], sizes = [16, 16], strides = [1, 1]} : vector<24x16xf32> to vector<16x16xf32>
    %462 = vector.broadcast %460 : f32 to vector<16x16xf32>
    %463 = arith.mulf %462, %461 : vector<16x16xf32>
    %464 = arith.addf %459, %463 : vector<16x16xf32>
    %c25 = arith.constant 25 : index
    %465 = memref.load %arg6[%c25] : memref<98xf32, #tpu.memory_space<smem>>
    %466 = vector.extract_strided_slice %200 {offsets = [3, 0], sizes = [16, 16], strides = [1, 1]} : vector<24x16xf32> to vector<16x16xf32>
    %467 = vector.broadcast %465 : f32 to vector<16x16xf32>
    %468 = arith.mulf %467, %466 : vector<16x16xf32>
    %469 = arith.addf %464, %468 : vector<16x16xf32>
    %c74 = arith.constant 74 : index
    %470 = memref.load %arg6[%c74] : memref<98xf32, #tpu.memory_space<smem>>
    %471 = vector.extract_strided_slice %214 {offsets = [3, 0], sizes = [16, 16], strides = [1, 1]} : vector<24x16xf32> to vector<16x16xf32>
    %472 = vector.broadcast %470 : f32 to vector<16x16xf32>
    %473 = arith.mulf %472, %471 : vector<16x16xf32>
    %474 = arith.addf %469, %473 : vector<16x16xf32>
    %c26 = arith.constant 26 : index
    %475 = memref.load %arg6[%c26] : memref<98xf32, #tpu.memory_space<smem>>
    %476 = vector.extract_strided_slice %202 {offsets = [3, 0], sizes = [16, 16], strides = [1, 1]} : vector<24x16xf32> to vector<16x16xf32>
    %477 = vector.broadcast %475 : f32 to vector<16x16xf32>
    %478 = arith.mulf %477, %476 : vector<16x16xf32>
    %479 = arith.addf %474, %478 : vector<16x16xf32>
    %c75 = arith.constant 75 : index
    %480 = memref.load %arg6[%c75] : memref<98xf32, #tpu.memory_space<smem>>
    %481 = vector.extract_strided_slice %216 {offsets = [3, 0], sizes = [16, 16], strides = [1, 1]} : vector<24x16xf32> to vector<16x16xf32>
    %482 = vector.broadcast %480 : f32 to vector<16x16xf32>
    %483 = arith.mulf %482, %481 : vector<16x16xf32>
    %484 = arith.addf %479, %483 : vector<16x16xf32>
    %c27 = arith.constant 27 : index
    %485 = memref.load %arg6[%c27] : memref<98xf32, #tpu.memory_space<smem>>
    %486 = vector.extract_strided_slice %204 {offsets = [3, 0], sizes = [16, 16], strides = [1, 1]} : vector<24x16xf32> to vector<16x16xf32>
    %487 = vector.broadcast %485 : f32 to vector<16x16xf32>
    %488 = arith.mulf %487, %486 : vector<16x16xf32>
    %489 = arith.addf %484, %488 : vector<16x16xf32>
    %c76 = arith.constant 76 : index
    %490 = memref.load %arg6[%c76] : memref<98xf32, #tpu.memory_space<smem>>
    %491 = vector.extract_strided_slice %218 {offsets = [3, 0], sizes = [16, 16], strides = [1, 1]} : vector<24x16xf32> to vector<16x16xf32>
    %492 = vector.broadcast %490 : f32 to vector<16x16xf32>
    %493 = arith.mulf %492, %491 : vector<16x16xf32>
    %494 = arith.addf %489, %493 : vector<16x16xf32>
    %c28 = arith.constant 28 : index
    %495 = memref.load %arg6[%c28] : memref<98xf32, #tpu.memory_space<smem>>
    %496 = vector.extract_strided_slice %192 {offsets = [4, 0], sizes = [16, 16], strides = [1, 1]} : vector<24x16xf32> to vector<16x16xf32>
    %497 = vector.broadcast %495 : f32 to vector<16x16xf32>
    %498 = arith.mulf %497, %496 : vector<16x16xf32>
    %c77 = arith.constant 77 : index
    %499 = memref.load %arg6[%c77] : memref<98xf32, #tpu.memory_space<smem>>
    %500 = vector.extract_strided_slice %206 {offsets = [4, 0], sizes = [16, 16], strides = [1, 1]} : vector<24x16xf32> to vector<16x16xf32>
    %501 = vector.broadcast %499 : f32 to vector<16x16xf32>
    %502 = arith.mulf %501, %500 : vector<16x16xf32>
    %503 = arith.addf %498, %502 : vector<16x16xf32>
    %c29 = arith.constant 29 : index
    %504 = memref.load %arg6[%c29] : memref<98xf32, #tpu.memory_space<smem>>
    %505 = vector.extract_strided_slice %194 {offsets = [4, 0], sizes = [16, 16], strides = [1, 1]} : vector<24x16xf32> to vector<16x16xf32>
    %506 = vector.broadcast %504 : f32 to vector<16x16xf32>
    %507 = arith.mulf %506, %505 : vector<16x16xf32>
    %508 = arith.addf %503, %507 : vector<16x16xf32>
    %c78 = arith.constant 78 : index
    %509 = memref.load %arg6[%c78] : memref<98xf32, #tpu.memory_space<smem>>
    %510 = vector.extract_strided_slice %208 {offsets = [4, 0], sizes = [16, 16], strides = [1, 1]} : vector<24x16xf32> to vector<16x16xf32>
    %511 = vector.broadcast %509 : f32 to vector<16x16xf32>
    %512 = arith.mulf %511, %510 : vector<16x16xf32>
    %513 = arith.addf %508, %512 : vector<16x16xf32>
    %c30 = arith.constant 30 : index
    %514 = memref.load %arg6[%c30] : memref<98xf32, #tpu.memory_space<smem>>
    %515 = vector.extract_strided_slice %196 {offsets = [4, 0], sizes = [16, 16], strides = [1, 1]} : vector<24x16xf32> to vector<16x16xf32>
    %516 = vector.broadcast %514 : f32 to vector<16x16xf32>
    %517 = arith.mulf %516, %515 : vector<16x16xf32>
    %518 = arith.addf %513, %517 : vector<16x16xf32>
    %c79 = arith.constant 79 : index
    %519 = memref.load %arg6[%c79] : memref<98xf32, #tpu.memory_space<smem>>
    %520 = vector.extract_strided_slice %210 {offsets = [4, 0], sizes = [16, 16], strides = [1, 1]} : vector<24x16xf32> to vector<16x16xf32>
    %521 = vector.broadcast %519 : f32 to vector<16x16xf32>
    %522 = arith.mulf %521, %520 : vector<16x16xf32>
    %523 = arith.addf %518, %522 : vector<16x16xf32>
    %c31 = arith.constant 31 : index
    %524 = memref.load %arg6[%c31] : memref<98xf32, #tpu.memory_space<smem>>
    %525 = vector.extract_strided_slice %198 {offsets = [4, 0], sizes = [16, 16], strides = [1, 1]} : vector<24x16xf32> to vector<16x16xf32>
    %526 = vector.broadcast %524 : f32 to vector<16x16xf32>
    %527 = arith.mulf %526, %525 : vector<16x16xf32>
    %528 = arith.addf %523, %527 : vector<16x16xf32>
    %c80 = arith.constant 80 : index
    %529 = memref.load %arg6[%c80] : memref<98xf32, #tpu.memory_space<smem>>
    %530 = vector.extract_strided_slice %212 {offsets = [4, 0], sizes = [16, 16], strides = [1, 1]} : vector<24x16xf32> to vector<16x16xf32>
    %531 = vector.broadcast %529 : f32 to vector<16x16xf32>
    %532 = arith.mulf %531, %530 : vector<16x16xf32>
    %533 = arith.addf %528, %532 : vector<16x16xf32>
    %c32 = arith.constant 32 : index
    %534 = memref.load %arg6[%c32] : memref<98xf32, #tpu.memory_space<smem>>
    %535 = vector.extract_strided_slice %200 {offsets = [4, 0], sizes = [16, 16], strides = [1, 1]} : vector<24x16xf32> to vector<16x16xf32>
    %536 = vector.broadcast %534 : f32 to vector<16x16xf32>
    %537 = arith.mulf %536, %535 : vector<16x16xf32>
    %538 = arith.addf %533, %537 : vector<16x16xf32>
    %c81 = arith.constant 81 : index
    %539 = memref.load %arg6[%c81] : memref<98xf32, #tpu.memory_space<smem>>
    %540 = vector.extract_strided_slice %214 {offsets = [4, 0], sizes = [16, 16], strides = [1, 1]} : vector<24x16xf32> to vector<16x16xf32>
    %541 = vector.broadcast %539 : f32 to vector<16x16xf32>
    %542 = arith.mulf %541, %540 : vector<16x16xf32>
    %543 = arith.addf %538, %542 : vector<16x16xf32>
    %c33 = arith.constant 33 : index
    %544 = memref.load %arg6[%c33] : memref<98xf32, #tpu.memory_space<smem>>
    %545 = vector.extract_strided_slice %202 {offsets = [4, 0], sizes = [16, 16], strides = [1, 1]} : vector<24x16xf32> to vector<16x16xf32>
    %546 = vector.broadcast %544 : f32 to vector<16x16xf32>
    %547 = arith.mulf %546, %545 : vector<16x16xf32>
    %548 = arith.addf %543, %547 : vector<16x16xf32>
    %c82 = arith.constant 82 : index
    %549 = memref.load %arg6[%c82] : memref<98xf32, #tpu.memory_space<smem>>
    %550 = vector.extract_strided_slice %216 {offsets = [4, 0], sizes = [16, 16], strides = [1, 1]} : vector<24x16xf32> to vector<16x16xf32>
    %551 = vector.broadcast %549 : f32 to vector<16x16xf32>
    %552 = arith.mulf %551, %550 : vector<16x16xf32>
    %553 = arith.addf %548, %552 : vector<16x16xf32>
    %c34 = arith.constant 34 : index
    %554 = memref.load %arg6[%c34] : memref<98xf32, #tpu.memory_space<smem>>
    %555 = vector.extract_strided_slice %204 {offsets = [4, 0], sizes = [16, 16], strides = [1, 1]} : vector<24x16xf32> to vector<16x16xf32>
    %556 = vector.broadcast %554 : f32 to vector<16x16xf32>
    %557 = arith.mulf %556, %555 : vector<16x16xf32>
    %558 = arith.addf %553, %557 : vector<16x16xf32>
    %c83 = arith.constant 83 : index
    %559 = memref.load %arg6[%c83] : memref<98xf32, #tpu.memory_space<smem>>
    %560 = vector.extract_strided_slice %218 {offsets = [4, 0], sizes = [16, 16], strides = [1, 1]} : vector<24x16xf32> to vector<16x16xf32>
    %561 = vector.broadcast %559 : f32 to vector<16x16xf32>
    %562 = arith.mulf %561, %560 : vector<16x16xf32>
    %563 = arith.addf %558, %562 : vector<16x16xf32>
    %c35 = arith.constant 35 : index
    %564 = memref.load %arg6[%c35] : memref<98xf32, #tpu.memory_space<smem>>
    %565 = vector.extract_strided_slice %192 {offsets = [5, 0], sizes = [16, 16], strides = [1, 1]} : vector<24x16xf32> to vector<16x16xf32>
    %566 = vector.broadcast %564 : f32 to vector<16x16xf32>
    %567 = arith.mulf %566, %565 : vector<16x16xf32>
    %c84 = arith.constant 84 : index
    %568 = memref.load %arg6[%c84] : memref<98xf32, #tpu.memory_space<smem>>
    %569 = vector.extract_strided_slice %206 {offsets = [5, 0], sizes = [16, 16], strides = [1, 1]} : vector<24x16xf32> to vector<16x16xf32>
    %570 = vector.broadcast %568 : f32 to vector<16x16xf32>
    %571 = arith.mulf %570, %569 : vector<16x16xf32>
    %572 = arith.addf %567, %571 : vector<16x16xf32>
    %c36 = arith.constant 36 : index
    %573 = memref.load %arg6[%c36] : memref<98xf32, #tpu.memory_space<smem>>
    %574 = vector.extract_strided_slice %194 {offsets = [5, 0], sizes = [16, 16], strides = [1, 1]} : vector<24x16xf32> to vector<16x16xf32>
    %575 = vector.broadcast %573 : f32 to vector<16x16xf32>
    %576 = arith.mulf %575, %574 : vector<16x16xf32>
    %577 = arith.addf %572, %576 : vector<16x16xf32>
    %c85 = arith.constant 85 : index
    %578 = memref.load %arg6[%c85] : memref<98xf32, #tpu.memory_space<smem>>
    %579 = vector.extract_strided_slice %208 {offsets = [5, 0], sizes = [16, 16], strides = [1, 1]} : vector<24x16xf32> to vector<16x16xf32>
    %580 = vector.broadcast %578 : f32 to vector<16x16xf32>
    %581 = arith.mulf %580, %579 : vector<16x16xf32>
    %582 = arith.addf %577, %581 : vector<16x16xf32>
    %c37 = arith.constant 37 : index
    %583 = memref.load %arg6[%c37] : memref<98xf32, #tpu.memory_space<smem>>
    %584 = vector.extract_strided_slice %196 {offsets = [5, 0], sizes = [16, 16], strides = [1, 1]} : vector<24x16xf32> to vector<16x16xf32>
    %585 = vector.broadcast %583 : f32 to vector<16x16xf32>
    %586 = arith.mulf %585, %584 : vector<16x16xf32>
    %587 = arith.addf %582, %586 : vector<16x16xf32>
    %c86 = arith.constant 86 : index
    %588 = memref.load %arg6[%c86] : memref<98xf32, #tpu.memory_space<smem>>
    %589 = vector.extract_strided_slice %210 {offsets = [5, 0], sizes = [16, 16], strides = [1, 1]} : vector<24x16xf32> to vector<16x16xf32>
    %590 = vector.broadcast %588 : f32 to vector<16x16xf32>
    %591 = arith.mulf %590, %589 : vector<16x16xf32>
    %592 = arith.addf %587, %591 : vector<16x16xf32>
    %c38 = arith.constant 38 : index
    %593 = memref.load %arg6[%c38] : memref<98xf32, #tpu.memory_space<smem>>
    %594 = vector.extract_strided_slice %198 {offsets = [5, 0], sizes = [16, 16], strides = [1, 1]} : vector<24x16xf32> to vector<16x16xf32>
    %595 = vector.broadcast %593 : f32 to vector<16x16xf32>
    %596 = arith.mulf %595, %594 : vector<16x16xf32>
    %597 = arith.addf %592, %596 : vector<16x16xf32>
    %c87 = arith.constant 87 : index
    %598 = memref.load %arg6[%c87] : memref<98xf32, #tpu.memory_space<smem>>
    %599 = vector.extract_strided_slice %212 {offsets = [5, 0], sizes = [16, 16], strides = [1, 1]} : vector<24x16xf32> to vector<16x16xf32>
    %600 = vector.broadcast %598 : f32 to vector<16x16xf32>
    %601 = arith.mulf %600, %599 : vector<16x16xf32>
    %602 = arith.addf %597, %601 : vector<16x16xf32>
    %c39 = arith.constant 39 : index
    %603 = memref.load %arg6[%c39] : memref<98xf32, #tpu.memory_space<smem>>
    %604 = vector.extract_strided_slice %200 {offsets = [5, 0], sizes = [16, 16], strides = [1, 1]} : vector<24x16xf32> to vector<16x16xf32>
    %605 = vector.broadcast %603 : f32 to vector<16x16xf32>
    %606 = arith.mulf %605, %604 : vector<16x16xf32>
    %607 = arith.addf %602, %606 : vector<16x16xf32>
    %c88 = arith.constant 88 : index
    %608 = memref.load %arg6[%c88] : memref<98xf32, #tpu.memory_space<smem>>
    %609 = vector.extract_strided_slice %214 {offsets = [5, 0], sizes = [16, 16], strides = [1, 1]} : vector<24x16xf32> to vector<16x16xf32>
    %610 = vector.broadcast %608 : f32 to vector<16x16xf32>
    %611 = arith.mulf %610, %609 : vector<16x16xf32>
    %612 = arith.addf %607, %611 : vector<16x16xf32>
    %c40 = arith.constant 40 : index
    %613 = memref.load %arg6[%c40] : memref<98xf32, #tpu.memory_space<smem>>
    %614 = vector.extract_strided_slice %202 {offsets = [5, 0], sizes = [16, 16], strides = [1, 1]} : vector<24x16xf32> to vector<16x16xf32>
    %615 = vector.broadcast %613 : f32 to vector<16x16xf32>
    %616 = arith.mulf %615, %614 : vector<16x16xf32>
    %617 = arith.addf %612, %616 : vector<16x16xf32>
    %c89 = arith.constant 89 : index
    %618 = memref.load %arg6[%c89] : memref<98xf32, #tpu.memory_space<smem>>
    %619 = vector.extract_strided_slice %216 {offsets = [5, 0], sizes = [16, 16], strides = [1, 1]} : vector<24x16xf32> to vector<16x16xf32>
    %620 = vector.broadcast %618 : f32 to vector<16x16xf32>
    %621 = arith.mulf %620, %619 : vector<16x16xf32>
    %622 = arith.addf %617, %621 : vector<16x16xf32>
    %c41 = arith.constant 41 : index
    %623 = memref.load %arg6[%c41] : memref<98xf32, #tpu.memory_space<smem>>
    %624 = vector.extract_strided_slice %204 {offsets = [5, 0], sizes = [16, 16], strides = [1, 1]} : vector<24x16xf32> to vector<16x16xf32>
    %625 = vector.broadcast %623 : f32 to vector<16x16xf32>
    %626 = arith.mulf %625, %624 : vector<16x16xf32>
    %627 = arith.addf %622, %626 : vector<16x16xf32>
    %c90 = arith.constant 90 : index
    %628 = memref.load %arg6[%c90] : memref<98xf32, #tpu.memory_space<smem>>
    %629 = vector.extract_strided_slice %218 {offsets = [5, 0], sizes = [16, 16], strides = [1, 1]} : vector<24x16xf32> to vector<16x16xf32>
    %630 = vector.broadcast %628 : f32 to vector<16x16xf32>
    %631 = arith.mulf %630, %629 : vector<16x16xf32>
    %632 = arith.addf %627, %631 : vector<16x16xf32>
    %c42 = arith.constant 42 : index
    %633 = memref.load %arg6[%c42] : memref<98xf32, #tpu.memory_space<smem>>
    %634 = vector.extract_strided_slice %192 {offsets = [6, 0], sizes = [16, 16], strides = [1, 1]} : vector<24x16xf32> to vector<16x16xf32>
    %635 = vector.broadcast %633 : f32 to vector<16x16xf32>
    %636 = arith.mulf %635, %634 : vector<16x16xf32>
    %c91 = arith.constant 91 : index
    %637 = memref.load %arg6[%c91] : memref<98xf32, #tpu.memory_space<smem>>
    %638 = vector.extract_strided_slice %206 {offsets = [6, 0], sizes = [16, 16], strides = [1, 1]} : vector<24x16xf32> to vector<16x16xf32>
    %639 = vector.broadcast %637 : f32 to vector<16x16xf32>
    %640 = arith.mulf %639, %638 : vector<16x16xf32>
    %641 = arith.addf %636, %640 : vector<16x16xf32>
    %c43 = arith.constant 43 : index
    %642 = memref.load %arg6[%c43] : memref<98xf32, #tpu.memory_space<smem>>
    %643 = vector.extract_strided_slice %194 {offsets = [6, 0], sizes = [16, 16], strides = [1, 1]} : vector<24x16xf32> to vector<16x16xf32>
    %644 = vector.broadcast %642 : f32 to vector<16x16xf32>
    %645 = arith.mulf %644, %643 : vector<16x16xf32>
    %646 = arith.addf %641, %645 : vector<16x16xf32>
    %c92 = arith.constant 92 : index
    %647 = memref.load %arg6[%c92] : memref<98xf32, #tpu.memory_space<smem>>
    %648 = vector.extract_strided_slice %208 {offsets = [6, 0], sizes = [16, 16], strides = [1, 1]} : vector<24x16xf32> to vector<16x16xf32>
    %649 = vector.broadcast %647 : f32 to vector<16x16xf32>
    %650 = arith.mulf %649, %648 : vector<16x16xf32>
    %651 = arith.addf %646, %650 : vector<16x16xf32>
    %c44 = arith.constant 44 : index
    %652 = memref.load %arg6[%c44] : memref<98xf32, #tpu.memory_space<smem>>
    %653 = vector.extract_strided_slice %196 {offsets = [6, 0], sizes = [16, 16], strides = [1, 1]} : vector<24x16xf32> to vector<16x16xf32>
    %654 = vector.broadcast %652 : f32 to vector<16x16xf32>
    %655 = arith.mulf %654, %653 : vector<16x16xf32>
    %656 = arith.addf %651, %655 : vector<16x16xf32>
    %c93 = arith.constant 93 : index
    %657 = memref.load %arg6[%c93] : memref<98xf32, #tpu.memory_space<smem>>
    %658 = vector.extract_strided_slice %210 {offsets = [6, 0], sizes = [16, 16], strides = [1, 1]} : vector<24x16xf32> to vector<16x16xf32>
    %659 = vector.broadcast %657 : f32 to vector<16x16xf32>
    %660 = arith.mulf %659, %658 : vector<16x16xf32>
    %661 = arith.addf %656, %660 : vector<16x16xf32>
    %c45 = arith.constant 45 : index
    %662 = memref.load %arg6[%c45] : memref<98xf32, #tpu.memory_space<smem>>
    %663 = vector.extract_strided_slice %198 {offsets = [6, 0], sizes = [16, 16], strides = [1, 1]} : vector<24x16xf32> to vector<16x16xf32>
    %664 = vector.broadcast %662 : f32 to vector<16x16xf32>
    %665 = arith.mulf %664, %663 : vector<16x16xf32>
    %666 = arith.addf %661, %665 : vector<16x16xf32>
    %c94 = arith.constant 94 : index
    %667 = memref.load %arg6[%c94] : memref<98xf32, #tpu.memory_space<smem>>
    %668 = vector.extract_strided_slice %212 {offsets = [6, 0], sizes = [16, 16], strides = [1, 1]} : vector<24x16xf32> to vector<16x16xf32>
    %669 = vector.broadcast %667 : f32 to vector<16x16xf32>
    %670 = arith.mulf %669, %668 : vector<16x16xf32>
    %671 = arith.addf %666, %670 : vector<16x16xf32>
    %c46 = arith.constant 46 : index
    %672 = memref.load %arg6[%c46] : memref<98xf32, #tpu.memory_space<smem>>
    %673 = vector.extract_strided_slice %200 {offsets = [6, 0], sizes = [16, 16], strides = [1, 1]} : vector<24x16xf32> to vector<16x16xf32>
    %674 = vector.broadcast %672 : f32 to vector<16x16xf32>
    %675 = arith.mulf %674, %673 : vector<16x16xf32>
    %676 = arith.addf %671, %675 : vector<16x16xf32>
    %c95 = arith.constant 95 : index
    %677 = memref.load %arg6[%c95] : memref<98xf32, #tpu.memory_space<smem>>
    %678 = vector.extract_strided_slice %214 {offsets = [6, 0], sizes = [16, 16], strides = [1, 1]} : vector<24x16xf32> to vector<16x16xf32>
    %679 = vector.broadcast %677 : f32 to vector<16x16xf32>
    %680 = arith.mulf %679, %678 : vector<16x16xf32>
    %681 = arith.addf %676, %680 : vector<16x16xf32>
    %c47 = arith.constant 47 : index
    %682 = memref.load %arg6[%c47] : memref<98xf32, #tpu.memory_space<smem>>
    %683 = vector.extract_strided_slice %202 {offsets = [6, 0], sizes = [16, 16], strides = [1, 1]} : vector<24x16xf32> to vector<16x16xf32>
    %684 = vector.broadcast %682 : f32 to vector<16x16xf32>
    %685 = arith.mulf %684, %683 : vector<16x16xf32>
    %686 = arith.addf %681, %685 : vector<16x16xf32>
    %c96 = arith.constant 96 : index
    %687 = memref.load %arg6[%c96] : memref<98xf32, #tpu.memory_space<smem>>
    %688 = vector.extract_strided_slice %216 {offsets = [6, 0], sizes = [16, 16], strides = [1, 1]} : vector<24x16xf32> to vector<16x16xf32>
    %689 = vector.broadcast %687 : f32 to vector<16x16xf32>
    %690 = arith.mulf %689, %688 : vector<16x16xf32>
    %691 = arith.addf %686, %690 : vector<16x16xf32>
    %c48 = arith.constant 48 : index
    %692 = memref.load %arg6[%c48] : memref<98xf32, #tpu.memory_space<smem>>
    %693 = vector.extract_strided_slice %204 {offsets = [6, 0], sizes = [16, 16], strides = [1, 1]} : vector<24x16xf32> to vector<16x16xf32>
    %694 = vector.broadcast %692 : f32 to vector<16x16xf32>
    %695 = arith.mulf %694, %693 : vector<16x16xf32>
    %696 = arith.addf %691, %695 : vector<16x16xf32>
    %c97 = arith.constant 97 : index
    %697 = memref.load %arg6[%c97] : memref<98xf32, #tpu.memory_space<smem>>
    %698 = vector.extract_strided_slice %218 {offsets = [6, 0], sizes = [16, 16], strides = [1, 1]} : vector<24x16xf32> to vector<16x16xf32>
    %699 = vector.broadcast %697 : f32 to vector<16x16xf32>
    %700 = arith.mulf %699, %698 : vector<16x16xf32>
    %701 = arith.addf %696, %700 : vector<16x16xf32>
    %702 = arith.addf %287, %356 : vector<16x16xf32>
    %703 = arith.addf %702, %425 : vector<16x16xf32>
    %704 = arith.addf %703, %494 : vector<16x16xf32>
    %705 = arith.addf %704, %563 : vector<16x16xf32>
    %706 = arith.addf %705, %632 : vector<16x16xf32>
    %707 = arith.addf %706, %701 : vector<16x16xf32>
    %c0_164 = arith.constant 0 : index
    %708 = memref.load %arg7[%c0_164] : memref<1xf32, #tpu.memory_space<smem>>
    %709 = vector.broadcast %708 : f32 to vector<16x16xf32>
    %710 = arith.addf %707, %709 : vector<16x16xf32>
    %711 = arith.negf %710 : vector<16x16xf32>
    %712 = math.exp %711 : vector<16x16xf32>
    %cst_165 = arith.constant 1.000000e+00 : f32
    %713 = vector.broadcast %cst_165 : f32 to vector<16x16xf32>
    %714 = arith.addf %713, %712 : vector<16x16xf32>
    %715 = arith.divf %713, %714 : vector<16x16xf32>
    %716 = vector.extract_strided_slice %715 {offsets = [0, 0], sizes = [1, 16], strides = [1, 1]} : vector<16x16xf32> to vector<1x16xf32>
    %c0_166 = arith.constant 0 : index
    %c0_167 = arith.constant 0 : index
    %717 = vector.load %arg10[%c0_166, %c0_167] : memref<1x256xf32, #tpu.memory_space<vmem>>, vector<1x16xf32>
    tpu.vector_store %arg10[%c0_166, %c0_167], %716 {strides = array<i32>} : memref<1x256xf32, #tpu.memory_space<vmem>>, vector<1x16xf32>,
    %718 = vector.extract_strided_slice %715 {offsets = [1, 0], sizes = [1, 16], strides = [1, 1]} : vector<16x16xf32> to vector<1x16xf32>
    %c0_168 = arith.constant 0 : index
    %c16_169 = arith.constant 16 : index
    %719 = vector.load %arg10[%c0_168, %c16_169] : memref<1x256xf32, #tpu.memory_space<vmem>>, vector<1x16xf32>
    tpu.vector_store %arg10[%c0_168, %c16_169], %718 {strides = array<i32>} : memref<1x256xf32, #tpu.memory_space<vmem>>, vector<1x16xf32>,
    %720 = vector.extract_strided_slice %715 {offsets = [2, 0], sizes = [1, 16], strides = [1, 1]} : vector<16x16xf32> to vector<1x16xf32>
    %c0_170 = arith.constant 0 : index
    %c32_171 = arith.constant 32 : index
    %721 = vector.load %arg10[%c0_170, %c32_171] : memref<1x256xf32, #tpu.memory_space<vmem>>, vector<1x16xf32>
    tpu.vector_store %arg10[%c0_170, %c32_171], %720 {strides = array<i32>} : memref<1x256xf32, #tpu.memory_space<vmem>>, vector<1x16xf32>,
    %722 = vector.extract_strided_slice %715 {offsets = [3, 0], sizes = [1, 16], strides = [1, 1]} : vector<16x16xf32> to vector<1x16xf32>
    %c0_172 = arith.constant 0 : index
    %c48_173 = arith.constant 48 : index
    %723 = vector.load %arg10[%c0_172, %c48_173] : memref<1x256xf32, #tpu.memory_space<vmem>>, vector<1x16xf32>
    tpu.vector_store %arg10[%c0_172, %c48_173], %722 {strides = array<i32>} : memref<1x256xf32, #tpu.memory_space<vmem>>, vector<1x16xf32>,
    %724 = vector.extract_strided_slice %715 {offsets = [4, 0], sizes = [1, 16], strides = [1, 1]} : vector<16x16xf32> to vector<1x16xf32>
    %c0_174 = arith.constant 0 : index
    %c64_175 = arith.constant 64 : index
    %725 = vector.load %arg10[%c0_174, %c64_175] : memref<1x256xf32, #tpu.memory_space<vmem>>, vector<1x16xf32>
    tpu.vector_store %arg10[%c0_174, %c64_175], %724 {strides = array<i32>} : memref<1x256xf32, #tpu.memory_space<vmem>>, vector<1x16xf32>,
    %726 = vector.extract_strided_slice %715 {offsets = [5, 0], sizes = [1, 16], strides = [1, 1]} : vector<16x16xf32> to vector<1x16xf32>
    %c0_176 = arith.constant 0 : index
    %c80_177 = arith.constant 80 : index
    %727 = vector.load %arg10[%c0_176, %c80_177] : memref<1x256xf32, #tpu.memory_space<vmem>>, vector<1x16xf32>
    tpu.vector_store %arg10[%c0_176, %c80_177], %726 {strides = array<i32>} : memref<1x256xf32, #tpu.memory_space<vmem>>, vector<1x16xf32>,
    %728 = vector.extract_strided_slice %715 {offsets = [6, 0], sizes = [1, 16], strides = [1, 1]} : vector<16x16xf32> to vector<1x16xf32>
    %c0_178 = arith.constant 0 : index
    %c96_179 = arith.constant 96 : index
    %729 = vector.load %arg10[%c0_178, %c96_179] : memref<1x256xf32, #tpu.memory_space<vmem>>, vector<1x16xf32>
    tpu.vector_store %arg10[%c0_178, %c96_179], %728 {strides = array<i32>} : memref<1x256xf32, #tpu.memory_space<vmem>>, vector<1x16xf32>,
    %730 = vector.extract_strided_slice %715 {offsets = [7, 0], sizes = [1, 16], strides = [1, 1]} : vector<16x16xf32> to vector<1x16xf32>
    %c0_180 = arith.constant 0 : index
    %c112 = arith.constant 112 : index
    %731 = vector.load %arg10[%c0_180, %c112] : memref<1x256xf32, #tpu.memory_space<vmem>>, vector<1x16xf32>
    tpu.vector_store %arg10[%c0_180, %c112], %730 {strides = array<i32>} : memref<1x256xf32, #tpu.memory_space<vmem>>, vector<1x16xf32>,
    %732 = vector.extract_strided_slice %715 {offsets = [8, 0], sizes = [1, 16], strides = [1, 1]} : vector<16x16xf32> to vector<1x16xf32>
    %c0_181 = arith.constant 0 : index
    %c128 = arith.constant 128 : index
    %733 = vector.load %arg10[%c0_181, %c128] : memref<1x256xf32, #tpu.memory_space<vmem>>, vector<1x16xf32>
    tpu.vector_store %arg10[%c0_181, %c128], %732 {strides = array<i32>} : memref<1x256xf32, #tpu.memory_space<vmem>>, vector<1x16xf32>,
    %734 = vector.extract_strided_slice %715 {offsets = [9, 0], sizes = [1, 16], strides = [1, 1]} : vector<16x16xf32> to vector<1x16xf32>
    %c0_182 = arith.constant 0 : index
    %c144 = arith.constant 144 : index
    %735 = vector.load %arg10[%c0_182, %c144] : memref<1x256xf32, #tpu.memory_space<vmem>>, vector<1x16xf32>
    tpu.vector_store %arg10[%c0_182, %c144], %734 {strides = array<i32>} : memref<1x256xf32, #tpu.memory_space<vmem>>, vector<1x16xf32>,
    %736 = vector.extract_strided_slice %715 {offsets = [10, 0], sizes = [1, 16], strides = [1, 1]} : vector<16x16xf32> to vector<1x16xf32>
    %c0_183 = arith.constant 0 : index
    %c160 = arith.constant 160 : index
    %737 = vector.load %arg10[%c0_183, %c160] : memref<1x256xf32, #tpu.memory_space<vmem>>, vector<1x16xf32>
    tpu.vector_store %arg10[%c0_183, %c160], %736 {strides = array<i32>} : memref<1x256xf32, #tpu.memory_space<vmem>>, vector<1x16xf32>,
    %738 = vector.extract_strided_slice %715 {offsets = [11, 0], sizes = [1, 16], strides = [1, 1]} : vector<16x16xf32> to vector<1x16xf32>
    %c0_184 = arith.constant 0 : index
    %c176 = arith.constant 176 : index
    %739 = vector.load %arg10[%c0_184, %c176] : memref<1x256xf32, #tpu.memory_space<vmem>>, vector<1x16xf32>
    tpu.vector_store %arg10[%c0_184, %c176], %738 {strides = array<i32>} : memref<1x256xf32, #tpu.memory_space<vmem>>, vector<1x16xf32>,
    %740 = vector.extract_strided_slice %715 {offsets = [12, 0], sizes = [1, 16], strides = [1, 1]} : vector<16x16xf32> to vector<1x16xf32>
    %c0_185 = arith.constant 0 : index
    %c192 = arith.constant 192 : index
    %741 = vector.load %arg10[%c0_185, %c192] : memref<1x256xf32, #tpu.memory_space<vmem>>, vector<1x16xf32>
    tpu.vector_store %arg10[%c0_185, %c192], %740 {strides = array<i32>} : memref<1x256xf32, #tpu.memory_space<vmem>>, vector<1x16xf32>,
    %742 = vector.extract_strided_slice %715 {offsets = [13, 0], sizes = [1, 16], strides = [1, 1]} : vector<16x16xf32> to vector<1x16xf32>
    %c0_186 = arith.constant 0 : index
    %c208 = arith.constant 208 : index
    %743 = vector.load %arg10[%c0_186, %c208] : memref<1x256xf32, #tpu.memory_space<vmem>>, vector<1x16xf32>
    tpu.vector_store %arg10[%c0_186, %c208], %742 {strides = array<i32>} : memref<1x256xf32, #tpu.memory_space<vmem>>, vector<1x16xf32>,
    %744 = vector.extract_strided_slice %715 {offsets = [14, 0], sizes = [1, 16], strides = [1, 1]} : vector<16x16xf32> to vector<1x16xf32>
    %c0_187 = arith.constant 0 : index
    %c224 = arith.constant 224 : index
    %745 = vector.load %arg10[%c0_187, %c224] : memref<1x256xf32, #tpu.memory_space<vmem>>, vector<1x16xf32>
    tpu.vector_store %arg10[%c0_187, %c224], %744 {strides = array<i32>} : memref<1x256xf32, #tpu.memory_space<vmem>>, vector<1x16xf32>,
    %746 = vector.extract_strided_slice %715 {offsets = [15, 0], sizes = [1, 16], strides = [1, 1]} : vector<16x16xf32> to vector<1x16xf32>
    %c0_188 = arith.constant 0 : index
    %c240 = arith.constant 240 : index
    %747 = vector.load %arg10[%c0_188, %c240] : memref<1x256xf32, #tpu.memory_space<vmem>>, vector<1x16xf32>
    tpu.vector_store %arg10[%c0_188, %c240], %746 {strides = array<i32>} : memref<1x256xf32, #tpu.memory_space<vmem>>, vector<1x16xf32>,
    %c0_189 = arith.constant 0 : index
    %c0_190 = arith.constant 0 : index
    %748 = vector.load %arg10[%c0_189, %c0_190] : memref<1x256xf32, #tpu.memory_space<vmem>>, vector<1x256xf32>
    %749 = vector.broadcast %748 : vector<1x256xf32> to vector<32x256xf32>
    %750 = arith.mulf %54, %749 : vector<32x256xf32>
    %c0_191 = arith.constant 0 : index
    %c0_192 = arith.constant 0 : index
    %c0_193 = arith.constant 0 : index
    %751 = vector.load %arg8[%c0_191, %c0_192, %c0_193] : memref<1x32x256xf32, #tpu.memory_space<vmem>>, vector<1x32x256xf32>
    %752 = vector.shape_cast %751 : vector<1x32x256xf32> to vector<32x256xf32>
    %753 = vector.shape_cast %750 : vector<32x256xf32> to vector<1x32x256xf32>
    tpu.vector_store %arg8[%c0_191, %c0_192, %c0_193], %753 {strides = array<i32>} : memref<1x32x256xf32, #tpu.memory_space<vmem>>, vector<1x32x256xf32>,
    return
  }
  func.func @transform_0(%arg0: i32) -> (i32, i32, i32) {
    %c0_i32 = arith.constant 0 : i32
    %c0_i32_0 = arith.constant 0 : i32
    %c0_i32_1 = arith.constant 0 : i32
    return %arg0, %c0_i32, %c0_i32_0 : i32, i32, i32
  }
  func.func @transform_1(%arg0: i32) -> (i32, i32) {
    %c0_i32 = arith.constant 0 : i32
    %c0_i32_0 = arith.constant 0 : i32
    %c0_i32_1 = arith.constant 0 : i32
    return %c0_i32, %c0_i32_0 : i32, i32
  }
  func.func @transform_2(%arg0: i32) -> (i32, i32) {
    %c0_i32 = arith.constant 0 : i32
    %c0_i32_0 = arith.constant 0 : i32
    %c0_i32_1 = arith.constant 0 : i32
    return %c0_i32, %c0_i32_0 : i32, i32
  }
  func.func @transform_3(%arg0: i32) -> (i32, i32) {
    %c0_i32 = arith.constant 0 : i32
    %c0_i32_0 = arith.constant 0 : i32
    %c0_i32_1 = arith.constant 0 : i32
    return %c0_i32, %c0_i32_0 : i32, i32
  }
  func.func @transform_4(%arg0: i32) -> i32 {
    %c0_i32 = arith.constant 0 : i32
    %c0_i32_0 = arith.constant 0 : i32
    return %c0_i32 : i32
  }
  func.func @transform_5(%arg0: i32) -> i32 {
    %c0_i32 = arith.constant 0 : i32
    %c0_i32_0 = arith.constant 0 : i32
    return %c0_i32 : i32
  }
  func.func @transform_6(%arg0: i32) -> i32 {
    %c0_i32 = arith.constant 0 : i32
    %c0_i32_0 = arith.constant 0 : i32
    return %c0_i32 : i32
  }
  func.func @transform_7(%arg0: i32) -> (i32, i32, i32) {
    %c0_i32 = arith.constant 0 : i32
    %c0_i32_0 = arith.constant 0 : i32
    %c0_i32_1 = arith.constant 0 : i32
    return %arg0, %c0_i32, %c0_i32_0 : i32, i32, i32
  }
}

</mosaic_0001>

<bundles_post_ra>
// kernel: tpu_custom_call.1
= control target key start
LH: loop header
LB: loop body
LE: loop exit
PB: predicated region body
PF: predicated region fallthrough
CT: control target
= control target key end

     0   :  { %s5424_s0 = inlined_call_operand.hbm [shape: f32[2,32,256], index: 0, kind: input, shape index: {}]   ;;  %s5425_s1 = inlined_call_operand.vmem [shape: f32[32,2], index: 1, kind: input, shape index: {}]   ;;  %s5426_s2 = inlined_call_operand.vmem [shape: f32[32,2], index: 2, kind: input, shape index: {}]   ;;  %s5427_s3 = inlined_call_operand.vmem [shape: f32[32,1], index: 3, kind: input, shape index: {}]   ;;  %s5428_s4 = inlined_call_operand.vmem [shape: f32[2], index: 4, kind: input, shape index: {}]   ;;  %s5429_s5 = inlined_call_operand.vmem [shape: f32[98], index: 5, kind: input, shape index: {}]   ;;  %s5430_s6 = inlined_call_operand.<no memory space> [shape: f32[1], index: 6, kind: input, shape index: {}]   ;;  %s5431_s7 = inlined_call_operand.hbm [shape: f32[2,32,256], index: 7, kind: output, shape index: {}]  }
   0x1   :  { %5457 = sst [smem:[#allocation131_spill]] %s5424_s0 }
   0x2   :  { %5458 = sst [smem:[#allocation132_spill]] %s5425_s1 }
   0x3   :  { %5459 = sst [smem:[#allocation133_spill]] %s5426_s2 }
   0x4   :  { %5460 = sst [smem:[#allocation134_spill]] %s5427_s3 }
   0x5   :  { %5461 = sst [smem:[#allocation135_spill]] %s5428_s4 }
   0x6   :  { %5462 = sst [smem:[#allocation136_spill]] %s5429_s5 }
   0x7   :  { %12 = sst [smem:[#allocation4]] %s5430_s6 }
   0x8   :  { %13 = vsyncpa [#allocation6], 0 }
   0x9   :  { %15 = vsyncpa [#allocation6 + $0x1], 0 }
   0xa   :  { %16 = vsyncpa [#allocation8], 0 }
   0xb   :  { %17 = vsyncpa [#allocation11], 0 }
   0xc   :  { %18 = vsyncpa [#allocation7], 0 }
   0xd   :  { %20 = vsyncpa [#allocation7 + $0x1], 0  ;;  %s3365_s26 = smov 0   ;;  %s3367_s27 = smov 0  }
   0xe   :  { %s3369_s28 = smov 0   ;;  %s3371_s29 = smov 0  }
   0xf LB: > { %5463 = sst [smem:[#allocation17_spill]] %s3284_s28  ;;  %s3386_s6 = sadd.s32 4294967295, %s3288_s29   ;;  %s3288_s29 = sphi %s3371_s29, %s5743_s29   ;;  %s3284_s28 = sphi %s3369_s28, %s5740_s28   ;;  %s3280_s27 = sphi %s3367_s27, %s5742_s27   ;;  %s3276_s26 = sphi %s3365_s26, %s5741_s26  }
  0x10   : > { %s2899_s30 = sadd.s32 4294967294, %s3288_s29   ;;  %s3390_s8 = sadd.s32 1, %s3288_s29  }
  0x11   : > { %s33_s9 = sadd.s32 1, %s3284_s28  ;;  %s30_s10 = ssub.s32 %s3288_s29, %s3390_s8 }
  0x12   : > { %p40_p0 = scmp.ne.s32.totalorder %s3284_s28, %s3280_s27  ;;  %p31_p1 = scmp.eq.s32.totalorder %s30_s10, 0 }
  0x13   : > { %p41_p2 = scmp.eq.s32.totalorder %s3288_s29, 0  ;;  %p46_p3 = scmp.ne.s32.totalorder %s3280_s27, %s3276_s26 }
  0x14   : > { %p5432_p4 = scmp.eq.s32.totalorder %s3386_s6, 0  ;;  %p196_p7 = scmp.eq.s32.totalorder %s3386_s6, 1 }
  0x15   : > { %s3402_s11 = scalar_select %p31_p1, %s3284_s28, %s33_s9  }
  0x16   : > { %p3404_p5 = por %p41_p2, %p40_p0  ;;  %p3410_p6 = por %p5432_p4, %p46_p3 }
  0x17   : > { %5464 = sst [smem:[#allocation18_spill]] %s3402_s11  ;;  %p202_p8 = scmp.eq.s32.totalorder %s2899_s30, 1 }
  0x18   : > { %s5466_s13 = scalar_select %p3410_p6, 1, 0 }
  0x19   : > { %p2900_p9 = scmp.ge.s32.totalorder %s3288_s29, 1  ;;  %p209_p10 = scmp.lt.s32.totalorder %s3288_s29, 3 }
  0x1a   : > { %p3417_p11 = por %p196_p7, %p40_p0  ;;  %p3421_p12 = por %p202_p8, %p46_p3 }
  0x1b   : > { %p3425_p13 = pnand %p2900_p9, %p209_p10  ;;  %s5470_s4 = sld [smem:[#allocation135_spill]] }
  0x1c   : > { %s5467_s14 = scalar_select %p3417_p11, 1, 0 }
  0x1d   : > { %s5468_s15 = scalar_select %p3421_p12, 1, 0 }
  0x1e   : > { %s5469_s16 = scalar_select %p3425_p13, 1, 0 }
  0x1f   : > { %p3035_p1 = pneg %p3425_p13  ;;  %p3052_p2 = scmp.lt.s32.totalorder %s3288_s29, 2 }
  0x20   : > { %s5472_s5 = sld [smem:[#allocation136_spill]] }
  0x21   : > { %s231_s19 = sshll.u32 %s5470_s4, 4  ;;  %p3438_p7 = pnand %p3035_p1, %p5432_p4  ;;  %s232_s19 = int_to_ptr.vmem [resolvable:$true] %s231_s19 }
  0x22   : > { %p3447_p3 = pnand %p3052_p2, %p3404_p5  ;;  %s3154_s25 = scalar_lea.vmem %s232_s19, 16 }
  0x23   : > { %p3155_p8 = scmp.ne.s32.totalorder %s232_s19, %s3154_s25  ;;  %p3156_p9 = pneg %p3438_p7 }
  0x24   : > { %s5473_s24 = scalar_select %p3447_p3, 1, 0 }
  0x25   : > { %p3157_p10 = pnand %p3156_p9, %p3155_p8  ;;  %p3162_p0 = scmp.lt.s32.totalorder %s232_s19, %s232_s19 }
  0x26   : > { %s242_s23 = sshll.u32 %s5472_s5, 4  ;;  %p3163_p4 = scmp.lt.s32.totalorder %s3154_s25, %s3154_s25  ;;  %s243_s23 = int_to_ptr.vmem [resolvable:$true] %s242_s23 }
  0x27   : > { %p3158_p1 = pneg %p3157_p10 }
  0x28   : > { %p3164_p12 = por %p3163_p4, %p3162_p0 }
  0x2a   : > { %p3165_p11 = pnand %p3164_p12, %p3158_p1 }
  0x2c   : > { %3168 = shalt.err (!%p3165_p11)
}
  0x2d   : > { %s3290_s30 = smov [#allocation9]   ;;  %s256_s9 = sand.u32 1, %s3284_s28  }
  0x2e   : > { %3038 = dma.vmem_to_smem (!%p3438_p7), %s232_s19, 16, %s3290_s30, [#allocation8]  }
  0x2f   : > { %s3169_s10 = scalar_lea.vmem %s243_s23, 16  ;;  %p3177_p8 = scmp.lt.s32.totalorder %s243_s23, %s243_s23 }
  0x30   : > { %p3170_p5 = scmp.ne.s32.totalorder %s243_s23, %s3169_s10  ;;  %p3178_p10 = scmp.lt.s32.totalorder %s3169_s10, %s3169_s10 }
  0x32   : > { %p3172_p2 = pnand %p3170_p5, %p3156_p9  ;;  %p3179_p13 = por %p3178_p10, %p3177_p8 }
  0x34   : > { %p3173_p6 = pneg %p3172_p2 }
  0x36   : > { %p3180_p3 = pnand %p3179_p13, %p3173_p6 }
  0x38   : > { %3183 = shalt.err (!%p3180_p3)
}
  0x39   : > { %s3291_s12 = smov [#allocation10]   ;;  %s2904_s17 = sshll.u32 %s256_s9, 6 }
  0x3a   : > { %3041 = dma.vmem_to_smem (!%p3438_p7), %s243_s23, 16, %s3291_s12, [#allocation11]  }
  0x3b   : > { %s3021_s18 = sshll.u32 %s3288_s29, 10  ;;  %s5474_s0 = sld [smem:[#allocation131_spill]] }
  0x3c   : > { %s260_s25 = scalar_lea.vmem [#allocation5], %s2904_s17  ;;  %s3472_s20 = scalar_lea.sflag [#allocation6], %s256_s9 }
  0x3d   : > { %s267_s30 = sshll.u32 %s260_s25, 4  ;;  %p5475_p6 = scmp.ne.s32.totalorder %s5473_s24, 0  ;;  %s3470_s30 = int_to_ptr.vmem [resolvable:$true] %s267_s30 }
  0x3f   : > { %p3186_p11 = pneg %p5475_p6 }
  0x41   : > { %s3468_s22 = scalar_lea.hbm %s5474_s0, %s3021_s18  ;;  %s3189_s18 = scalar_lea.hbm %s5474_s0, 2048 }
  0x42   : > { %s3184_s10 = scalar_lea.hbm %s3468_s22, 1024  ;;  %p3190_p0 = scmp.lt.u32.totalorder %s3468_s22, %s5474_s0 }
  0x43   : > { %p3185_p4 = scmp.ne.s32.totalorder %s3468_s22, %s3184_s10  ;;  %p3191_p7 = scmp.lt.u32.totalorder %s3189_s18, %s3184_s10 }
  0x44   : > { %p3193_p9 = scmp.lt.u32.totalorder %s3184_s10, %s3468_s22 }
  0x45   : > { %p3187_p12 = pnand %p3186_p11, %p3185_p4  ;;  %p3192_p3 = por %p3191_p7, %p3190_p0 }
  0x47   : > { %p3188_p13 = pneg %p3187_p12  ;;  %p3194_p1 = por %p3193_p9, %p3192_p3 }
  0x49   : > { %p3195_p5 = pnand %p3194_p1, %p3188_p13 }
  0x4b   : > { %3198 = shalt.err (!%p3195_p5)
}
  0x4c   : > { %s3199_s9 = scalar_lea.vmem %s3470_s30, 1024  ;;  %s3292_s17 = smov [#allocation5]  }
  0x4d   : > { %p3200_p2 = scmp.ne.s32.totalorder %s3470_s30, %s3199_s9  ;;  %s3204_s25 = sshll.u32 %s3292_s17, 4  ;;  %s3205_s25 = int_to_ptr.vmem [resolvable:$false] %s3204_s25 }
  0x4e   : > { %s3206_s23 = scalar_lea.vmem %s3205_s25, 2048  ;;  %p3207_p4 = scmp.lt.s32.totalorder %s3470_s30, %s3205_s25 }
  0x4f   : > { %p3202_p8 = pnand %p3200_p2, %p3186_p11  ;;  %p3208_p12 = scmp.lt.s32.totalorder %s3206_s23, %s3199_s9 }
  0x51   : > { %p3203_p10 = pneg %p3202_p8  ;;  %p3209_p0 = por %p3208_p12, %p3207_p4 }
  0x53   : > { %p3210_p7 = pnand %p3209_p0, %p3203_p10 }
  0x55   : > { %3213 = shalt.err (!%p3210_p7)
}
  0x56   : > { %s3293_s10 = smov 256   ;;  %s3294_s12 = smov 16  }
  0x57   : > { %3045 = dma.hbm_to_vmem [thread:$0]  (!%p5475_p6), %s3468_s22, 1024, %s3470_s30, %s3472_s20, %s3293_s10, %s3293_s10, %s3294_s12  }
  0x58   : > { %p5476_p11 = scmp.ne.s32.totalorder %s5469_s16, 0 }
  0x5a   : > { %279 = sbr.rel (%p5476_p11) target bundleno = 1608 (0x648), region = 48 }
  0x61   : > { %s3503_s18 = sand.u32 1, %s3280_s27   ;;  %p5477_p13 = scmp.ne.s32.totalorder %s5466_s13, 0 }
  0x62   : > { %s5437_s19 = sshll.u32 %s3503_s18, 6  ;;  %s282_s21 = scalar_lea.sflag [#allocation6], %s3503_s18 }
  0x63   : > { %s285_s9 = scalar_lea.vmem [#allocation5], %s5437_s19 }
  0x64   : > { %3259 = dma.done.wait (%p5477_p13), %s282_s21, 1024  }
  0x65   : > { %3261 = vsyncadd (%p5477_p13), %s282_s21, 4294966272  ;;  %p5478_p6 = scmp.eq.s32.totalorder %s3386_s6, 0 }
  0x67   : > { %3263 = dma.done.wait (%p5478_p6), [#allocation8], 16   ;;  %p5479_p3 = pmov %p5478_p6 }
  0x69   : > { %3265 = vsyncadd (%p5479_p3), [#allocation8], 4294967280  ;;  %p5480_p9 = pmov %p5479_p3 }
  0x6a   : > { %p5481_p1 = pmov %p5479_p3 }
  0x6b   : > { %3267 = dma.done.wait (%p5480_p9), [#allocation11], 16  }
  0x6c   : > { %3269 = vsyncadd (%p5481_p1), [#allocation11], 4294967280 }
  0x6d   : > { %298 = sfence }
  0x6e   : > { %v3521_v0 = vld [vmem:[%s285_s9 + $0x20] sm:$0xff]  ;;  %v3523_v1 = vld [vmem:[%s285_s9 + $0x28] sm:$0xff]  ;;  %v3531_v5 = vld [vmem:[%s285_s9 + $0x30] sm:$0xff]  ;;  %v3295_v7 = vmov 0   ;;  %v3296_v8 = vmov 1   ;;  %s5482_s3 = sld [smem:[#allocation134_spill]] }
  0x6f   : > { %v3525_v2 = vld [vmem:[%s285_s9] sm:$0xff]  ;;  %v339_v3 = vadd.f32 %v3523_v1, %v3521_v0  ;;  %v3529_v4 = vld [vmem:[%s285_s9 + $0x8] sm:$0xff]  ;;  %v3533_v6 = vld [vmem:[%s285_s9 + $0x38] sm:$0xff]  ;;  %3118 = vset.pattern.permute.xlu1 %v3295_v7  ;;  %3120 = vset.pattern.permute.xlu0 %v3296_v8  ;;  %v355_v17 = vmax.f32 %v3521_v0, %v3523_v1  ;;  %s5483_s1 = sld [smem:[#allocation132_spill]]  ;;  %s5484_s2 = sld [smem:[#allocation133_spill]]  ;;  %vm361_vm0 = vcmask 7168  }
  0x70   : > { %v333_v9 = vadd.f32 %v3529_v4, %v3525_v2  ;;  %v3537_v10 = vld [vmem:[%s285_s9 + $0x10] sm:$0xff]  ;;  %v3539_v11 = vld [vmem:[%s285_s9 + $0x18] sm:$0xff]  ;;  %v342_v12 = vadd.f32 %v3533_v6, %v3531_v5  ;;  %v349_v15 = vmax.f32 %v3525_v2, %v3529_v4  ;;  %v358_v16 = vmax.f32 %v3531_v5, %v3533_v6  ;;  %s440_s21 = sld [smem:[#allocation9]]  ;;  %s2912_s9 = sld [smem:[#allocation9 + $0x1]] }
  0x71   : > { %340 = vadd.xlane.f32.xlu1 %v339_v3  ;;  %v336_v13 = vadd.f32 %v3539_v11, %v3537_v10  ;;  %v352_v14 = vmax.f32 %v3537_v10, %v3539_v11  ;;  %vm426_vm1 = vcmask 15360   ;;  %s5438_s13 = smov 127   ;;  %s3299_s16 = smov 3   ;;  %vm653_vm2 = vcmask 147480  }
  0x72   : > { %334 = vadd.xlane.f32.xlu0 %v333_v9  ;;  %s3300_s24 = smov 115   ;;  %s3301_s22 = smov 99   ;;  %vm2488_vm3 = vcmask 1046528   ;;  %vm2501_vm4 = vcmask 1045504   ;;  %vm2514_vm5 = vcmask 1044480   ;;  %vm2527_vm6 = vcmask 1043456  }
  0x73   : > { %s3302_s30 = smov 83   ;;  %s3303_s20 = smov 67   ;;  %vm2540_vm7 = vcmask 1042432   ;;  %vm2553_vm8 = vcmask 1041408  }
  0x74   : > { %v375_v18 = vld [vmem:[%s5482_s3 + $0x8] sm:$0xff]  ;;  %v376_v19 = vld [vmem:[%s5482_s3 + $0x10] sm:$0xff]  ;;  %v377_v21 = vld [vmem:[%s5482_s3 + $0x18] sm:$0xff]  ;;  %s3304_s17 = smov 51   ;;  %s3305_s25 = smov 35  }
  0x75   : > { %343 = vadd.xlane.f32.xlu1 %v342_v12  ;;  %v367_v20 = vld [vmem:[%s5483_s1 + $0x8] sm:$0xff]  ;;  %v370_v22 = vld [vmem:[%s5484_s2] sm:$0xff]  ;;  %v372_v24 = vld [vmem:[%s5484_s2 + $0x10] sm:$0xff]  ;;  %s3306_s23 = smov 19   ;;  %s3678_s10 = sld [smem:[#allocation10 + $0x1]] }
  0x76   : > { %337 = vadd.xlane.f32.xlu0 %v336_v13  ;;  %v366_v23 = vld [vmem:[%s5483_s1] sm:$0xff]  ;;  %v368_v26 = vld [vmem:[%s5483_s1 + $0x10] sm:$0xff]  ;;  %v371_v27 = vld [vmem:[%s5484_s2 + $0x8] sm:$0xff]  ;;  %s3681_s12 = sld [smem:[#allocation10 + $0x2]]  ;;  %s3709_s19 = sld [smem:[#allocation10 + $0xe]] }
  0x77   : > { %v374_v25 = vld [vmem:[%s5482_s3] sm:$0xff]  ;;  %v369_v28 = vld [vmem:[%s5483_s1 + $0x18] sm:$0xff]  ;;  %s3717_s0 = sld [smem:[#allocation10 + $0x2c]]  ;;  %s3719_s1 = sld [smem:[#allocation10 + $0x2d]] }
  0x78   : > { %v373_v29 = vld [vmem:[%s5484_s2 + $0x18] sm:$0xff]  ;;  %s3727_s2 = sld [smem:[#allocation10 + $0x15]]  ;;  %s3729_s3 = sld [smem:[#allocation10 + $0x46]] }
  0x79   : > { %353 = vmax.xlane.f32.xlu1 %v352_v14  ;;  %s5493_s4 = smov 127   ;;  %s3742_s5 = sld [smem:[#allocation10 + $0x5]] }
  0x7a   : > { %350 = vmax.xlane.f32.xlu0 %v349_v15  ;;  %s5441_s11 = smov 126   ;;  %s3769_s28 = sld [smem:[#allocation10 + $0x23]] }
  0x7b   : > { %p5736_p2 = scmp.ne.s32.totalorder %s5467_s14, 0 }
  0x7d   : > { %359 = vmax.xlane.f32.xlu1 %v358_v16 }
  0x7e   : > { %356 = vmax.xlane.f32.xlu0 %v355_v17 }
  0x8e   : > { %385 = vperm.xlu1 %3118, %v375_v18  }
  0x92   : > { %390 = vperm.xlu1 %3118, %v376_v19  }
  0x94   : > { %477 = vperm.xlu0 %3120, %v367_v20  }
  0x96   : > { %395 = vperm.xlu1 %3118, %v377_v21  }
  0x98   : > { %510 = vperm.xlu0 %3120, %v370_v22  }
  0x9a   : > { %404 = vperm.xlu1 %3118, %v366_v23  }
  0x9c   : > { %518 = vperm.xlu0 %3120, %v372_v24  }
  0x9e   : > { %409 = vperm.xlu1 %3118, %v367_v20  }
  0xa0   : > { %3121 = vset.pattern.permute.xlu0 %v3295_v7 }
  0xa1   : > { %380 = vperm.xlu0 %3121, %v374_v25  }
  0xa2   : > { %414 = vperm.xlu1 %3118, %v368_v26  }
  0xa5   : > { %451 = vperm.xlu0 %3121, %v371_v27  }
  0xa6   : > { %419 = vperm.xlu1 %3118, %v369_v28  }
  0xa9   : > { %461 = vperm.xlu0 %3121, %v373_v29  }
  0xaa   : > { %446 = vperm.xlu1 %3118, %v370_v22  }
  0xae   : > { %456 = vperm.xlu1 %3118, %v372_v24  }
  0xb2   : > { %3119 = vset.pattern.permute.xlu1 %v3296_v8 }
  0xb3   : > { %473 = vperm.xlu1 %3119, %v366_v23  }
  0xb7   : > { %481 = vperm.xlu1 %3119, %v368_v26  }
  0xbb   : > { %485 = vperm.xlu1 %3119, %v369_v28  }
  0xbf   : > { %514 = vperm.xlu1 %3119, %v371_v27  }
  0xc3   : > { %522 = vperm.xlu1 %3119, %v373_v29  }
  0xc7   : > { %3122 = vset.pattern.permute.xlu1 %v3295_v7 }
  0xfe   : > { %v341_v30 = vpop.xlane.xlu1 %340 }
  0xff   : > { %v335_v34 = vpop.xlane.xlu0 %334  ;;  %v347_v48 = vmul.f32 0.00390625, %v341_v30 }
 0x100   : > { %v345_v40 = vmul.f32 0.00390625, %v335_v34 }
 0x102   : > { %v344_v31 = vpop.xlane.xlu1 %343 }
 0x103   : > { %v338_v37 = vpop.xlane.xlu0 %337  ;;  %v348_v54 = vmul.f32 0.00390625, %v344_v31 }
 0x104   : > { %v346_v41 = vmul.f32 0.00390625, %v338_v37  ;;  %v441_v37 = vstv %s440_s21  ;;  %s3684_s21 = sld [smem:[#allocation10]] }
 0x106   : > { %v354_v32 = vpop.xlane.xlu1 %353 }
 0x107   : > { %v351_v39 = vpop.xlane.xlu0 %350  ;;  %v363_v43 = vsel %vm361_vm0, %v346_v41, %v354_v32 }
 0x108   : > { %v362_v44 = vsel %vm361_vm0, %v345_v40, %v351_v39 }
 0x10a   : > { %v360_v33 = vpop.xlane.xlu1 %359 }
 0x10b   : > { %v357_v46 = vpop.xlane.xlu0 %356  ;;  %v365_v57 = vsel %vm361_vm0, %v348_v54, %v360_v33 }
 0x10c   : > { %v364_v50 = vsel %vm361_vm0, %v347_v48, %v357_v46  ;;  %v506_v46 = vstv %s2912_s9  ;;  %s3686_s9 = sld [smem:[#allocation10 + $0x31]] }
 0x10e   : > { %v3589_v35 = vpop.permute.xlu1 %385 }
 0x112   : > { %v3591_v36 = vpop.permute.xlu1 %390 }
 0x113   : > { %v478_v9 = vpop.permute.xlu0 %477 }
 0x114   : > { %v489_v17 = vmul.f32 %v478_v9, %v363_v43 }
 0x116   : > { %v3593_v38 = vpop.permute.xlu1 %395  ;;  %v493_v22 = vsel %vm426_vm1, %v489_v17, 0.0 }
 0x117   : > { %v511_v16 = vpop.permute.xlu0 %510 }
 0x11a   : > { %v405_v42 = vpop.permute.xlu1 %404 }
 0x11b   : > { %v422_v49 = vmul.f32 %v405_v42, %v362_v44  ;;  %v519_v24 = vpop.permute.xlu0 %518 }
 0x11d   : > { %v427_v55 = vsel %vm426_vm1, %v422_v49, 0.0 }
 0x11e   : > { %v410_v45 = vpop.permute.xlu1 %409 }
 0x11f   : > { %v423_v47 = vmul.f32 %v410_v45, %v363_v43 }
 0x120   : > { %v381_v33 = vpop.permute.xlu0 %380 }
 0x121   : > { %v428_v52 = vsel %vm426_vm1, %v423_v47, 0.0 }
 0x122   : > { %v415_v51 = vpop.permute.xlu1 %414  ;;  %v429_v58 = vadd.f32 %v428_v52, %v427_v55 }
 0x123   : > { %v424_v53 = vmul.f32 %v415_v51, %v364_v50 }
 0x124   : > { %v452_v42 = vpop.permute.xlu0 %451 }
 0x125   : > { %v430_v56 = vsel %vm426_vm1, %v424_v53, 0.0 }
 0x126   : > { %v420_v59 = vpop.permute.xlu1 %419  ;;  %v431_v61 = vadd.f32 %v430_v56, %v429_v58 }
 0x127   : > { %v425_v60 = vmul.f32 %v420_v59, %v365_v57 }
 0x128   : > { %v462_v51 = vpop.permute.xlu0 %461 }
 0x129   : > { %v432_v62 = vsel %vm426_vm1, %v425_v60, 0.0 }
 0x12a   : > { %v433_v63 = vadd.f32 %v432_v62, %v431_v61  ;;  %v447_v3 = vpop.permute.xlu1 %446 }
 0x12c   : > { %v434_v7 = vrot.slane %v433_v63, 4 }
 0x12e   : > { %v457_v8 = vpop.permute.xlu1 %456  ;;  %v435_v12 = vadd.f32 %v434_v7, %v433_v63 }
 0x130   : > { %v436_v15 = vrot.slane %v435_v12, 2 }
 0x132   : > { %v474_v13 = vpop.permute.xlu1 %473  ;;  %v437_v21 = vadd.f32 %v436_v15, %v435_v12 }
 0x133   : > { %v488_v14 = vmul.f32 %v474_v13, %v362_v44 }
 0x134   : > { %v438_v28 = vrot.slane %v437_v21, 1 }
 0x135   : > { %v492_v19 = vsel %vm426_vm1, %v488_v14, 0.0 }
 0x136   : > { %v482_v18 = vpop.permute.xlu1 %481  ;;  %v494_v25 = vadd.f32 %v493_v22, %v492_v19  ;;  %v439_v32 = vadd.f32 %v438_v28, %v437_v21 }
 0x137   : > { %v490_v20 = vmul.f32 %v482_v18, %v364_v50 }
 0x138   : > { %v442_v40 = vadd.f32 %v441_v37, %v439_v32 }
 0x139   : > { %v495_v23 = vsel %vm426_vm1, %v490_v20, 0.0 }
 0x13a   : > { %v486_v26 = vpop.permute.xlu1 %485  ;;  %v496_v29 = vadd.f32 %v495_v23, %v494_v25  ;;  %v443_v44 = vmax.f32 %v442_v40, 0.0 }
 0x13b   : > { %v491_v27 = vmul.f32 %v486_v26, %v365_v57 }
 0x13c   : > { %v464_v49 = vmul.f32 %v447_v3, %v443_v44  ;;  %v465_v50 = vmul.f32 %v452_v42, %v443_v44  ;;  %v466_v54 = vmul.f32 %v457_v8, %v443_v44  ;;  %v467_v55 = vmul.f32 %v462_v51, %v443_v44 }
 0x13d   : > { %v497_v30 = vsel %vm426_vm1, %v491_v27, 0.0 }
 0x13e   : > { %v498_v31 = vadd.f32 %v497_v30, %v496_v29  ;;  %v515_v48 = vpop.permute.xlu1 %514  ;;  %v468_v56 = vadd.f32 %v464_v49, %v381_v33  ;;  %v469_v57 = vadd.f32 %v465_v50, %v3589_v35  ;;  %v470_v9 = vadd.f32 %v466_v54, %v3591_v36 }
 0x13f   : > { %v471_v3 = vadd.f32 %v467_v55, %v3593_v38 }
 0x140   : > { %v499_v34 = vrot.slane %v498_v31, 4 }
 0x142   : > { %v500_v39 = vadd.f32 %v499_v34, %v498_v31  ;;  %v523_v60 = vpop.permute.xlu1 %522  ;;  %v3298_v34 = vmov 0.0  }
 0x143   : > { %643 = vst [vmem:[#allocation2] sm:$0xff] %v3298_v34  ;;  %644 = vst [vmem:[#allocation2 + $0x8] sm:$0xff] %v3298_v34 }
 0x144   : > { %v501_v41 = vrot.slane %v500_v39, 2  ;;  %645 = vst [vmem:[#allocation2 + $0x10] sm:$0xff] %v3298_v34  ;;  %646 = vst [vmem:[#allocation2 + $0x18] sm:$0xff] %v3298_v34 }
 0x145   : > { %647 = vst [vmem:[#allocation2 + $0x20] sm:$0xff] %v3298_v34  ;;  %648 = vst [vmem:[#allocation2 + $0x28] sm:$0xff] %v3298_v34 }
 0x146   : > { %v502_v43 = vadd.f32 %v501_v41, %v500_v39 }
 0x148   : > { %v503_v45 = vrot.slane %v502_v43, 1 }
 0x14a   : > { %v504_v47 = vadd.f32 %v503_v45, %v502_v43 }
 0x14c   : > { %v507_v52 = vadd.f32 %v506_v46, %v504_v47 }
 0x14e   : > { %v508_v53 = vmax.f32 %v507_v52, 0.0 }
 0x150   : > { %v526_v58 = vmul.f32 %v515_v48, %v508_v53  ;;  %v525_v59 = vmul.f32 %v511_v16, %v508_v53  ;;  %v528_v62 = vmul.f32 %v523_v60, %v508_v53  ;;  %v527_v7 = vmul.f32 %v519_v24, %v508_v53 }
 0x152   : > { %v530_v61 = vadd.f32 %v526_v58, %v469_v57  ;;  %v529_v63 = vadd.f32 %v525_v59, %v468_v56  ;;  %v532_v8 = vadd.f32 %v528_v62, %v471_v3  ;;  %v531_v12 = vadd.f32 %v527_v7, %v470_v9 }
 0x154   : > { %537 = vrot.lane.b32.xlu0 %v529_v63, %s5438_s13  ;;  %539 = vrot.lane.b32.xlu1 %v530_v61, %s5438_s13 }
 0x158   : > { %541 = vrot.lane.b32.xlu0 %v531_v12, %s5438_s13  ;;  %543 = vrot.lane.b32.xlu1 %v532_v8, %s5438_s13  ;;  %s3711_s13 = sld [smem:[#allocation10 + $0x3f]] }
 0x1c6   : > { %v540_v35 = vpop.permute.xlu1 %539  ;;  %v538_v13 = vpop.permute.xlu0 %537 }
 0x1c7   : > { %v550_v14 = vadd.f32 %v540_v35, %v530_v61  ;;  %v549_v15 = vadd.f32 %v538_v13, %v529_v63 }
 0x1c9   : > { %v2914_v16 = vmul.f32 -1.442695, %v550_v14  ;;  %v2913_v17 = vmul.f32 -1.442695, %v549_v15 }
 0x1ca   : > { %v544_v36 = vpop.permute.xlu1 %543  ;;  %v542_v18 = vpop.permute.xlu0 %541 }
 0x1cb   : > { %3123 = vpow2.f32 %v2914_v16  ;;  %v552_v38 = vadd.f32 %v544_v36, %v532_v8  ;;  %v551_v19 = vadd.f32 %v542_v18, %v531_v12 }
 0x1cc   : > { %3125 = vpow2.f32 %v2913_v17 }
 0x1cd   : > { %v2916_v20 = vmul.f32 -1.442695, %v552_v38  ;;  %v2915_v21 = vmul.f32 -1.442695, %v551_v19 }
 0x1cf   : > { %3127 = vpow2.f32 %v2916_v20 }
 0x1d0   : > { %3129 = vpow2.f32 %v2915_v21 }
 0x1d5   : > { %v3124_v22 = vpop.eup %3123 }
 0x1d6   : > { %v3126_v23 = vpop.eup %3125  ;;  %v566_v24 = vadd.f32 1.0, %v3124_v22 }
 0x1d7   : > { %v565_v25 = vadd.f32 1.0, %v3126_v23 }
 0x1d8   : > { %3131 = vrcp.f32 %v566_v24 }
 0x1d9   : > { %v3128_v26 = vpop.eup %3127  ;;  %3133 = vrcp.f32 %v565_v25 }
 0x1da   : > { %v3130_v27 = vpop.eup %3129  ;;  %v568_v28 = vadd.f32 1.0, %v3128_v26 }
 0x1db   : > { %v567_v29 = vadd.f32 1.0, %v3130_v27 }
 0x1dc   : > { %3135 = vrcp.f32 %v568_v28 }
 0x1dd   : > { %3137 = vrcp.f32 %v567_v29 }
 0x1e2   : > { %v3132_v30 = vpop.eup %3131 }
 0x1e3   : > { %v3134_v31 = vpop.eup %3133  ;;  %584 = vperm.xlu1 %3122, %v3132_v30  }
 0x1e4   : > { %579 = vperm.xlu0 %3121, %v3134_v31  }
 0x1e6   : > { %v3136_v32 = vpop.eup %3135 }
 0x1e7   : > { %v3138_v33 = vpop.eup %3137 }
 0x1e8   : > { %594 = vperm.xlu0 %3121, %v3136_v32   ;;  %589 = vperm.xlu1 %3122, %v3138_v33   ;;  %v800_v33 = vstv %s3678_s10  ;;  %s2936_s10 = sld [smem:[#allocation10 + $0xa]] }
 0x262   : > { %v585_v37 = vpop.permute.xlu1 %584 }
 0x263   : > { %v580_v39 = vpop.permute.xlu0 %579  ;;  %v3615_v40 = vmul.f32 %v585_v37, %v3537_v10 }
 0x264   : > { %v3618_v41 = vmul.f32 %v580_v39, %v3525_v2  ;;  %v3638_v55 = vmul.f32 %v580_v39, %v3529_v4 }
 0x265   : > { %5485 = vst [vmem:[#allocation19_spill] sm:$0xff] %v3615_v40 }
 0x266   : > { %5486 = vst [vmem:[#allocation20_spill] sm:$0xff] %v3618_v41  ;;  %v623_v44 = vadd.f32 %v3615_v40, %v3618_v41  ;;  %5490 = vst [vmem:[#allocation24_spill] sm:$0xff] %v3638_v55 }
 0x267   : > { %v590_v42 = vpop.permute.xlu1 %589  ;;  %v595_v43 = vpop.permute.xlu0 %594 }
 0x268   : > { %v3623_v45 = vmul.f32 %v590_v42, %v3521_v0  ;;  %v3626_v46 = vmul.f32 %v595_v43, %v3531_v5  ;;  %v3635_v5 = vmul.f32 %v585_v37, %v3539_v11  ;;  %v3641_v58 = vmul.f32 %v590_v42, %v3523_v1 }
 0x269   : > { %v3646_v63 = vmul.f32 %v595_v43, %v3533_v6 }
 0x26a   : > { %5487 = vst [vmem:[#allocation21_spill] sm:$0xff] %v3623_v45  ;;  %5488 = vst [vmem:[#allocation22_spill] sm:$0xff] %v3626_v46  ;;  %v605_v47 = vmax.f32 %v3618_v41, %v3623_v45  ;;  %v624_v10 = vadd.f32 %v623_v44, %v3623_v45  ;;  %v606_v2 = vmax.f32 %v3615_v40, %v3626_v46  ;;  %v828_v44 = vstv %s3681_s12  ;;  %s2976_s12 = sld [smem:[#allocation10 + $0x1e]] }
 0x26b   : > { %5489 = vst [vmem:[#allocation23_spill] sm:$0xff] %v3635_v5  ;;  %5491 = vst [vmem:[#allocation25_spill] sm:$0xff] %v3641_v58  ;;  %v632_v61 = vadd.f32 %v3635_v5, %v3638_v55  ;;  %v614_v1 = vmax.f32 %v3638_v55, %v3641_v58  ;;  %v615_v4 = vmax.f32 %v3635_v5, %v3646_v63 }
 0x26c   : > { %v625_v48 = vadd.f32 %v624_v10, %v3626_v46  ;;  %v607_v49 = vmax.f32 %v605_v47, %v606_v2  ;;  %5492 = vst [vmem:[#allocation26_spill] sm:$0xff] %v3646_v63  ;;  %v790_v47 = vstv %s3684_s21  ;;  %v794_v10 = vstv %s3686_s9  ;;  %s2992_s21 = sld [smem:[#allocation10 + $0x26]]  ;;  %s2994_s9 = sld [smem:[#allocation10 + $0x27]] }
 0x26d   : > { %v633_v11 = vadd.f32 %v632_v61, %v3641_v58  ;;  %v616_v6 = vmax.f32 %v614_v1, %v615_v4 }
 0x26e   : > { %v626_v50 = vrot.slane %v625_v48, 4  ;;  %v608_v51 = vrot.slane %v607_v49, 4 }
 0x26f   : > { %v634_v3 = vadd.f32 %v633_v11, %v3646_v63  ;;  %v617_v12 = vrot.slane %v616_v6, 4  ;;  %v3777_v11 = vstv %s3709_s19  ;;  %s3797_s19 = sld [smem:[#allocation10 + $0x5b]] }
 0x270   : > { %v627_v52 = vadd.f32 %v626_v50, %v625_v48  ;;  %v609_v53 = vmax.f32 %v607_v49, %v608_v51 }
 0x271   : > { %v635_v8 = vrot.slane %v634_v3, 4  ;;  %v618_v13 = vmax.f32 %v616_v6, %v617_v12  ;;  %v3803_v12 = vstv %s3719_s1  ;;  %s3309_s1 = smov 124  }
 0x272   : > { %v628_v0 = vrot.slane %v627_v52, 2  ;;  %v610_v54 = vrot.slane %v609_v53, 2 }
 0x273   : > { %v636_v35 = vadd.f32 %v635_v8, %v634_v3  ;;  %v619_v15 = vrot.slane %v618_v13, 2  ;;  %v3795_v8 = vstv %s3717_s0  ;;  %s3852_s0 = sld [smem:[#allocation10 + $0x8]] }
 0x274   : > { %v629_v56 = vadd.f32 %v628_v0, %v627_v52  ;;  %v611_v57 = vmax.f32 %v609_v53, %v610_v54 }
 0x275   : > { %v637_v14 = vrot.slane %v636_v35, 2  ;;  %v620_v17 = vmax.f32 %v618_v13, %v619_v15  ;;  %v3810_v13 = vstv %s3727_s2  ;;  %s3310_s2 = smov 123  }
 0x276   : > { %v630_v59 = vrot.slane %v629_v56, 1  ;;  %v612_v60 = vrot.slane %v611_v57, 1 }
 0x277   : > { %v638_v16 = vadd.f32 %v637_v14, %v636_v35  ;;  %v621_v18 = vrot.slane %v620_v17, 1  ;;  %v3813_v14 = vstv %s3729_s3  ;;  %s3311_s3 = smov 122  }
 0x278   : > { %v631_v62 = vadd.f32 %v630_v59, %v629_v56  ;;  %v613_v7 = vmax.f32 %v611_v57, %v612_v60 }
 0x279   : > { %v639_v36 = vrot.slane %v638_v16, 1  ;;  %v622_v19 = vmax.f32 %v620_v17, %v621_v18 }
 0x27a   : > { %v641_v9 = vmul.f32 0.03125, %v631_v62  ;;  %650 = vrot.lane.b32.xlu1 %v613_v7, %s3299_s16 }
 0x27b   : > { %v640_v38 = vadd.f32 %v639_v36, %v638_v16 }
 0x27c   : > { %656 = vrot.lane.b32.xlu0 %v641_v9, %s3299_s16 }
 0x27d   : > { %v642_v20 = vmul.f32 0.03125, %v640_v38 }
 0x27e   : > { %661 = vrot.lane.b32.xlu1 %v613_v7, %s3300_s24 }
 0x280   : > { %665 = vrot.lane.b32.xlu0 %v641_v9, %s3300_s24 }
 0x282   : > { %669 = vrot.lane.b32.xlu1 %v613_v7, %s3301_s22 }
 0x284   : > { %673 = vrot.lane.b32.xlu0 %v641_v9, %s3301_s22 }
 0x286   : > { %677 = vrot.lane.b32.xlu1 %v613_v7, %s3302_s30 }
 0x288   : > { %681 = vrot.lane.b32.xlu0 %v641_v9, %s3302_s30 }
 0x28a   : > { %685 = vrot.lane.b32.xlu1 %v613_v7, %s3303_s20 }
 0x28c   : > { %689 = vrot.lane.b32.xlu0 %v641_v9, %s3303_s20 }
 0x28e   : > { %693 = vrot.lane.b32.xlu1 %v613_v7, %s3304_s17 }
 0x290   : > { %697 = vrot.lane.b32.xlu0 %v641_v9, %s3304_s17 }
 0x292   : > { %701 = vrot.lane.b32.xlu1 %v613_v7, %s3305_s25 }
 0x294   : > { %705 = vrot.lane.b32.xlu0 %v641_v9, %s3305_s25 }
 0x296   : > { %709 = vrot.lane.b32.xlu1 %v613_v7, %s3306_s23 }
 0x298   : > { %713 = vrot.lane.b32.xlu0 %v641_v9, %s3306_s23  ;;  %v3780_v9 = vstv %s3711_s13  ;;  %s3800_s13 = sld [smem:[#allocation10 + $0x6]] }
 0x29a   : > { %718 = vrot.lane.b32.xlu1 %v622_v19, %s3299_s16 }
 0x29c   : > { %723 = vrot.lane.b32.xlu0 %v642_v20, %s3299_s16  ;;  %s3688_s16 = sld [smem:[#allocation10 + $0x7]] }
 0x29e   : > { %727 = vrot.lane.b32.xlu1 %v622_v19, %s3300_s24 }
 0x2a0   : > { %731 = vrot.lane.b32.xlu0 %v642_v20, %s3300_s24  ;;  %s3690_s24 = sld [smem:[#allocation10 + $0x38]] }
 0x2a2   : > { %735 = vrot.lane.b32.xlu1 %v622_v19, %s3301_s22  ;;  %v3733_v2 = vstv %s3688_s16  ;;  %s3756_s16 = sld [smem:[#allocation10 + $0x1c]] }
 0x2a4   : > { %739 = vrot.lane.b32.xlu0 %v642_v20, %s3301_s22  ;;  %s3693_s22 = sld [smem:[#allocation10 + $0x3]] }
 0x2a6   : > { %743 = vrot.lane.b32.xlu1 %v622_v19, %s3302_s30  ;;  %v3736_v48 = vstv %s3690_s24  ;;  %s3758_s24 = sld [smem:[#allocation10 + $0x4d]] }
 0x2a8   : > { %747 = vrot.lane.b32.xlu0 %v642_v20, %s3302_s30  ;;  %s3695_s30 = sld [smem:[#allocation10 + $0x4]] }
 0x2aa   : > { %751 = vrot.lane.b32.xlu1 %v622_v19, %s3303_s20  ;;  %v856_v0 = vstv %s3693_s22  ;;  %s3967_s22 = sld [smem:[#allocation10 + $0x21]] }
 0x2ac   : > { %755 = vrot.lane.b32.xlu0 %v642_v20, %s3303_s20  ;;  %s3699_s20 = sld [smem:[#allocation10 + $0x1f]] }
 0x2ae   : > { %759 = vrot.lane.b32.xlu1 %v622_v19, %s3304_s17  ;;  %v884_v3 = vstv %s3695_s30  ;;  %s3997_s30 = sld [smem:[#allocation10 + $0x22]] }
 0x2b0   : > { %763 = vrot.lane.b32.xlu0 %v642_v20, %s3304_s17  ;;  %s3701_s17 = sld [smem:[#allocation10 + $0x20]] }
 0x2b2   : > { %767 = vrot.lane.b32.xlu1 %v622_v19, %s3305_s25  ;;  %v3764_v59 = vstv %s3699_s20  ;;  %s3784_s20 = sld [smem:[#allocation10 + $0x2a]] }
 0x2b4   : > { %771 = vrot.lane.b32.xlu0 %v642_v20, %s3305_s25  ;;  %s3703_s25 = sld [smem:[#allocation10 + $0x24]] }
 0x2b6   : > { %775 = vrot.lane.b32.xlu1 %v622_v19, %s3306_s23  ;;  %v3767_v60 = vstv %s3701_s17  ;;  %s3308_s17 = smov 125  }
 0x2b8   : > { %779 = vrot.lane.b32.xlu0 %v642_v20, %s3306_s23  ;;  %s3705_s23 = sld [smem:[#allocation10 + $0x2b]] }
 0x2ba   : > { %v3774_v7 = vstv %s3703_s25  ;;  %s2990_s25 = sld [smem:[#allocation10 + $0x25]] }
 0x2be   : > { %v3792_v6 = vstv %s3705_s23  ;;  %s3969_s23 = sld [smem:[#allocation10 + $0x2e]] }
 0x2ec   : > { %v651_v21 = vpop.permute.xlu1 %650 }
 0x2ed   : > { %654 = vst.msk [vmem:[#allocation2 + $0x3] sm:$0x1] %vm653_vm2, %v651_v21 }
 0x2ee   : > { %v657_v22 = vpop.permute.xlu0 %656 }
 0x2ef   : > { %660 = vst.msk [vmem:[#allocation2 + $0x1b] sm:$0x1] %vm653_vm2, %v657_v22 }
 0x2f0   : > { %v662_v23 = vpop.permute.xlu1 %661 }
 0x2f1   : > { %664 = vst.msk [vmem:[#allocation2 + $0x4] sm:$0x1] %vm653_vm2, %v662_v23 }
 0x2f2   : > { %v666_v24 = vpop.permute.xlu0 %665 }
 0x2f3   : > { %668 = vst.msk [vmem:[#allocation2 + $0x1c] sm:$0x1] %vm653_vm2, %v666_v24 }
 0x2f4   : > { %v670_v25 = vpop.permute.xlu1 %669 }
 0x2f5   : > { %672 = vst.msk [vmem:[#allocation2 + $0x5] sm:$0x1] %vm653_vm2, %v670_v25 }
 0x2f6   : > { %v674_v26 = vpop.permute.xlu0 %673 }
 0x2f7   : > { %676 = vst.msk [vmem:[#allocation2 + $0x1d] sm:$0x1] %vm653_vm2, %v674_v26  ;;  %v912_v26 = vstv %s3742_s5  ;;  %s3995_s5 = sld [smem:[#allocation10 + $0x28]] }
 0x2f8   : > { %v678_v27 = vpop.permute.xlu1 %677 }
 0x2f9   : > { %680 = vst.msk [vmem:[#allocation2 + $0x6] sm:$0x1] %vm653_vm2, %v678_v27  ;;  %v3855_v27 = vstv %s3756_s16  ;;  %s4021_s16 = sld [smem:[#allocation10 + $0xb]] }
 0x2fa   : > { %v682_v28 = vpop.permute.xlu0 %681 }
 0x2fb   : > { %684 = vst.msk [vmem:[#allocation2 + $0x1e] sm:$0x1] %vm653_vm2, %v682_v28  ;;  %v3858_v28 = vstv %s3758_s24  ;;  %s2940_s24 = sld [smem:[#allocation10 + $0xc]] }
 0x2fc   : > { %v686_v29 = vpop.permute.xlu1 %685 }
 0x2fd   : > { %688 = vst.msk [vmem:[#allocation2 + $0x7] sm:$0x1] %vm653_vm2, %v686_v29 }
 0x2fe   : > { %v690_v30 = vpop.permute.xlu0 %689 }
 0x2ff   : > { %692 = vst.msk [vmem:[#allocation2 + $0x1f] sm:$0x1] %vm653_vm2, %v690_v30 }
 0x300   : > { %v694_v31 = vpop.permute.xlu1 %693 }
 0x301   : > { %696 = vst.msk [vmem:[#allocation2 + $0x8] sm:$0x1] %vm653_vm2, %v694_v31  ;;  %v3864_v31 = vstv %s3769_s28  ;;  %s2934_s28 = sld [smem:[#allocation10 + $0x9]] }
 0x302   : > { %v698_v32 = vpop.permute.xlu0 %697 }
 0x303   : > { %700 = vst.msk [vmem:[#allocation2 + $0x20] sm:$0x1] %vm653_vm2, %v698_v32 }
 0x304   : > { %v3707_v34 = vld [vmem:[#allocation2] sm:$0xff]  ;;  %v702_v37 = vpop.permute.xlu1 %701 }
 0x305   : > { %704 = vst.msk [vmem:[#allocation2 + $0x9] sm:$0x1] %vm653_vm2, %v702_v37  ;;  %v801_v42 = vmul.f32 %v800_v33, %v3707_v34  ;;  %v829_v51 = vmul.f32 %v828_v44, %v3707_v34  ;;  %v791_v52 = vmul.f32 %v790_v47, %v3707_v34  ;;  %v969_v54 = vmul.f32 %v3733_v2, %v3707_v34 }
 0x306   : > { %v706_v39 = vpop.permute.xlu0 %705  ;;  %v3721_v43 = vld [vmem:[#allocation2 + $0x18] sm:$0xff]  ;;  %v857_v4 = vmul.f32 %v856_v0, %v3707_v34  ;;  %v3807_v35 = vmul.f32 %v3764_v59, %v3707_v34  ;;  %v1222_v15 = vmul.f32 %v3777_v11, %v3707_v34  ;;  %v3822_v17 = vmul.f32 %v3767_v60, %v3707_v34 }
 0x307   : > { %708 = vst.msk [vmem:[#allocation2 + $0x21] sm:$0x1] %vm653_vm2, %v706_v39  ;;  %805 = vrot.lane.b32.xlu1 %v801_v42, %s5493_s4  ;;  %v795_v53 = vmul.f32 %v794_v10, %v3721_v43  ;;  %v974_v56 = vmul.f32 %v3736_v48, %v3721_v43  ;;  %v1227_v16 = vmul.f32 %v3780_v9, %v3721_v43  ;;  %v3870_v37 = vstv %s3784_s20  ;;  %s2942_s20 = sld [smem:[#allocation10 + $0xd]] }
 0x308   : > { %v710_v49 = vpop.permute.xlu1 %709  ;;  %v3826_v36 = vmul.f32 %v3774_v7, %v3707_v34  ;;  %v885_v38 = vmul.f32 %v884_v3, %v3707_v34  ;;  %v3833_v19 = vmul.f32 %v3792_v6, %v3707_v34  ;;  %v3837_v20 = vmul.f32 %v3795_v8, %v3707_v34 }
 0x309   : > { %712 = vst.msk [vmem:[#allocation2 + $0xa] sm:$0x1] %vm653_vm2, %v710_v49  ;;  %v3761_v57 = vadd.f32 %v795_v53, %v791_v52  ;;  %v3771_v62 = vadd.f32 %v974_v56, %v969_v54  ;;  %v3840_v22 = vadd.f32 %v1227_v16, %v1222_v15  ;;  %v3844_v23 = vmul.f32 %v3803_v12, %v3707_v34 }
 0x30a   : > { %v714_v50 = vpop.permute.xlu0 %713  ;;  %v1475_v24 = vmul.f32 %v3810_v13, %v3707_v34  ;;  %v1480_v25 = vmul.f32 %v3813_v14, %v3721_v43  ;;  %v913_v42 = vmul.f32 %v912_v26, %v3707_v34  ;;  %v3877_v49 = vstv %s3797_s19  ;;  %s2946_s19 = sld [smem:[#allocation10 + $0xf]] }
 0x30b   : > { %716 = vst.msk [vmem:[#allocation2 + $0x22] sm:$0x1] %vm653_vm2, %v714_v50  ;;  %833 = vrot.lane.b32.xlu1 %v829_v51, %s5441_s11  ;;  %s3782_s11 = sld [smem:[#allocation10 + $0x54]]  ;;  %v1728_v50 = vmul.f32 %v3855_v27, %v3707_v34  ;;  %v1733_v51 = vmul.f32 %v3858_v28, %v3721_v43  ;;  %v940_v52 = vstv %s3800_s13  ;;  %v1981_v54 = vmul.f32 %v3864_v31, %v3707_v34  ;;  %s2948_s13 = sld [smem:[#allocation10 + $0x10]] }
 0x30c   : > { %v719_v61 = vpop.permute.xlu1 %718  ;;  %v3861_v29 = vadd.f32 %v1480_v25, %v1475_v24  ;;  %v941_v16 = vmul.f32 %v940_v52, %v3707_v34 }
 0x30d   : > { %721 = vst.msk [vmem:[#allocation2 + $0xb] sm:$0x1] %vm653_vm2, %v719_v61  ;;  %v3886_v53 = vadd.f32 %v1733_v51, %v1728_v50 }
 0x30e   : > { %v724_v1 = vpop.permute.xlu0 %723  ;;  %5494 = vst [vmem:[#allocation27_spill] sm:$0xff] %v3861_v29 }
 0x30f   : > { %726 = vst.msk [vmem:[#allocation2 + $0x23] sm:$0x1] %vm653_vm2, %v724_v1  ;;  %861 = vrot.lane.b32.xlu1 %v857_v4, %s3308_s17  ;;  %5495 = vst [vmem:[#allocation28_spill] sm:$0xff] %v3886_v53  ;;  %v2234_v1 = vmul.f32 %v3870_v37, %v3707_v34  ;;  %v2239_v4 = vmul.f32 %v3877_v49, %v3721_v43 }
 0x310   : > { %v728_v18 = vpop.permute.xlu1 %727 }
 0x311   : > { %730 = vst.msk [vmem:[#allocation2 + $0xc] sm:$0x1] %vm653_vm2, %v728_v18  ;;  %v3867_v32 = vstv %s3782_s11  ;;  %s5498_s11 = smov 126  }
 0x312   : > { %v732_v21 = vpop.permute.xlu0 %731  ;;  %v1986_v56 = vmul.f32 %v3867_v32, %v3721_v43 }
 0x313   : > { %734 = vst.msk [vmem:[#allocation2 + $0x24] sm:$0x1] %vm653_vm2, %v732_v21  ;;  %889 = vrot.lane.b32.xlu1 %v885_v38, %s3309_s1  ;;  %v3904_v38 = vstv %s3852_s0  ;;  %v3906_v21 = vadd.f32 %v2239_v4, %v2234_v1  ;;  %s2950_s0 = sld [smem:[#allocation10 + $0x11]] }
 0x314   : > { %v736_v30 = vpop.permute.xlu1 %735  ;;  %v3900_v18 = vadd.f32 %v1986_v56, %v1981_v54 }
 0x315   : > { %738 = vst.msk [vmem:[#allocation2 + $0xd] sm:$0x1] %vm653_vm2, %v736_v30  ;;  %5497 = vst [vmem:[#allocation30_spill] sm:$0xff] %v3906_v21  ;;  %v982_v30 = vmul.f32 %v3904_v38, %v3707_v34 }
 0x316   : > { %v740_v39 = vpop.permute.xlu0 %739  ;;  %5496 = vst [vmem:[#allocation29_spill] sm:$0xff] %v3900_v18 }
 0x317   : > { %742 = vst.msk [vmem:[#allocation2 + $0x25] sm:$0x1] %vm653_vm2, %v740_v39  ;;  %917 = vrot.lane.b32.xlu1 %v913_v42, %s3310_s2 }
 0x318   : > { %v744_v61 = vpop.permute.xlu1 %743 }
 0x319   : > { %746 = vst.msk [vmem:[#allocation2 + $0xe] sm:$0x1] %vm653_vm2, %v744_v61 }
 0x31a   : > { %v748_v15 = vpop.permute.xlu0 %747 }
 0x31b   : > { %750 = vst.msk [vmem:[#allocation2 + $0x26] sm:$0x1] %vm653_vm2, %v748_v15  ;;  %945 = vrot.lane.b32.xlu1 %v941_v16, %s3311_s3 }
 0x31c   : > { %v752_v24 = vpop.permute.xlu1 %751 }
 0x31d   : > { %754 = vst.msk [vmem:[#allocation2 + $0xf] sm:$0x1] %vm653_vm2, %v752_v24 }
 0x31e   : > { %v756_v25 = vpop.permute.xlu0 %755 }
 0x31f   : > { %758 = vst.msk [vmem:[#allocation2 + $0x27] sm:$0x1] %vm653_vm2, %v756_v25  ;;  %988 = vrot.lane.b32.xlu1 %v982_v30, %s5493_s4 }
 0x320   : > { %v760_v39 = vpop.permute.xlu1 %759 }
 0x321   : > { %762 = vst.msk [vmem:[#allocation2 + $0x10] sm:$0x1] %vm653_vm2, %v760_v39 }
 0x322   : > { %v764_v42 = vpop.permute.xlu0 %763 }
 0x323   : > { %766 = vst.msk [vmem:[#allocation2 + $0x28] sm:$0x1] %vm653_vm2, %v764_v42 }
 0x324   : > { %v3916_v50 = vld [vmem:[#allocation2 + $0x8] sm:$0xff]  ;;  %v768_v51 = vpop.permute.xlu1 %767 }
 0x325   : > { %770 = vst.msk [vmem:[#allocation2 + $0x11] sm:$0x1] %vm653_vm2, %v768_v51  ;;  %v802_v56 = vmul.f32 %v800_v33, %v3916_v50  ;;  %v830_v15 = vmul.f32 %v828_v44, %v3916_v50  ;;  %v792_v16 = vmul.f32 %v790_v47, %v3916_v50  ;;  %v858_v24 = vmul.f32 %v856_v0, %v3916_v50 }
 0x326   : > { %v772_v54 = vpop.permute.xlu0 %771  ;;  %v3924_v1 = vld [vmem:[#allocation2 + $0x20] sm:$0xff]  ;;  %v970_v25 = vmul.f32 %v3733_v2, %v3916_v50  ;;  %v886_v51 = vmul.f32 %v884_v3, %v3916_v50  ;;  %v1982_v21 = vmul.f32 %v3864_v31, %v3916_v50 }
 0x327   : > { %774 = vst.msk [vmem:[#allocation2 + $0x29] sm:$0x1] %vm653_vm2, %v772_v54  ;;  %807 = vrot.lane.b32.xlu0 %v802_v56, %s5493_s4  ;;  %v796_v33 = vmul.f32 %v794_v10, %v3924_v1  ;;  %v975_v44 = vmul.f32 %v3736_v48, %v3924_v1  ;;  %v1223_v10 = vmul.f32 %v3777_v11, %v3916_v50 }
 0x328   : > { %v776_v61 = vpop.permute.xlu1 %775  ;;  %v1228_v47 = vmul.f32 %v3780_v9, %v3924_v1 }
 0x329   : > { %778 = vst.msk [vmem:[#allocation2 + $0x12] sm:$0x1] %vm653_vm2, %v776_v61  ;;  %v3945_v30 = vadd.f32 %v796_v33, %v792_v16  ;;  %v3952_v0 = vadd.f32 %v975_v44, %v970_v25  ;;  %v1021_v61 = vstv %s2934_s28  ;;  %v3979_v16 = vstv %s2936_s10  ;;  %s2952_s28 = sld [smem:[#allocation10 + $0x12]]  ;;  %s2954_s10 = sld [smem:[#allocation10 + $0x13]] }
 0x32a   : > { %v780_v4 = vpop.permute.xlu0 %779  ;;  %v3956_v42 = vadd.f32 %v1228_v47, %v1223_v10  ;;  %v1022_v3 = vmul.f32 %v1021_v61, %v3707_v34  ;;  %v3983_v25 = vstv %s2990_s25  ;;  %v1481_v44 = vmul.f32 %v3813_v14, %v3924_v1  ;;  %s2960_s25 = sld [smem:[#allocation10 + $0x16]] }
 0x32b   : > { %782 = vst.msk [vmem:[#allocation2 + $0x2a] sm:$0x1] %vm653_vm2, %v780_v4  ;;  %835 = vrot.lane.b32.xlu0 %v830_v15, %s5498_s11  ;;  %v914_v4 = vmul.f32 %v912_v26, %v3916_v50  ;;  %v3991_v10 = vstv %s2992_s21  ;;  %v1062_v45 = vmul.f32 %v3979_v16, %v3707_v34  ;;  %v1063_v29 = vmul.f32 %v3979_v16, %v3916_v50  ;;  %s2962_s21 = sld [smem:[#allocation10 + $0x17]] }
 0x32c   : > { %5499 = vst [vmem:[#allocation31_spill] sm:$0xff] %v3956_v42  ;;  %v4059_v5 = vmul.f32 %v3991_v10, %v3916_v50 }
 0x32f   : > { %863 = vrot.lane.b32.xlu0 %v858_v24, %s3308_s17  ;;  %v3981_v24 = vstv %s2976_s12  ;;  %s2956_s12 = sld [smem:[#allocation10 + $0x14]] }
 0x330   : > { %v3954_v39 = vld [vmem:[#allocation2 + $0x10] sm:$0xff] }
 0x331   : > { %v984_v54 = vmul.f32 %v3904_v38, %v3954_v39  ;;  %v971_v15 = vmul.f32 %v3733_v2, %v3954_v39  ;;  %v3993_v2 = vstv %s2994_s9  ;;  %v4004_v47 = vmul.f32 %v3981_v24, %v3954_v39  ;;  %s2964_s9 = sld [smem:[#allocation10 + $0x18]] }
 0x332   : > { %v3963_v56 = vld [vmem:[#allocation2 + $0x28] sm:$0xff]  ;;  %v4027_v63 = vmul.f32 %v3774_v7, %v3954_v39  ;;  %v4031_v46 = vmul.f32 %v3792_v6, %v3954_v39  ;;  %v4049_v58 = vmul.f32 %v3795_v8, %v3954_v39  ;;  %v1477_v40 = vmul.f32 %v3810_v13, %v3954_v39 }
 0x333   : > { %891 = vrot.lane.b32.xlu0 %v886_v51, %s3309_s1  ;;  %992 = vrot.lane.b32.xlu1 %v984_v54, %s5493_s4  ;;  %v976_v33 = vmul.f32 %v3736_v48, %v3963_v56  ;;  %v942_v48 = vmul.f32 %v940_v52, %v3916_v50  ;;  %v4008_v51 = vmul.f32 %v3764_v59, %v3954_v39 }
 0x334   : > { %v1476_v54 = vmul.f32 %v3810_v13, %v3916_v50  ;;  %v1229_v52 = vmul.f32 %v3780_v9, %v3963_v56  ;;  %v4040_v9 = vstv %s3967_s22  ;;  %v1482_v55 = vmul.f32 %v3813_v14, %v3963_v56  ;;  %s2966_s22 = sld [smem:[#allocation10 + $0x19]] }
 0x335   : > { %v3989_v26 = vadd.f32 %v976_v33, %v971_v15  ;;  %v4019_v15 = vmul.f32 %v3767_v60, %v3954_v39  ;;  %v4075_v18 = vmul.f32 %v3993_v2, %v3916_v50  ;;  %v4084_v13 = vstv %s3995_s5  ;;  %s2970_s5 = sld [smem:[#allocation10 + $0x1b]] }
 0x336   : > { %v4023_v33 = vadd.f32 %v1481_v44, %v1476_v54  ;;  %v4043_v44 = vstv %s3969_s23  ;;  %v4087_v14 = vstv %s3997_s30  ;;  %s2968_s23 = sld [smem:[#allocation10 + $0x1a]]  ;;  %s2974_s30 = sld [smem:[#allocation10 + $0x1d]] }
 0x337   : > { %919 = vrot.lane.b32.xlu0 %v914_v4, %s3310_s2  ;;  %1028 = vrot.lane.b32.xlu1 %v1022_v3, %s5498_s11  ;;  %v1024_v4 = vmul.f32 %v1021_v61, %v3954_v39  ;;  %v1224_v3 = vmul.f32 %v3777_v11, %v3954_v39  ;;  %v4035_v11 = vmul.f32 %v3983_v25, %v3916_v50 }
 0x338   : > { %5500 = vst [vmem:[#allocation32_spill] sm:$0xff] %v4023_v33  ;;  %v1023_v33 = vmul.f32 %v1021_v61, %v3916_v50  ;;  %v1730_v61 = vmul.f32 %v3855_v27, %v3954_v39 }
 0x339   : > { %v4045_v54 = vadd.f32 %v1229_v52, %v1224_v3  ;;  %v983_v3 = vmul.f32 %v3904_v38, %v3916_v50  ;;  %v4065_v52 = vmul.f32 %v3803_v12, %v3954_v39  ;;  %v1987_v38 = vmul.f32 %v3867_v32, %v3924_v1 }
 0x33b   : > { %947 = vrot.lane.b32.xlu0 %v942_v48, %s3311_s3  ;;  %1032 = vrot.lane.b32.xlu1 %v1024_v4, %s5498_s11  ;;  %5501 = vst [vmem:[#allocation33_spill] sm:$0xff] %v4045_v54  ;;  %v1729_v48 = vmul.f32 %v3855_v27, %v3916_v50  ;;  %v1734_v4 = vmul.f32 %v3858_v28, %v3924_v1 }
 0x33c   : > { %v4095_v53 = vadd.f32 %v1987_v38, %v1982_v21  ;;  %v4114_v21 = vmul.f32 %v4087_v14, %v3916_v50  ;;  %v1101_v38 = vstv %s4021_s16  ;;  %v1988_v27 = vmul.f32 %v3867_v32, %v3963_v56  ;;  %s4397_s16 = sld [smem:[#allocation10 + $0x32]] }
 0x33d   : > { %v4071_v41 = vadd.f32 %v1734_v4, %v1729_v48  ;;  %v4089_v48 = vadd.f32 %v1482_v55, %v1477_v40  ;;  %v4093_v4 = vmul.f32 %v4040_v9, %v3916_v50  ;;  %v1064_v40 = vmul.f32 %v3979_v16, %v3954_v39 }
 0x33e   : > { %5504 = vst [vmem:[#allocation36_spill] sm:$0xff] %v4095_v53  ;;  %v4110_v55 = vmul.f32 %v4084_v13, %v3916_v50  ;;  %v1102_v42 = vmul.f32 %v1101_v38, %v3707_v34 }
 0x33f   : > { %5502 = vst [vmem:[#allocation34_spill] sm:$0xff] %v4071_v41  ;;  %990 = vrot.lane.b32.xlu0 %v983_v3, %s5493_s4  ;;  %1068 = vrot.lane.b32.xlu1 %v1062_v45, %s3308_s17  ;;  %5503 = vst [vmem:[#allocation35_spill] sm:$0xff] %v4089_v48  ;;  %v2235_v41 = vmul.f32 %v3870_v37, %v3916_v50  ;;  %v2240_v3 = vmul.f32 %v3877_v49, %v3924_v1 }
 0x340   : > { %v4103_v45 = vmul.f32 %v4043_v44, %v3916_v50  ;;  %v1735_v48 = vmul.f32 %v3858_v28, %v3963_v56  ;;  %v1104_v28 = vmul.f32 %v1101_v38, %v3954_v39 }
 0x341   : > { %v4117_v53 = vadd.f32 %v2240_v3, %v2235_v41  ;;  %v1983_v41 = vmul.f32 %v3864_v31, %v3954_v39 }
 0x342   : > { %v4128_v54 = vadd.f32 %v1735_v48, %v1730_v61  ;;  %v2236_v48 = vmul.f32 %v3870_v37, %v3954_v39  ;;  %v1181_v37 = vstv %s2942_s20  ;;  %s4420_s20 = sld [smem:[#allocation10 + $0x34]] }
 0x343   : > { %5505 = vst [vmem:[#allocation37_spill] sm:$0xff] %v4117_v53  ;;  %1030 = vrot.lane.b32.xlu0 %v1023_v33, %s5498_s11  ;;  %1072 = vrot.lane.b32.xlu1 %v1064_v40, %s3308_s17  ;;  %v1103_v33 = vmul.f32 %v1101_v38, %v3916_v50  ;;  %v4138_v16 = vadd.f32 %v1988_v27, %v1983_v41  ;;  %v1234_v38 = vstv %s2946_s19  ;;  %v1274_v27 = vstv %s2948_s13  ;;  %s4433_s19 = sld [smem:[#allocation10 + $0x35]]  ;;  %s4446_s13 = sld [smem:[#allocation10 + $0x36]] }
 0x344   : > { %5506 = vst [vmem:[#allocation38_spill] sm:$0xff] %v4128_v54  ;;  %v1236_v61 = vmul.f32 %v1234_v38, %v3916_v50  ;;  %v1182_v41 = vmul.f32 %v1181_v37, %v3707_v34  ;;  %v4220_v53 = vstv %s2974_s30  ;;  %s2953_s30 = sld [smem:[#allocation10 + $0x43]] }
 0x345   : > { %5507 = vst [vmem:[#allocation39_spill] sm:$0xff] %v4138_v16 }
 0x347   : > { %1070 = vrot.lane.b32.xlu0 %v1063_v29, %s3308_s17  ;;  %1108 = vrot.lane.b32.xlu1 %v1102_v42, %s3309_s1  ;;  %v2241_v29 = vmul.f32 %v3877_v49, %v3963_v56  ;;  %v1141_v42 = vstv %s2940_s24  ;;  %v1183_v49 = vmul.f32 %v1181_v37, %v3916_v50  ;;  %s4408_s24 = sld [smem:[#allocation10 + $0x33]] }
 0x348   : > { %v1143_v32 = vmul.f32 %v1141_v42, %v3916_v50  ;;  %v1142_v3 = vmul.f32 %v1141_v42, %v3707_v34  ;;  %v1144_v40 = vmul.f32 %v1141_v42, %v3954_v39  ;;  %v1235_v42 = vmul.f32 %v1234_v38, %v3707_v34 }
 0x349   : > { %v4146_v31 = vadd.f32 %v2241_v29, %v2236_v48  ;;  %v1314_v48 = vstv %s2950_s0  ;;  %s4459_s0 = sld [smem:[#allocation10 + $0x37]] }
 0x34a   : > { %v1316_v29 = vmul.f32 %v1314_v48, %v3916_v50 }
 0x34b   : > { %1110 = vrot.lane.b32.xlu0 %v1103_v33, %s3309_s1  ;;  %1112 = vrot.lane.b32.xlu1 %v1104_v28, %s3309_s1  ;;  %5508 = vst [vmem:[#allocation40_spill] sm:$0xff] %v4146_v31  ;;  %v1276_v33 = vmul.f32 %v1274_v27, %v3916_v50  ;;  %v1184_v28 = vmul.f32 %v1181_v37, %v3954_v39 }
 0x34c   : > { %v1237_v37 = vmul.f32 %v1234_v38, %v3954_v39  ;;  %v1277_v38 = vmul.f32 %v1274_v27, %v3954_v39 }
 0x34f   : > { %1150 = vrot.lane.b32.xlu0 %v1143_v32, %s3310_s2  ;;  %1148 = vrot.lane.b32.xlu1 %v1142_v3, %s3310_s2  ;;  %v1354_v32 = vstv %s2952_s28  ;;  %s2933_s28 = sld [smem:[#allocation10 + $0x39]] }
 0x350   : > { %v1356_v3 = vmul.f32 %v1354_v32, %v3916_v50 }
 0x353   : > { %1190 = vrot.lane.b32.xlu0 %v1183_v49, %s3311_s3  ;;  %1152 = vrot.lane.b32.xlu1 %v1144_v40, %s3310_s2  ;;  %v1394_v49 = vstv %s2954_s10  ;;  %s2935_s10 = sld [smem:[#allocation10 + $0x3a]] }
 0x354   : > { %v1396_v40 = vmul.f32 %v1394_v49, %v3916_v50 }
 0x357   : > { %1243 = vrot.lane.b32.xlu0 %v1236_v61, %s5493_s4  ;;  %1188 = vrot.lane.b32.xlu1 %v1182_v41, %s3311_s3  ;;  %v1275_v61 = vmul.f32 %v1274_v27, %v3707_v34  ;;  %v1434_v41 = vstv %s2956_s12  ;;  %v1317_v27 = vmul.f32 %v1314_v48, %v3954_v39  ;;  %s2937_s12 = sld [smem:[#allocation10 + $0x3b]] }
 0x35b   : > { %1283 = vrot.lane.b32.xlu0 %v1276_v33, %s5498_s11  ;;  %1192 = vrot.lane.b32.xlu1 %v1184_v28, %s3311_s3  ;;  %v1436_v33 = vmul.f32 %v1434_v41, %v3916_v50  ;;  %v1487_v28 = vstv %s2960_s25  ;;  %s2939_s25 = sld [smem:[#allocation10 + $0x3c]] }
 0x35c   : > { %v1488_v31 = vmul.f32 %v1487_v28, %v3707_v34 }
 0x35f   : > { %1323 = vrot.lane.b32.xlu0 %v1316_v29, %s3308_s17  ;;  %1241 = vrot.lane.b32.xlu1 %v1235_v42, %s5493_s4  ;;  %v1489_v29 = vmul.f32 %v1487_v28, %v3916_v50  ;;  %v1315_v42 = vmul.f32 %v1314_v48, %v3707_v34 }
 0x363   : > { %1363 = vrot.lane.b32.xlu0 %v1356_v3, %s3309_s1  ;;  %1245 = vrot.lane.b32.xlu1 %v1237_v37, %s5493_s4  ;;  %v1527_v3 = vstv %s2962_s21  ;;  %s2941_s21 = sld [smem:[#allocation10 + $0x3d]] }
 0x364   : > { %v1529_v37 = vmul.f32 %v1527_v3, %v3916_v50 }
 0x367   : > { %1403 = vrot.lane.b32.xlu0 %v1396_v40, %s3310_s2  ;;  %1281 = vrot.lane.b32.xlu1 %v1275_v61, %s5498_s11  ;;  %v4188_v40 = vstv %s2964_s9  ;;  %s2943_s9 = sld [smem:[#allocation10 + $0x3e]] }
 0x368   : > { %v1569_v61 = vmul.f32 %v4188_v40, %v3916_v50 }
 0x36b   : > { %1443 = vrot.lane.b32.xlu0 %v1436_v33, %s3311_s3  ;;  %1285 = vrot.lane.b32.xlu1 %v1277_v38, %s5498_s11  ;;  %v1355_v33 = vmul.f32 %v1354_v32, %v3707_v34  ;;  %v4195_v38 = vstv %s2966_s22  ;;  %s2947_s22 = sld [smem:[#allocation10 + $0x40]] }
 0x36c   : > { %v1609_v48 = vmul.f32 %v4195_v38, %v3916_v50 }
 0x36f   : > { %1496 = vrot.lane.b32.xlu0 %v1489_v29, %s5493_s4  ;;  %1321 = vrot.lane.b32.xlu1 %v1315_v42, %s3308_s17  ;;  %v1357_v29 = vmul.f32 %v1354_v32, %v3954_v39  ;;  %v4202_v42 = vstv %s2968_s23  ;;  %s2949_s23 = sld [smem:[#allocation10 + $0x41]] }
 0x373   : > { %1536 = vrot.lane.b32.xlu0 %v1529_v37, %s5498_s11  ;;  %1325 = vrot.lane.b32.xlu1 %v1317_v27, %s3308_s17  ;;  %v1649_v27 = vmul.f32 %v4202_v42, %v3916_v50 }
 0x377   : > { %1576 = vrot.lane.b32.xlu0 %v1569_v61, %s3308_s17  ;;  %1361 = vrot.lane.b32.xlu1 %v1355_v33, %s3309_s1  ;;  %v1395_v61 = vmul.f32 %v1394_v49, %v3707_v34  ;;  %v4211_v33 = vstv %s2970_s5  ;;  %s2951_s5 = sld [smem:[#allocation10 + $0x42]] }
 0x378   : > { %v1689_v32 = vmul.f32 %v4211_v33, %v3916_v50 }
 0x379   : > { %v4204_v37 = vpop.permute.xlu1 %805 }
 0x37b   : > { %1616 = vrot.lane.b32.xlu0 %v1609_v48, %s3309_s1  ;;  %1365 = vrot.lane.b32.xlu1 %v1357_v29, %s3309_s1  ;;  %v1397_v48 = vmul.f32 %v1394_v49, %v3954_v39  ;;  %v1782_v49 = vmul.f32 %v3981_v24, %v3916_v50 }
 0x37d   : > { %v4216_v29 = vpop.permute.xlu1 %833 }
 0x37f   : > { %1656 = vrot.lane.b32.xlu0 %v1649_v27, %s3310_s2  ;;  %1401 = vrot.lane.b32.xlu1 %v1395_v61, %s3310_s2  ;;  %v1742_v27 = vmul.f32 %v4220_v53, %v3916_v50  ;;  %v1435_v61 = vmul.f32 %v1434_v41, %v3707_v34 }
 0x381   : > { %v4227_v16 = vpop.permute.xlu1 %861 }
 0x383   : > { %1696 = vrot.lane.b32.xlu0 %v1689_v32, %s3311_s3  ;;  %1405 = vrot.lane.b32.xlu1 %v1397_v48, %s3310_s2  ;;  %v1437_v32 = vmul.f32 %v1434_v41, %v3954_v39  ;;  %v1822_v48 = vmul.f32 %v3764_v59, %v3916_v50  ;;  %v1490_v41 = vmul.f32 %v1487_v28, %v3954_v39 }
 0x384   : > { %v1995_v59 = vmul.f32 %v3774_v7, %v3916_v50  ;;  %v1530_v28 = vmul.f32 %v1527_v3, %v3954_v39 }
 0x385   : > { %v4237_v54 = vpop.permute.xlu1 %889 }
 0x387   : > { %1749 = vrot.lane.b32.xlu0 %v1742_v27, %s5493_s4  ;;  %1441 = vrot.lane.b32.xlu1 %v1435_v61, %s3311_s3  ;;  %v1862_v27 = vmul.f32 %v3767_v60, %v3916_v50  ;;  %v2248_v60 = vmul.f32 %v3792_v6, %v3916_v50 }
 0x389   : > { %v4246_v61 = vpop.permute.xlu1 %917 }
 0x38a   : > { %5509 = vst [vmem:[#allocation41_spill] sm:$0xff] %v4246_v61 }
 0x38b   : > { %1789 = vrot.lane.b32.xlu0 %v1782_v49, %s5498_s11  ;;  %1445 = vrot.lane.b32.xlu1 %v1437_v32, %s3311_s3  ;;  %v1528_v49 = vmul.f32 %v1527_v3, %v3707_v34 }
 0x38d   : > { %v4258_v32 = vpop.permute.xlu1 %945 }
 0x38e   : > { %5510 = vst [vmem:[#allocation42_spill] sm:$0xff] %v4258_v32 }
 0x38f   : > { %1829 = vrot.lane.b32.xlu0 %v1822_v48, %s3308_s17  ;;  %1494 = vrot.lane.b32.xlu1 %v1488_v31, %s5493_s4  ;;  %v2034_v48 = vmul.f32 %v3983_v25, %v3707_v34 }
 0x391   : > { %v4270_v6 = vpop.permute.xlu1 %988 }
 0x393   : > { %1869 = vrot.lane.b32.xlu0 %v1862_v27, %s3309_s1  ;;  %1498 = vrot.lane.b32.xlu1 %v1490_v41, %s5493_s4  ;;  %v1568_v27 = vmul.f32 %v4188_v40, %v3707_v34  ;;  %v2036_v41 = vmul.f32 %v3983_v25, %v3954_v39 }
 0x397   : > { %2002 = vrot.lane.b32.xlu0 %v1995_v59, %s5493_s4  ;;  %1534 = vrot.lane.b32.xlu1 %v1528_v49, %s5498_s11  ;;  %v1570_v59 = vmul.f32 %v4188_v40, %v3954_v39 }
 0x399   : > { %v4253_v31 = vpop.permute.xlu0 %807 }
 0x39b   : > { %2255 = vrot.lane.b32.xlu0 %v2248_v60, %s5493_s4  ;;  %1538 = vrot.lane.b32.xlu1 %v1530_v28, %s5498_s11  ;;  %v2288_v28 = vmul.f32 %v3795_v8, %v3916_v50 }
 0x39d   : > { %v4262_v7 = vpop.permute.xlu0 %835 }
 0x39f   : > { %2040 = vrot.lane.b32.xlu0 %v2034_v48, %s5498_s11  ;;  %1574 = vrot.lane.b32.xlu1 %v1568_v27, %s3308_s17  ;;  %v1608_v48 = vmul.f32 %v4195_v38, %v3707_v34  ;;  %v2074_v27 = vmul.f32 %v3991_v10, %v3707_v34 }
 0x3a1   : > { %v4272_v3 = vpop.permute.xlu0 %863 }
 0x3a3   : > { %2044 = vrot.lane.b32.xlu0 %v2036_v41, %s5498_s11  ;;  %1578 = vrot.lane.b32.xlu1 %v1570_v59, %s3308_s17  ;;  %v1610_v41 = vmul.f32 %v4195_v38, %v3954_v39 }
 0x3a5   : > { %v4280_v49 = vpop.permute.xlu0 %891  ;;  %v4282_v60 = vpop.permute.xlu1 %992 }
 0x3a7   : > { %2295 = vrot.lane.b32.xlu0 %v2288_v28, %s5498_s11  ;;  %1614 = vrot.lane.b32.xlu1 %v1608_v48, %s3309_s1  ;;  %v2076_v28 = vmul.f32 %v3991_v10, %v3954_v39  ;;  %v1648_v48 = vmul.f32 %v4202_v42, %v3707_v34 }
 0x3a9   : > { %v4290_v25 = vpop.permute.xlu0 %919  ;;  %v4292_v40 = vpop.permute.xlu1 %1028 }
 0x3aa   : > { %5511 = vst [vmem:[#allocation43_spill] sm:$0xff] %v4290_v25 }
 0x3ab   : > { %2080 = vrot.lane.b32.xlu0 %v2074_v27, %s3308_s17  ;;  %1618 = vrot.lane.b32.xlu1 %v1610_v41, %s3309_s1  ;;  %v2328_v27 = vmul.f32 %v3803_v12, %v3916_v50  ;;  %v1650_v41 = vmul.f32 %v4202_v42, %v3954_v39  ;;  %v2116_v42 = vmul.f32 %v3993_v2, %v3954_v39 }
 0x3ad   : > { %v4300_v8 = vpop.permute.xlu0 %947  ;;  %v4302_v59 = vpop.permute.xlu1 %1032 }
 0x3ae   : > { %5512 = vst [vmem:[#allocation44_spill] sm:$0xff] %v4300_v8 }
 0x3af   : > { %2084 = vrot.lane.b32.xlu0 %v2076_v28, %s3308_s17  ;;  %1654 = vrot.lane.b32.xlu1 %v1648_v48, %s3310_s2  ;;  %v2114_v28 = vmul.f32 %v3993_v2, %v3707_v34  ;;  %v1688_v48 = vmul.f32 %v4211_v33, %v3707_v34 }
 0x3b1   : > { %v4310_v32 = vpop.permute.xlu0 %990  ;;  %v4312_v38 = vpop.permute.xlu1 %1068 }
 0x3b3   : > { %2335 = vrot.lane.b32.xlu0 %v2328_v27, %s3308_s17  ;;  %1658 = vrot.lane.b32.xlu1 %v1650_v41, %s3310_s2  ;;  %v1690_v27 = vmul.f32 %v4211_v33, %v3954_v39 }
 0x3b5   : > { %v4320_v10 = vpop.permute.xlu0 %1030  ;;  %v4322_v8 = vpop.permute.xlu1 %1072 }
 0x3b7   : > { %2120 = vrot.lane.b32.xlu0 %v2114_v28, %s3309_s1  ;;  %1694 = vrot.lane.b32.xlu1 %v1688_v48, %s3311_s3  ;;  %v1901_v28 = vmul.f32 %v4040_v9, %v3707_v34  ;;  %v1741_v48 = vmul.f32 %v4220_v53, %v3707_v34 }
 0x3b9   : > { %v4330_v12 = vpop.permute.xlu0 %1070  ;;  %v4332_v50 = vpop.permute.xlu1 %1108 }
 0x3bb   : > { %2124 = vrot.lane.b32.xlu0 %v2116_v42, %s3309_s1  ;;  %1698 = vrot.lane.b32.xlu1 %v1690_v27, %s3311_s3  ;;  %v1903_v42 = vmul.f32 %v4040_v9, %v3954_v39  ;;  %v1743_v27 = vmul.f32 %v4220_v53, %v3954_v39 }
 0x3bd   : > { %v4340_v41 = vpop.permute.xlu0 %1110  ;;  %v4342_v61 = vpop.permute.xlu1 %1112 }
 0x3be   : > { %5513 = vst [vmem:[#allocation45_spill] sm:$0xff] %v4340_v41 }
 0x3bf   : > { %1907 = vrot.lane.b32.xlu0 %v1901_v28, %s3310_s2  ;;  %1747 = vrot.lane.b32.xlu1 %v1741_v48, %s5493_s4  ;;  %v2367_v28 = vmul.f32 %v4043_v44, %v3707_v34  ;;  %v1781_v48 = vmul.f32 %v3981_v24, %v3707_v34  ;;  %v2154_v24 = vmul.f32 %v4084_v13, %v3707_v34 }
 0x3c1   : > { %v4350_v2 = vpop.permute.xlu0 %1150  ;;  %v4352_v33 = vpop.permute.xlu1 %1148 }
 0x3c3   : > { %1911 = vrot.lane.b32.xlu0 %v1903_v42, %s3310_s2  ;;  %1751 = vrot.lane.b32.xlu1 %v1743_v27, %s5493_s4  ;;  %v2369_v42 = vmul.f32 %v4043_v44, %v3954_v39 }
 0x3c5   : > { %v4360_v25 = vpop.permute.xlu0 %1190  ;;  %v4362_v41 = vpop.permute.xlu1 %1152 }
 0x3c6   : > { %5514 = vst [vmem:[#allocation46_spill] sm:$0xff] %v4360_v25 }
 0x3c7   : > { %2373 = vrot.lane.b32.xlu0 %v2367_v28, %s3309_s1  ;;  %1787 = vrot.lane.b32.xlu1 %v1781_v48, %s5498_s11  ;;  %v2156_v48 = vmul.f32 %v4084_v13, %v3954_v39 }
 0x3c9   : > { %v4370_v9 = vpop.permute.xlu0 %1243  ;;  %v4372_v53 = vpop.permute.xlu1 %1188 }
 0x3ca   : > { %5515 = vst [vmem:[#allocation47_spill] sm:$0xff] %v4370_v9  ;;  %5516 = vst [vmem:[#allocation48_spill] sm:$0xff] %v4372_v53 }
 0x3cb   : > { %2377 = vrot.lane.b32.xlu0 %v2369_v42, %s3309_s1  ;;  %1791 = vrot.lane.b32.xlu1 %v4004_v47, %s5498_s11 }
 0x3cd   : > { %v4379_v27 = vpop.permute.xlu0 %1283  ;;  %v4381_v25 = vpop.permute.xlu1 %1192 }
 0x3ce   : > { %5517 = vst [vmem:[#allocation49_spill] sm:$0xff] %v4379_v27  ;;  %5518 = vst [vmem:[#allocation50_spill] sm:$0xff] %v4381_v25  ;;  %v811_v25 = vadd.f32 %v4204_v37, %v3761_v57  ;;  %v997_v57 = vadd.f32 %v4270_v6, %v3771_v62 }
 0x3cf   : > { %2160 = vrot.lane.b32.xlu0 %v2154_v24, %s3310_s2  ;;  %1827 = vrot.lane.b32.xlu1 %v3807_v35, %s3308_s17  ;;  %v1941_v35 = vmul.f32 %v4087_v14, %v3707_v34  ;;  %v1943_v24 = vmul.f32 %v4087_v14, %v3954_v39  ;;  %v5451_v34 = vstv %s4397_s16  ;;  %v5452_v39 = vstv %s4408_s24 }
 0x3d1   : > { %v4388_v28 = vpop.permute.xlu0 %1323  ;;  %v4390_v44 = vpop.permute.xlu1 %1241 }
 0x3d2   : > { %5519 = vst [vmem:[#allocation51_spill] sm:$0xff] %v4388_v28 }
 0x3d3   : > { %2164 = vrot.lane.b32.xlu0 %v2156_v48, %s3310_s2  ;;  %1831 = vrot.lane.b32.xlu1 %v4008_v51, %s3308_s17 }
 0x3d5   : > { %v4399_v47 = vpop.permute.xlu0 %1363  ;;  %v4401_v42 = vpop.permute.xlu1 %1245 }
 0x3d6   : > { %5520 = vst [vmem:[#allocation52_spill] sm:$0xff] %v4399_v47 }
 0x3d7   : > { %1947 = vrot.lane.b32.xlu0 %v1941_v35, %s3311_s3  ;;  %1867 = vrot.lane.b32.xlu1 %v3822_v17, %s3309_s1  ;;  %v816_v35 = vmul.f32 %v5451_v34, %v3924_v1 }
 0x3d9   : > { %v4410_v51 = vpop.permute.xlu0 %1403  ;;  %v4412_v13 = vpop.permute.xlu1 %1281 }
 0x3da   : > { %5521 = vst [vmem:[#allocation53_spill] sm:$0xff] %v4410_v51  ;;  %5522 = vst [vmem:[#allocation54_spill] sm:$0xff] %v4412_v13  ;;  %v4490_v51 = vstv %s2933_s28  ;;  %s2969_s28 = sld [smem:[#allocation10 + $0x4b]] }
 0x3db   : > { %1951 = vrot.lane.b32.xlu0 %v1943_v24, %s3311_s3  ;;  %1871 = vrot.lane.b32.xlu1 %v4019_v15, %s3309_s1  ;;  %v844_v24 = vmul.f32 %v5452_v39, %v3924_v1 }
 0x3dd   : > { %v4422_v17 = vpop.permute.xlu0 %1443  ;;  %v4424_v48 = vpop.permute.xlu1 %1285 }
 0x3de   : > { %5523 = vst [vmem:[#allocation55_spill] sm:$0xff] %v4422_v17  ;;  %5524 = vst [vmem:[#allocation56_spill] sm:$0xff] %v4424_v48 }
 0x3df   : > { %821 = vrot.lane.b32.xlu0 %v816_v35, %s5493_s4  ;;  %2000 = vrot.lane.b32.xlu1 %v3826_v36, %s5493_s4  ;;  %v5453_v35 = vstv %s4420_s20 }
 0x3e1   : > { %v4435_v15 = vpop.permute.xlu0 %1496  ;;  %v4437_v14 = vpop.permute.xlu1 %1321 }
 0x3e2   : > { %5525 = vst [vmem:[#allocation57_spill] sm:$0xff] %v4435_v15  ;;  %5526 = vst [vmem:[#allocation58_spill] sm:$0xff] %v4437_v14  ;;  %v872_v15 = vmul.f32 %v5453_v35, %v3924_v1 }
 0x3e3   : > { %849 = vrot.lane.b32.xlu0 %v844_v24, %s5498_s11  ;;  %2004 = vrot.lane.b32.xlu1 %v4027_v63, %s5493_s4  ;;  %v5454_v24 = vstv %s4433_s19 }
 0x3e5   : > { %v4448_v36 = vpop.permute.xlu0 %1536  ;;  %v4450_v34 = vpop.permute.xlu1 %1325 }
 0x3e6   : > { %5527 = vst [vmem:[#allocation59_spill] sm:$0xff] %v4448_v36  ;;  %5528 = vst [vmem:[#allocation60_spill] sm:$0xff] %v4450_v34  ;;  %v900_v36 = vmul.f32 %v5454_v24, %v3924_v1  ;;  %v5456_v24 = vstv %s4459_s0 }
 0x3e7   : > { %877 = vrot.lane.b32.xlu0 %v872_v15, %s3308_s17  ;;  %2253 = vrot.lane.b32.xlu1 %v3833_v19, %s5493_s4  ;;  %v5455_v15 = vstv %s4446_s13 }
 0x3e8   : > { %v928_v17 = vmul.f32 %v5455_v15, %v3924_v1 }
 0x3e9   : > { %v4461_v63 = vpop.permute.xlu0 %1576  ;;  %v4463_v39 = vpop.permute.xlu1 %1361 }
 0x3ea   : > { %5529 = vst [vmem:[#allocation61_spill] sm:$0xff] %v4461_v63  ;;  %5530 = vst [vmem:[#allocation62_spill] sm:$0xff] %v4463_v39 }
 0x3eb   : > { %905 = vrot.lane.b32.xlu0 %v900_v36, %s3309_s1  ;;  %2257 = vrot.lane.b32.xlu1 %v4031_v46, %s5493_s4  ;;  %v956_v46 = vmul.f32 %v5456_v24, %v3924_v1 }
 0x3ed   : > { %v4472_v19 = vpop.permute.xlu0 %1616  ;;  %v4474_v35 = vpop.permute.xlu1 %1365 }
 0x3ee   : > { %5531 = vst [vmem:[#allocation63_spill] sm:$0xff] %v4472_v19  ;;  %5532 = vst [vmem:[#allocation64_spill] sm:$0xff] %v4474_v35 }
 0x3ef   : > { %933 = vrot.lane.b32.xlu0 %v928_v17, %s3310_s2  ;;  %2042 = vrot.lane.b32.xlu1 %v4035_v11, %s5498_s11  ;;  %v1002_v11 = vmul.f32 %v4490_v51, %v3721_v43 }
 0x3f1   : > { %v4483_v63 = vpop.permute.xlu0 %1656  ;;  %v4485_v36 = vpop.permute.xlu1 %1401 }
 0x3f2   : > { %5533 = vst [vmem:[#allocation65_spill] sm:$0xff] %v4483_v63  ;;  %5534 = vst [vmem:[#allocation66_spill] sm:$0xff] %v4485_v36 }
 0x3f3   : > { %961 = vrot.lane.b32.xlu0 %v956_v46, %s3311_s3  ;;  %2293 = vrot.lane.b32.xlu1 %v3837_v20, %s5498_s11  ;;  %v1004_v46 = vmul.f32 %v4490_v51, %v3963_v56  ;;  %v4510_v20 = vstv %s2935_s10  ;;  %s2971_s10 = sld [smem:[#allocation10 + $0x4c]] }
 0x3f5   : > { %v4495_v17 = vpop.permute.xlu0 %1696  ;;  %v4497_v15 = vpop.permute.xlu1 %1405 }
 0x3f6   : > { %5535 = vst [vmem:[#allocation67_spill] sm:$0xff] %v4495_v17  ;;  %5536 = vst [vmem:[#allocation68_spill] sm:$0xff] %v4497_v15 }
 0x3f7   : > { %1008 = vrot.lane.b32.xlu0 %v1002_v11, %s5493_s4  ;;  %2297 = vrot.lane.b32.xlu1 %v4049_v58, %s5498_s11  ;;  %v1042_v58 = vmul.f32 %v4510_v20, %v3721_v43 }
 0x3f9   : > { %v4504_v24 = vpop.permute.xlu0 %1749  ;;  %v4506_v63 = vpop.permute.xlu1 %1441 }
 0x3fa   : > { %5537 = vst [vmem:[#allocation69_spill] sm:$0xff] %v4504_v24  ;;  %5538 = vst [vmem:[#allocation70_spill] sm:$0xff] %v4506_v63  ;;  %v4643_v63 = vstv %s2949_s23  ;;  %s2991_s23 = sld [smem:[#allocation10 + $0x56]] }
 0x3fb   : > { %1012 = vrot.lane.b32.xlu0 %v1004_v46, %s5493_s4  ;;  %2082 = vrot.lane.b32.xlu1 %v4059_v5, %s3308_s17  ;;  %v1044_v46 = vmul.f32 %v4510_v20, %v3963_v56  ;;  %v4530_v5 = vstv %s2937_s12  ;;  %s2975_s12 = sld [smem:[#allocation10 + $0x4e]] }
 0x3fd   : > { %v4515_v17 = vpop.permute.xlu0 %1789  ;;  %v4517_v11 = vpop.permute.xlu1 %1445 }
 0x3fe   : > { %5539 = vst [vmem:[#allocation71_spill] sm:$0xff] %v4515_v17  ;;  %5540 = vst [vmem:[#allocation72_spill] sm:$0xff] %v4517_v11 }
 0x3ff   : > { %1048 = vrot.lane.b32.xlu0 %v1042_v58, %s5498_s11  ;;  %2333 = vrot.lane.b32.xlu1 %v3844_v23, %s3308_s17  ;;  %v1082_v23 = vmul.f32 %v4530_v5, %v3721_v43 }
 0x401   : > { %v4524_v24 = vpop.permute.xlu0 %1829  ;;  %v4526_v19 = vpop.permute.xlu1 %1494 }
 0x402   : > { %5541 = vst [vmem:[#allocation73_spill] sm:$0xff] %v4524_v24  ;;  %5542 = vst [vmem:[#allocation74_spill] sm:$0xff] %v4526_v19 }
 0x403   : > { %1052 = vrot.lane.b32.xlu0 %v1044_v46, %s5498_s11  ;;  %2337 = vrot.lane.b32.xlu1 %v4065_v52, %s3308_s17  ;;  %v1084_v46 = vmul.f32 %v4530_v5, %v3963_v56  ;;  %v4550_v52 = vstv %s2939_s25  ;;  %s2977_s25 = sld [smem:[#allocation10 + $0x4f]] }
 0x405   : > { %v4535_v17 = vpop.permute.xlu0 %1869  ;;  %v4537_v58 = vpop.permute.xlu1 %1498 }
 0x406   : > { %5543 = vst [vmem:[#allocation75_spill] sm:$0xff] %v4535_v17  ;;  %5544 = vst [vmem:[#allocation76_spill] sm:$0xff] %v4537_v58  ;;  %v4619_v58 = vstv %s2947_s22  ;;  %s3003_s22 = sld [smem:[#allocation10 + $0x5c]] }
 0x407   : > { %1088 = vrot.lane.b32.xlu0 %v1082_v23, %s3308_s17  ;;  %2122 = vrot.lane.b32.xlu1 %v4075_v18, %s3309_s1  ;;  %v4559_v18 = vld [vmem:[#allocation2 + $0x18] sm:$0xff] }
 0x408   : > { %v1122_v17 = vmul.f32 %v4559_v18, %v4550_v52 }
 0x409   : > { %v4544_v24 = vpop.permute.xlu0 %2002  ;;  %v4546_v11 = vpop.permute.xlu1 %1534 }
 0x40a   : > { %5545 = vst [vmem:[#allocation77_spill] sm:$0xff] %v4544_v24  ;;  %5546 = vst [vmem:[#allocation78_spill] sm:$0xff] %v4546_v11 }
 0x40b   : > { %1092 = vrot.lane.b32.xlu0 %v1084_v46, %s3308_s17  ;;  %1909 = vrot.lane.b32.xlu1 %v4093_v4, %s3310_s2  ;;  %v1124_v4 = vmul.f32 %v4550_v52, %v3963_v56 }
 0x40d   : > { %v4555_v43 = vpop.permute.xlu0 %2255  ;;  %v4557_v23 = vpop.permute.xlu1 %1538 }
 0x40e   : > { %5547 = vst [vmem:[#allocation79_spill] sm:$0xff] %v4555_v43  ;;  %5548 = vst [vmem:[#allocation80_spill] sm:$0xff] %v4557_v23  ;;  %v4572_v43 = vstv %s2941_s21  ;;  %s2979_s21 = sld [smem:[#allocation10 + $0x50]] }
 0x40f   : > { %1128 = vrot.lane.b32.xlu0 %v1122_v17, %s3309_s1  ;;  %2375 = vrot.lane.b32.xlu1 %v4103_v45, %s3309_s1 }
 0x411   : > { %v4566_v24 = vpop.permute.xlu0 %2040  ;;  %v4568_v46 = vpop.permute.xlu1 %1574 }
 0x412   : > { %5549 = vst [vmem:[#allocation81_spill] sm:$0xff] %v4566_v24  ;;  %5550 = vst [vmem:[#allocation82_spill] sm:$0xff] %v4568_v46  ;;  %v1162_v24 = vmul.f32 %v4559_v18, %v4572_v43 }
 0x413   : > { %1132 = vrot.lane.b32.xlu0 %v1124_v4, %s3309_s1  ;;  %2162 = vrot.lane.b32.xlu1 %v4110_v55, %s3310_s2  ;;  %v1164_v55 = vmul.f32 %v4572_v43, %v3963_v56  ;;  %v5555_v4 = vstv %s4397_s16  ;;  %s2955_s16 = sld [smem:[#allocation10 + $0x44]] }
 0x415   : > { %v4577_v17 = vpop.permute.xlu0 %2044  ;;  %v4579_v45 = vpop.permute.xlu1 %1578 }
 0x416   : > { %5551 = vst [vmem:[#allocation83_spill] sm:$0xff] %v4577_v17  ;;  %5552 = vst [vmem:[#allocation84_spill] sm:$0xff] %v4579_v45  ;;  %v815_v17 = vmul.f32 %v4559_v18, %v5555_v4  ;;  %v4595_v45 = vstv %s2943_s9  ;;  %s2989_s9 = sld [smem:[#allocation10 + $0x55]] }
 0x417   : > { %1168 = vrot.lane.b32.xlu0 %v1162_v24, %s3310_s2  ;;  %1949 = vrot.lane.b32.xlu1 %v4114_v21, %s3311_s3 }
 0x419   : > { %v4586_v46 = vpop.permute.xlu0 %2295  ;;  %v4588_v23 = vpop.permute.xlu1 %1614 }
 0x41a   : > { %5553 = vst [vmem:[#allocation85_spill] sm:$0xff] %v4586_v46  ;;  %5554 = vst [vmem:[#allocation86_spill] sm:$0xff] %v4588_v23  ;;  %v1202_v46 = vmul.f32 %v4559_v18, %v4595_v45  ;;  %v5558_v23 = vstv %s4408_s24  ;;  %s2957_s24 = sld [smem:[#allocation10 + $0x45]] }
 0x41b   : > { %1172 = vrot.lane.b32.xlu0 %v1164_v55, %s3310_s2  ;;  %819 = vrot.lane.b32.xlu1 %v815_v17, %s5493_s4  ;;  %v843_v11 = vmul.f32 %v4559_v18, %v5558_v23  ;;  %v1204_v17 = vmul.f32 %v4595_v45, %v3963_v56 }
 0x41d   : > { %v4599_v24 = vpop.permute.xlu0 %2080  ;;  %v4601_v21 = vpop.permute.xlu1 %1618 }
 0x41e   : > { %5556 = vst [vmem:[#allocation87_spill] sm:$0xff] %v4599_v24  ;;  %5557 = vst [vmem:[#allocation88_spill] sm:$0xff] %v4601_v21  ;;  %v5561_v24 = vstv %s4420_s20  ;;  %s2961_s20 = sld [smem:[#allocation10 + $0x47]] }
 0x41f   : > { %1208 = vrot.lane.b32.xlu0 %v1202_v46, %s3311_s3  ;;  %847 = vrot.lane.b32.xlu1 %v843_v11, %s5498_s11  ;;  %v871_v21 = vmul.f32 %v4559_v18, %v5561_v24  ;;  %v1255_v46 = vmul.f32 %v4559_v18, %v4619_v58 }
 0x421   : > { %v4610_v4 = vpop.permute.xlu0 %2084  ;;  %v4612_v55 = vpop.permute.xlu1 %1654 }
 0x422   : > { %5559 = vst [vmem:[#allocation89_spill] sm:$0xff] %v4610_v4  ;;  %5560 = vst [vmem:[#allocation90_spill] sm:$0xff] %v4612_v55  ;;  %v5564_v4 = vstv %s4433_s19  ;;  %s2963_s19 = sld [smem:[#allocation10 + $0x48]] }
 0x423   : > { %1212 = vrot.lane.b32.xlu0 %v1204_v17, %s3311_s3  ;;  %875 = vrot.lane.b32.xlu1 %v871_v21, %s3308_s17  ;;  %v899_v55 = vmul.f32 %v4559_v18, %v5564_v4  ;;  %v1257_v21 = vmul.f32 %v4619_v58, %v3963_v56 }
 0x425   : > { %v4623_v23 = vpop.permute.xlu0 %2335  ;;  %v4625_v11 = vpop.permute.xlu1 %1658 }
 0x426   : > { %5562 = vst [vmem:[#allocation91_spill] sm:$0xff] %v4623_v23  ;;  %5563 = vst [vmem:[#allocation92_spill] sm:$0xff] %v4625_v11  ;;  %v5567_v23 = vstv %s4446_s13  ;;  %s2965_s13 = sld [smem:[#allocation10 + $0x49]] }
 0x427   : > { %1261 = vrot.lane.b32.xlu0 %v1255_v46, %s5493_s4  ;;  %903 = vrot.lane.b32.xlu1 %v899_v55, %s3309_s1  ;;  %v927_v11 = vmul.f32 %v4559_v18, %v5567_v23  ;;  %v1295_v46 = vmul.f32 %v4559_v18, %v4643_v63 }
 0x429   : > { %v4634_v24 = vpop.permute.xlu0 %2120  ;;  %v4636_v17 = vpop.permute.xlu1 %1694 }
 0x42a   : > { %5565 = vst [vmem:[#allocation93_spill] sm:$0xff] %v4634_v24  ;;  %5566 = vst [vmem:[#allocation94_spill] sm:$0xff] %v4636_v17  ;;  %v5570_v24 = vstv %s4459_s0  ;;  %s2967_s0 = sld [smem:[#allocation10 + $0x4a]] }
 0x42b   : > { %1265 = vrot.lane.b32.xlu0 %v1257_v21, %s5493_s4  ;;  %931 = vrot.lane.b32.xlu1 %v927_v11, %s3310_s2  ;;  %v955_v17 = vmul.f32 %v4559_v18, %v5570_v24  ;;  %v1297_v11 = vmul.f32 %v4643_v63, %v3963_v56  ;;  %v1003_v21 = vmul.f32 %v4490_v51, %v3924_v1 }
 0x42d   : > { %v4647_v4 = vpop.permute.xlu0 %2124  ;;  %v4649_v55 = vpop.permute.xlu1 %1698 }
 0x42e   : > { %5568 = vst [vmem:[#allocation95_spill] sm:$0xff] %v4647_v4  ;;  %5569 = vst [vmem:[#allocation96_spill] sm:$0xff] %v4649_v55  ;;  %v1334_v4 = vstv %s2951_s5  ;;  %s3005_s5 = sld [smem:[#allocation10 + $0x5d]] }
 0x42f   : > { %1301 = vrot.lane.b32.xlu0 %v1295_v46, %s5498_s11  ;;  %959 = vrot.lane.b32.xlu1 %v955_v17, %s3311_s3  ;;  %v1335_v17 = vmul.f32 %v4559_v18, %v1334_v4 }
 0x431   : > { %v4658_v23 = vpop.permute.xlu0 %1907  ;;  %v4660_v19 = vpop.permute.xlu1 %1747 }
 0x432   : > { %5571 = vst [vmem:[#allocation97_spill] sm:$0xff] %v4658_v23  ;;  %5572 = vst [vmem:[#allocation98_spill] sm:$0xff] %v4660_v19  ;;  %v1043_v23 = vmul.f32 %v4510_v20, %v3924_v1 }
 0x433   : > { %1305 = vrot.lane.b32.xlu0 %v1297_v11, %s5498_s11  ;;  %1010 = vrot.lane.b32.xlu1 %v1003_v21, %s5493_s4  ;;  %v1337_v11 = vmul.f32 %v1334_v4, %v3963_v56  ;;  %v1083_v21 = vmul.f32 %v4530_v5, %v3924_v1 }
 0x434   : > { %v4875_v48 = vstv %s3005_s5  ;;  %s3319_s5 = smov 112  }
 0x435   : > { %v4668_v24 = vpop.permute.xlu0 %1911  ;;  %v4670_v46 = vpop.permute.xlu1 %1751 }
 0x436   : > { %5573 = vst [vmem:[#allocation99_spill] sm:$0xff] %v4668_v24  ;;  %5574 = vst [vmem:[#allocation100_spill] sm:$0xff] %v4670_v46  ;;  %v1374_v24 = vstv %s2953_s30  ;;  %v1627_v46 = vstv %s2967_s0  ;;  %s2981_s30 = sld [smem:[#allocation10 + $0x51]]  ;;  %s2985_s0 = sld [smem:[#allocation10 + $0x53]] }
 0x437   : > { %1341 = vrot.lane.b32.xlu0 %v1335_v17, %s3308_s17  ;;  %1050 = vrot.lane.b32.xlu1 %v1043_v23, %s5498_s11  ;;  %v1375_v23 = vmul.f32 %v4559_v18, %v1374_v24 }
 0x439   : > { %v4677_v51 = vpop.permute.xlu0 %2373  ;;  %v4679_v19 = vpop.permute.xlu1 %1787 }
 0x43a   : > { %5575 = vst [vmem:[#allocation101_spill] sm:$0xff] %v4677_v51  ;;  %5576 = vst [vmem:[#allocation102_spill] sm:$0xff] %v4679_v19  ;;  %v1123_v51 = vmul.f32 %v4550_v52, %v3924_v1 }
 0x43b   : > { %1345 = vrot.lane.b32.xlu0 %v1337_v11, %s3308_s17  ;;  %1090 = vrot.lane.b32.xlu1 %v1083_v21, %s3308_s17  ;;  %v1377_v11 = vmul.f32 %v1374_v24, %v3963_v56  ;;  %v1163_v21 = vmul.f32 %v4572_v43, %v3924_v1 }
 0x43c   : > { %v4906_v6 = vstv %s2981_s30  ;;  %s3022_s30 = sshll.u32 %s3386_s6, 10  ;;  %s2791_s6 = scalar_lea.sflag [#allocation7], %s3503_s18 }
 0x43d   : > { %v4686_v20 = vpop.permute.xlu0 %2377  ;;  %v4688_v17 = vpop.permute.xlu1 %1791 }
 0x43e   : > { %5577 = vst [vmem:[#allocation103_spill] sm:$0xff] %v4686_v20  ;;  %5578 = vst [vmem:[#allocation104_spill] sm:$0xff] %v4688_v17  ;;  %v1414_v20 = vstv %s2955_s16  ;;  %v4769_v17 = vld [vmem:[#allocation2 + $0x28] sm:$0xff]  ;;  %s2993_s16 = sld [smem:[#allocation10 + $0x57]] }
 0x43f   : > { %1381 = vrot.lane.b32.xlu0 %v1375_v23, %s3309_s1  ;;  %1130 = vrot.lane.b32.xlu1 %v1123_v51, %s3309_s1  ;;  %v1415_v51 = vmul.f32 %v4559_v18, %v1414_v20 }
 0x441   : > { %v4695_v5 = vpop.permute.xlu0 %2160  ;;  %v4697_v19 = vpop.permute.xlu1 %1827 }
 0x442   : > { %5579 = vst [vmem:[#allocation105_spill] sm:$0xff] %v4695_v5  ;;  %5580 = vst [vmem:[#allocation106_spill] sm:$0xff] %v4697_v19  ;;  %v1203_v5 = vmul.f32 %v4595_v45, %v3924_v1 }
 0x443   : > { %1385 = vrot.lane.b32.xlu0 %v1377_v11, %s3309_s1  ;;  %1170 = vrot.lane.b32.xlu1 %v1163_v21, %s3310_s2  ;;  %v1417_v11 = vmul.f32 %v1414_v20, %v3963_v56  ;;  %v1256_v21 = vmul.f32 %v4619_v58, %v3924_v1 }
 0x445   : > { %v4704_v52 = vpop.permute.xlu0 %2164  ;;  %v4706_v23 = vpop.permute.xlu1 %1831 }
 0x446   : > { %5581 = vst [vmem:[#allocation107_spill] sm:$0xff] %v4704_v52  ;;  %5582 = vst [vmem:[#allocation108_spill] sm:$0xff] %v4706_v23  ;;  %v1454_v52 = vstv %s2957_s24  ;;  %v1547_v23 = vstv %s2963_s19  ;;  %s3007_s24 = sld [smem:[#allocation10 + $0x5e]]  ;;  %s2983_s19 = sld [smem:[#allocation10 + $0x52]] }
 0x447   : > { %1421 = vrot.lane.b32.xlu0 %v1415_v51, %s3310_s2  ;;  %1210 = vrot.lane.b32.xlu1 %v1203_v5, %s3311_s3  ;;  %v1455_v5 = vmul.f32 %v4559_v18, %v1454_v52 }
 0x449   : > { %v4713_v43 = vpop.permute.xlu0 %1947  ;;  %v4715_v19 = vpop.permute.xlu1 %1867 }
 0x44a   : > { %5583 = vst [vmem:[#allocation109_spill] sm:$0xff] %v4713_v43  ;;  %5584 = vst [vmem:[#allocation110_spill] sm:$0xff] %v4715_v19  ;;  %v4727_v43 = vld [vmem:[#allocation2 + $0x20] sm:$0xff] }
 0x44b   : > { %1425 = vrot.lane.b32.xlu0 %v1417_v11, %s3310_s2  ;;  %1263 = vrot.lane.b32.xlu1 %v1256_v21, %s5493_s4  ;;  %v1296_v19 = vmul.f32 %v4727_v43, %v4643_v63  ;;  %v1457_v11 = vmul.f32 %v1454_v52, %v3963_v56  ;;  %v1336_v21 = vmul.f32 %v4727_v43, %v1334_v4 }
 0x44d   : > { %v4722_v45 = vpop.permute.xlu0 %1951  ;;  %v4724_v51 = vpop.permute.xlu1 %1871 }
 0x44e   : > { %5585 = vst [vmem:[#allocation111_spill] sm:$0xff] %v4722_v45  ;;  %5586 = vst [vmem:[#allocation112_spill] sm:$0xff] %v4724_v51  ;;  %v1507_v45 = vstv %s2961_s20  ;;  %s2995_s20 = sld [smem:[#allocation10 + $0x58]] }
 0x44f   : > { %1461 = vrot.lane.b32.xlu0 %v1455_v5, %s3311_s3  ;;  %1303 = vrot.lane.b32.xlu1 %v1296_v19, %s5498_s11  ;;  %v1508_v19 = vmul.f32 %v4559_v18, %v1507_v45  ;;  %v1376_v5 = vmul.f32 %v4727_v43, %v1374_v24 }
 0x451   : > { %v4733_v1 = vpop.permute.xlu0 %821  ;;  %v4735_v58 = vpop.permute.xlu1 %2000 }
 0x452   : > { %5587 = vst [vmem:[#allocation113_spill] sm:$0xff] %v4735_v58 }
 0x453   : > { %1465 = vrot.lane.b32.xlu0 %v1457_v11, %s3311_s3  ;;  %1343 = vrot.lane.b32.xlu1 %v1336_v21, %s3308_s17  ;;  %v1510_v11 = vmul.f32 %v1507_v45, %v3963_v56  ;;  %v1416_v21 = vmul.f32 %v4727_v43, %v1414_v20 }
 0x455   : > { %v4741_v51 = vpop.permute.xlu0 %849  ;;  %v4743_v63 = vpop.permute.xlu1 %2004 }
 0x456   : > { %5588 = vst [vmem:[#allocation114_spill] sm:$0xff] %v4743_v63 }
 0x457   : > { %1514 = vrot.lane.b32.xlu0 %v1508_v19, %s5493_s4  ;;  %1383 = vrot.lane.b32.xlu1 %v1376_v5, %s3309_s1  ;;  %v1548_v19 = vmul.f32 %v4559_v18, %v1547_v23  ;;  %v1456_v5 = vmul.f32 %v4727_v43, %v1454_v52 }
 0x459   : > { %v4749_v58 = vpop.permute.xlu0 %877  ;;  %v4751_v4 = vpop.permute.xlu1 %2253 }
 0x45a   : > { %5589 = vst [vmem:[#allocation115_spill] sm:$0xff] %v4751_v4  ;;  %v1587_v4 = vstv %s2965_s13  ;;  %s3010_s13 = sld [smem:[#allocation10 + $0x2f]] }
 0x45b   : > { %1518 = vrot.lane.b32.xlu0 %v1510_v11, %s5493_s4  ;;  %1423 = vrot.lane.b32.xlu1 %v1416_v21, %s3310_s2  ;;  %v1550_v11 = vmul.f32 %v4769_v17, %v1547_v23  ;;  %v1509_v21 = vmul.f32 %v4727_v43, %v1507_v45 }
 0x45d   : > { %v4757_v63 = vpop.permute.xlu0 %905  ;;  %v4759_v24 = vpop.permute.xlu1 %2257 }
 0x45e   : > { %5590 = vst [vmem:[#allocation116_spill] sm:$0xff] %v4759_v24 }
 0x45f   : > { %1554 = vrot.lane.b32.xlu0 %v1548_v19, %s5498_s11  ;;  %1463 = vrot.lane.b32.xlu1 %v1456_v5, %s3311_s3  ;;  %v1588_v5 = vmul.f32 %v4559_v18, %v1587_v4 }
 0x461   : > { %v4765_v56 = vpop.permute.xlu0 %933  ;;  %v4767_v20 = vpop.permute.xlu1 %2042 }
 0x462   : > { %5591 = vst [vmem:[#allocation117_spill] sm:$0xff] %v4765_v56  ;;  %5592 = vst [vmem:[#allocation118_spill] sm:$0xff] %v4767_v20  ;;  %v1549_v20 = vmul.f32 %v4727_v43, %v1547_v23  ;;  %v2307_v56 = vmul.f32 %v4559_v18, %v4875_v48 }
 0x463   : > { %1558 = vrot.lane.b32.xlu0 %v1550_v11, %s5498_s11  ;;  %1516 = vrot.lane.b32.xlu1 %v1509_v21, %s5493_s4  ;;  %v1590_v11 = vmul.f32 %v4769_v17, %v1587_v4  ;;  %v1589_v21 = vmul.f32 %v4727_v43, %v1587_v4 }
 0x465   : > { %v4775_v52 = vpop.permute.xlu0 %961  ;;  %v4777_v19 = vpop.permute.xlu1 %2293 }
 0x466   : > { %5593 = vst [vmem:[#allocation119_spill] sm:$0xff] %v4775_v52  ;;  %5594 = vst [vmem:[#allocation120_spill] sm:$0xff] %v4777_v19  ;;  %v1629_v19 = vmul.f32 %v4727_v43, %v1627_v46 }
 0x467   : > { %1594 = vrot.lane.b32.xlu0 %v1588_v5, %s3308_s17  ;;  %1556 = vrot.lane.b32.xlu1 %v1549_v20, %s5498_s11  ;;  %v1628_v20 = vmul.f32 %v4559_v18, %v1627_v46 }
 0x469   : > { %v4783_v45 = vpop.permute.xlu0 %1008  ;;  %v4785_v24 = vpop.permute.xlu1 %2297 }
 0x46a   : > { %5595 = vst [vmem:[#allocation121_spill] sm:$0xff] %v4785_v24  ;;  %v1667_v24 = vstv %s2969_s28  ;;  %s5114_s28 = sld [smem:[#allocation10 + $0x60]] }
 0x46b   : > { %1598 = vrot.lane.b32.xlu0 %v1590_v11, %s3308_s17  ;;  %1596 = vrot.lane.b32.xlu1 %v1589_v21, %s3308_s17  ;;  %v1630_v21 = vmul.f32 %v4769_v17, %v1627_v46  ;;  %v1669_v55 = vmul.f32 %v4727_v43, %v1667_v24  ;;  %v1760_v46 = vstv %s2975_s12  ;;  %s3013_s12 = sld [smem:[#allocation10 + $0x61]] }
 0x46c   : > { %v1762_v36 = vmul.f32 %v4727_v43, %v1760_v46 }
 0x46d   : > { %v4791_v23 = vpop.permute.xlu0 %1012  ;;  %v4793_v5 = vpop.permute.xlu1 %2082 }
 0x46e   : > { %5596 = vst [vmem:[#allocation122_spill] sm:$0xff] %v4793_v5  ;;  %v1707_v5 = vstv %s2971_s10  ;;  %s3012_s10 = sld [smem:[#allocation10 + $0x30]] }
 0x46f   : > { %1634 = vrot.lane.b32.xlu0 %v1628_v20, %s3309_s1  ;;  %1636 = vrot.lane.b32.xlu1 %v1629_v19, %s3309_s1  ;;  %v1668_v19 = vmul.f32 %v4559_v18, %v1667_v24  ;;  %v1709_v15 = vmul.f32 %v4727_v43, %v1707_v5 }
 0x471   : > { %v4799_v4 = vpop.permute.xlu0 %1048  ;;  %v4801_v11 = vpop.permute.xlu1 %2333 }
 0x472   : > { %5597 = vst [vmem:[#allocation123_spill] sm:$0xff] %v4801_v11 }
 0x473   : > { %1638 = vrot.lane.b32.xlu0 %v1630_v21, %s3309_s1  ;;  %1676 = vrot.lane.b32.xlu1 %v1669_v55, %s3310_s2  ;;  %v1670_v55 = vmul.f32 %v4769_v17, %v1667_v24  ;;  %v1840_v24 = vstv %s2979_s21  ;;  %s3315_s21 = smov 64  }
 0x474   : > { %v1842_v39 = vmul.f32 %v4727_v43, %v1840_v24  ;;  %v1841_v13 = vmul.f32 %v4559_v18, %v1840_v24 }
 0x475   : > { %v4807_v47 = vpop.permute.xlu0 %1052  ;;  %v4809_v20 = vpop.permute.xlu1 %2337 }
 0x476   : > { %5598 = vst [vmem:[#allocation124_spill] sm:$0xff] %v4809_v20  ;;  %v1800_v20 = vstv %s2977_s25  ;;  %s3314_s25 = smov 32  }
 0x477   : > { %1674 = vrot.lane.b32.xlu0 %v1668_v19, %s3310_s2  ;;  %1716 = vrot.lane.b32.xlu1 %v1709_v15, %s3311_s3  ;;  %v1708_v15 = vmul.f32 %v4559_v18, %v1707_v5  ;;  %v1802_v35 = vmul.f32 %v4727_v43, %v1800_v20 }
 0x479   : > { %v4815_v11 = vpop.permute.xlu0 %1088  ;;  %v4817_v21 = vpop.permute.xlu1 %2122 }
 0x47a   : > { %5599 = vst [vmem:[#allocation125_spill] sm:$0xff] %v4817_v21 }
 0x47b   : > { %1678 = vrot.lane.b32.xlu0 %v1670_v55, %s3310_s2  ;;  %1769 = vrot.lane.b32.xlu1 %v1762_v36, %s5493_s4  ;;  %v1710_v36 = vmul.f32 %v4769_v17, %v1707_v5 }
 0x47d   : > { %v4823_v28 = vpop.permute.xlu0 %1092  ;;  %v4825_v19 = vpop.permute.xlu1 %1909 }
 0x47e   : > { %5600 = vst [vmem:[#allocation126_spill] sm:$0xff] %v4825_v19  ;;  %v4839_v19 = vstv %s2989_s9  ;;  %s3316_s9 = smov 48  }
 0x47f   : > { %1714 = vrot.lane.b32.xlu0 %v1708_v15, %s3311_s3  ;;  %1809 = vrot.lane.b32.xlu1 %v1802_v35, %s5498_s11  ;;  %v1761_v35 = vmul.f32 %v4559_v18, %v1760_v46  ;;  %v2015_v52 = vmul.f32 %v4727_v43, %v4839_v19 }
 0x481   : > { %v4831_v21 = vpop.permute.xlu0 %1128  ;;  %v4833_v55 = vpop.permute.xlu1 %2375 }
 0x482   : > { %5601 = vst [vmem:[#allocation127_spill] sm:$0xff] %v4833_v55  ;;  %v4848_v55 = vstv %s3003_s22  ;;  %s3317_s22 = smov 80  }
 0x483   : > { %1718 = vrot.lane.b32.xlu0 %v1710_v36, %s3311_s3  ;;  %1849 = vrot.lane.b32.xlu1 %v1842_v39, %s3308_s17  ;;  %v1763_v36 = vmul.f32 %v4769_v17, %v1760_v46  ;;  %v2269_v14 = vmul.f32 %v4769_v17, %v4848_v55  ;;  %v4868_v46 = vstv %s2991_s23  ;;  %s3318_s23 = smov 96  }
 0x485   : > { %v4841_v27 = vpop.permute.xlu0 %1132  ;;  %v4843_v15 = vpop.permute.xlu1 %2162 }
 0x486   : > { %5602 = vst [vmem:[#allocation128_spill] sm:$0xff] %v4843_v15  ;;  %v2267_v15 = vmul.f32 %v4559_v18, %v4848_v55 }
 0x487   : > { %1767 = vrot.lane.b32.xlu0 %v1761_v35, %s5493_s4  ;;  %2022 = vrot.lane.b32.xlu1 %v2015_v52, %s5493_s4  ;;  %v1801_v52 = vmul.f32 %v4559_v18, %v1800_v20 }
 0x489   : > { %v4852_v5 = vpop.permute.xlu0 %1168  ;;  %v4854_v39 = vpop.permute.xlu1 %1949 }
 0x48a   : > { %5603 = vst [vmem:[#allocation129_spill] sm:$0xff] %v4854_v39 }
 0x48b   : > { %1771 = vrot.lane.b32.xlu0 %v1763_v36, %s5493_s4  ;;  %2273 = vrot.lane.b32.xlu1 %v2267_v15, %s5493_s4  ;;  %v1803_v36 = vmul.f32 %v4769_v17, %v1800_v20  ;;  %v2055_v15 = vmul.f32 %v4727_v43, %v4868_v46 }
 0x48d   : > { %v4861_v34 = vpop.permute.xlu0 %1172  ;;  %v820_v35 = vpop.permute.xlu1 %819 }
 0x48e   : > { %v825_v20 = vadd.f32 %v820_v35, %v811_v25  ;;  %v1843_v35 = vmul.f32 %v4769_v17, %v1840_v24 }
 0x48f   : > { %1807 = vrot.lane.b32.xlu0 %v1801_v52, %s5498_s11  ;;  %2277 = vrot.lane.b32.xlu1 %v2269_v14, %s5493_s4  ;;  %v812_v52 = vadd.f32 %v4253_v31, %v3945_v30  ;;  %v999_v30 = vadd.f32 %v4282_v60, %v3989_v26  ;;  %v4910_v26 = vstv %s2993_s16  ;;  %s5727_s16 = sshll.u32 %s3503_s18, 6 }
 0x490   : > { %v839_v31 = vadd.f32 %v4216_v29, %v825_v20 }
 0x491   : > { %v4870_v39 = vpop.permute.xlu0 %1208  ;;  %v848_v9 = vpop.permute.xlu1 %847  ;;  %v826_v14 = vadd.f32 %v4733_v1, %v812_v52  ;;  %v1019_v62 = vadd.f32 %v4791_v23, %v999_v30  ;;  %v2095_v23 = vmul.f32 %v4727_v43, %v4910_v26  ;;  %v4937_v30 = vstv %s3007_s24  ;;  %s324_s24 = scalar_lea.vmem [#allocation12], %s5727_s16 }
 0x492   : > { %5604 = vst [vmem:[#allocation130_spill] sm:$0xff] %v4870_v39 }
 0x493   : > { %1811 = vrot.lane.b32.xlu0 %v1803_v36, %s5498_s11  ;;  %2062 = vrot.lane.b32.xlu1 %v2055_v15, %s5498_s11  ;;  %v840_v37 = vadd.f32 %v4262_v7, %v826_v14  ;;  %v853_v7 = vadd.f32 %v848_v9, %v839_v31  ;;  %v1039_v15 = vadd.f32 %v4302_v59, %v1019_v62 }
 0x494   : > { %v1883_v59 = vmul.f32 %v4769_v17, %v4906_v6 }
 0x495   : > { %v4884_v39 = vpop.permute.xlu0 %1212  ;;  %v876_v53 = vpop.permute.xlu1 %875  ;;  %v854_v29 = vadd.f32 %v4741_v51, %v840_v37  ;;  %v1059_v51 = vadd.f32 %v4807_v47, %v1039_v15  ;;  %v867_v14 = vadd.f32 %v4227_v16, %v853_v7  ;;  %v998_v16 = vadd.f32 %v4310_v32, %v3952_v0 }
 0x496   : > { %v2054_v15 = vmul.f32 %v4559_v18, %v4868_v46 }
 0x497   : > { %1847 = vrot.lane.b32.xlu0 %v1841_v13, %s3308_s17  ;;  %2313 = vrot.lane.b32.xlu1 %v2307_v56, %s5498_s11  ;;  %v2309_v13 = vmul.f32 %v4769_v17, %v4875_v48  ;;  %v1017_v56 = vadd.f32 %v4783_v45, %v997_v57  ;;  %v1881_v45 = vmul.f32 %v4559_v18, %v4906_v6 }
 0x498   : > { %v868_v52 = vadd.f32 %v4272_v3, %v854_v29  ;;  %v1079_v47 = vadd.f32 %v4322_v8, %v1059_v51  ;;  %v881_v37 = vadd.f32 %v876_v53, %v867_v14 }
 0x499   : > { %v4897_v25 = vpop.permute.xlu0 %1261  ;;  %v4899_v1 = vpop.permute.xlu1 %903  ;;  %v1037_v36 = vadd.f32 %v4292_v40, %v1017_v56  ;;  %v2014_v40 = vmul.f32 %v4559_v18, %v4839_v19  ;;  %v2347_v56 = vmul.f32 %v4559_v18, %v4937_v30 }
 0x49a   : > { %v1099_v0 = vadd.f32 %v4823_v28, %v1079_v47  ;;  %v895_v53 = vadd.f32 %v4237_v54, %v881_v37  ;;  %v2349_v28 = vmul.f32 %v4769_v17, %v4937_v30 }
 0x49b   : > { %1851 = vrot.lane.b32.xlu0 %v1843_v35, %s3308_s17  ;;  %2317 = vrot.lane.b32.xlu1 %v2309_v13, %s5498_s11  ;;  %v1057_v9 = vadd.f32 %v4799_v4, %v1037_v36  ;;  %v882_v4 = vadd.f32 %v4749_v58, %v868_v52  ;;  %v2016_v13 = vmul.f32 %v4769_v17, %v4839_v19 }
 0x49c   : > { %v1119_v7 = vadd.f32 %v4342_v61, %v1099_v0  ;;  %v909_v36 = vadd.f32 %v4899_v1, %v895_v53 }
 0x49d   : > { %v4913_v60 = vpop.permute.xlu0 %1265  ;;  %v4915_v24 = vpop.permute.xlu1 %931  ;;  %v1077_v3 = vadd.f32 %v4312_v38, %v1057_v9  ;;  %v896_v38 = vadd.f32 %v4280_v49, %v882_v4 }
 0x49e   : > { %v1139_v49 = vadd.f32 %v4841_v27, %v1119_v7  ;;  %v4988_v27 = vstv %s2983_s19 }
 0x49f   : > { %1887 = vrot.lane.b32.xlu0 %v1881_v45, %s3309_s1  ;;  %2102 = vrot.lane.b32.xlu1 %v2095_v23, %s3308_s17  ;;  %v1097_v62 = vadd.f32 %v4815_v11, %v1077_v3  ;;  %v2268_v11 = vmul.f32 %v4727_v43, %v4848_v55  ;;  %v4967_v23 = vstv %s2995_s20  ;;  %v910_v55 = vadd.f32 %v4757_v63, %v896_v38  ;;  %v5605_v63 = vld [vmem:[#allocation33_spill] sm:$0xff]  ;;  %v5611_v38 = vld [vmem:[#allocation48_spill] sm:$0xff]  ;;  %s2804_s20 = sshll.u32 %s324_s24, 4  ;;  %s5379_s20 = int_to_ptr.vmem [resolvable:$true] %s2804_s20 }
 0x4a0   : > { %v2134_v9 = vmul.f32 %v4559_v18, %v4967_v23  ;;  %v1252_v1 = vadd.f32 %v4401_v42, %v5605_v63  ;;  %v1159_v14 = vadd.f32 %v4362_v41, %v1139_v49  ;;  %v5608_v3 = vld [vmem:[#allocation41_spill] sm:$0xff]  ;;  %v2136_v37 = vmul.f32 %v4769_v17, %v4967_v23 }
 0x4a1   : > { %v4929_v20 = vpop.permute.xlu0 %1301  ;;  %v4931_v57 = vpop.permute.xlu1 %959  ;;  %v1117_v29 = vadd.f32 %v4332_v50, %v1097_v62  ;;  %v923_v47 = vadd.f32 %v5608_v3, %v909_v36  ;;  %v5616_v36 = vld [vmem:[#allocation44_spill] sm:$0xff] }
 0x4a2   : > { %v1272_v41 = vadd.f32 %v4913_v60, %v1252_v1  ;;  %v2308_v60 = vmul.f32 %v4727_v43, %v4875_v48  ;;  %v5619_v1 = vld [vmem:[#allocation47_spill] sm:$0xff] }
 0x4a3   : > { %2020 = vrot.lane.b32.xlu0 %v2014_v40, %s5493_s4  ;;  %1891 = vrot.lane.b32.xlu1 %v1883_v59, %s3309_s1  ;;  %v1137_v54 = vadd.f32 %v4831_v21, %v1117_v29  ;;  %v1250_v21 = vadd.f32 %v4390_v44, %v3840_v22  ;;  %v5606_v40 = vld [vmem:[#allocation45_spill] sm:$0xff]  ;;  %v5607_v44 = vld [vmem:[#allocation43_spill] sm:$0xff]  ;;  %v937_v0 = vadd.f32 %v4915_v24, %v923_v47 }
 0x4a4   : > { %v924_v59 = vadd.f32 %v5607_v44, %v910_v55  ;;  %v5622_v47 = vld [vmem:[#allocation119_spill] sm:$0xff] }
 0x4a5   : > { %v4946_v31 = vpop.permute.xlu0 %1305  ;;  %v1011_v35 = vpop.permute.xlu1 %1010  ;;  %v1157_v52 = vadd.f32 %v4352_v33, %v1137_v54  ;;  %v1179_v33 = vadd.f32 %v4861_v34, %v1159_v14 }
 0x4a6   : > { %v1018_v32 = vadd.f32 %v1011_v35, %v998_v16  ;;  %v1270_v16 = vadd.f32 %v4897_v25, %v1250_v21  ;;  %v2094_v21 = vmul.f32 %v4559_v18, %v4910_v26 }
 0x4a7   : > { %2024 = vrot.lane.b32.xlu0 %v2016_v13, %s5493_s4  ;;  %2353 = vrot.lane.b32.xlu1 %v2347_v56, %s3308_s17  ;;  %v1177_v42 = vadd.f32 %v4852_v5, %v1157_v52  ;;  %v1921_v13 = vmul.f32 %v4559_v18, %v4988_v27  ;;  %v5609_v56 = vld [vmem:[#allocation117_spill] sm:$0xff]  ;;  %v5610_v5 = vld [vmem:[#allocation54_spill] sm:$0xff] }
 0x4a8   : > { %v1038_v8 = vadd.f32 %v4320_v10, %v1018_v32  ;;  %v938_v62 = vadd.f32 %v5609_v56, %v924_v59  ;;  %v1290_v32 = vadd.f32 %v5610_v5, %v1270_v16  ;;  %v5620_v52 = vld [vmem:[#allocation58_spill] sm:$0xff]  ;;  %v5621_v59 = vld [vmem:[#allocation60_spill] sm:$0xff] }
 0x4a9   : > { %v4959_v58 = vpop.permute.xlu0 %1341  ;;  %v1051_v19 = vpop.permute.xlu1 %1050  ;;  %v1197_v53 = vadd.f32 %v5611_v38, %v1177_v42 }
 0x4aa   : > { %v1058_v45 = vadd.f32 %v1051_v19, %v1038_v8  ;;  %v5612_v19 = vld [vmem:[#allocation50_spill] sm:$0xff]  ;;  %v1310_v7 = vadd.f32 %v4929_v20, %v1290_v32 }
 0x4ab   : > { %2275 = vrot.lane.b32.xlu0 %v2268_v11, %s5493_s4  ;;  %2357 = vrot.lane.b32.xlu1 %v2349_v28, %s3308_s17  ;;  %s4990_s4 = sld [smem:[#allocation10 + $0x5f]]  ;;  %v1199_v11 = vadd.f32 %v5612_v19, %v1179_v33  ;;  %v5613_v28 = vld [vmem:[#allocation56_spill] sm:$0xff]  ;;  %v5624_v32 = vld [vmem:[#allocation62_spill] sm:$0xff] }
 0x4ac   : > { %v1078_v10 = vadd.f32 %v4330_v12, %v1058_v45  ;;  %v2056_v12 = vmul.f32 %v4769_v17, %v4868_v46  ;;  %v5614_v45 = vld [vmem:[#allocation130_spill] sm:$0xff]  ;;  %v1330_v14 = vadd.f32 %v5620_v52, %v1310_v7  ;;  %v5626_v7 = vld [vmem:[#allocation51_spill] sm:$0xff] }
 0x4ad   : > { %v4976_v50 = vpop.permute.xlu0 %1345  ;;  %v1091_v61 = vpop.permute.xlu1 %1090  ;;  %v1217_v54 = vadd.f32 %v5614_v45, %v1197_v53  ;;  %v1219_v49 = vadd.f32 %v4884_v39, %v1199_v11  ;;  %v5618_v39 = vld [vmem:[#allocation31_spill] sm:$0xff]  ;;  %v5625_v53 = vld [vmem:[#allocation64_spill] sm:$0xff] }
 0x4ae   : > { %v1098_v51 = vadd.f32 %v1091_v61, %v1078_v10  ;;  %v5615_v10 = vld [vmem:[#allocation46_spill] sm:$0xff]  ;;  %v952_v61 = vadd.f32 %v5616_v36, %v938_v62  ;;  %v1350_v42 = vadd.f32 %v4959_v58, %v1330_v14 }
 0x4af   : > { %2060 = vrot.lane.b32.xlu0 %v2054_v15, %s5498_s11  ;;  %2140 = vrot.lane.b32.xlu1 %v2134_v9, %s3309_s1  ;;  %v5617_v15 = vld [vmem:[#allocation42_spill] sm:$0xff]  ;;  %v2492_v44 = vrot.slane %v1219_v49, 1  ;;  %v2348_v49 = vmul.f32 %v4727_v43, %v4937_v30  ;;  %v2135_v30 = vmul.f32 %v4727_v43, %v4967_v23 }
 0x4b0   : > { %v1118_v22 = vadd.f32 %v5606_v40, %v1098_v51  ;;  %v951_v9 = vadd.f32 %v5617_v15, %v937_v0 }
 0x4b1   : > { %v5000_v46 = vpop.permute.xlu0 %1381  ;;  %v1131_v4 = vpop.permute.xlu1 %1130  ;;  %v5024_v24 = vstv %s4990_s4 }
 0x4b2   : > { %v1138_v35 = vadd.f32 %v1131_v4, %v1118_v22  ;;  %v2387_v40 = vmul.f32 %v4559_v18, %v5024_v24  ;;  %v2489_v22 = vrot.slane %v1217_v54, 1  ;;  %v966_v4 = vadd.f32 %v5622_v47, %v952_v61  ;;  %v5629_v61 = vld [vmem:[#allocation52_spill] sm:$0xff]  ;;  %v5097_v47 = vld [vmem:[#allocation2 + $0x8] sm:$0xff] }
 0x4b3   : > { %2064 = vrot.lane.b32.xlu0 %v2056_v12, %s5498_s11  ;;  %2144 = vrot.lane.b32.xlu1 %v2136_v37, %s3309_s1  ;;  %v1923_v12 = vmul.f32 %v4769_v17, %v4988_v27  ;;  %v965_v37 = vadd.f32 %v4931_v57, %v951_v9  ;;  %v5623_v57 = vld [vmem:[#allocation49_spill] sm:$0xff]  ;;  %v2389_v38 = vmul.f32 %v4769_v17, %v5024_v24 }
 0x4b4   : > { %v1158_v25 = vadd.f32 %v4350_v2, %v1138_v35  ;;  %v1292_v2 = vadd.f32 %v5613_v28, %v1272_v41  ;;  %v2096_v35 = vmul.f32 %v4769_v17, %v4910_v26  ;;  %v1370_v26 = vadd.f32 %v5624_v32, %v1350_v42  ;;  %v5635_v42 = vld [vmem:[#allocation76_spill] sm:$0xff]  ;;  %v5638_v32 = vld [vmem:[#allocation55_spill] sm:$0xff] }
 0x4b5   : > { %v1386_v34 = vpop.permute.xlu0 %1385  ;;  %v1171_v8 = vpop.permute.xlu1 %1170 }
 0x4b6   : > { %v1178_v29 = vadd.f32 %v1171_v8, %v1158_v25  ;;  %v1312_v48 = vadd.f32 %v4946_v31, %v1292_v2  ;;  %v1251_v31 = vadd.f32 %v5619_v1, %v5618_v39  ;;  %v1390_v2 = vadd.f32 %v5000_v46, %v1370_v26  ;;  %v5631_v39 = vld [vmem:[#allocation74_spill] sm:$0xff] }
 0x4b7   : > { %2315 = vrot.lane.b32.xlu0 %v2308_v60, %s5498_s11  ;;  %1927 = vrot.lane.b32.xlu1 %v1921_v13, %s3310_s2  ;;  %s5036_s11 = sld [smem:[#allocation10 + $0x59]]  ;;  %v1882_v60 = vmul.f32 %v4727_v43, %v4906_v6 }
 0x4b8   : > { %v1198_v55 = vadd.f32 %v5615_v10, %v1178_v29  ;;  %v1332_v16 = vadd.f32 %v5621_v59, %v1312_v48 }
 0x4b9   : > { %v1422_v51 = vpop.permute.xlu0 %1421  ;;  %v1211_v20 = vpop.permute.xlu1 %1210 }
 0x4ba   : > { %v1218_v63 = vadd.f32 %v1211_v20, %v1198_v55  ;;  %v1352_v25 = vadd.f32 %v4976_v50, %v1332_v16  ;;  %v5627_v55 = vld [vmem:[#allocation66_spill] sm:$0xff] }
 0x4bb   : > { %2100 = vrot.lane.b32.xlu0 %v2094_v21, %s3308_s17  ;;  %1931 = vrot.lane.b32.xlu1 %v1923_v12, %s3310_s2  ;;  %v1410_v46 = vadd.f32 %v5627_v55, %v1390_v2  ;;  %v5640_v2 = vld [vmem:[#allocation57_spill] sm:$0xff] }
 0x4bc   : > { %v2490_v3 = vrot.slane %v1218_v63, 1  ;;  %v1372_v19 = vadd.f32 %v5625_v53, %v1352_v25  ;;  %v5630_v63 = vld [vmem:[#allocation27_spill] sm:$0xff] }
 0x4bd   : > { %v1426_v33 = vpop.permute.xlu0 %1425  ;;  %v1264_v41 = vpop.permute.xlu1 %1263  ;;  %v5068_v28 = vstv %s5036_s11  ;;  %v1430_v9 = vadd.f32 %v1422_v51, %v1410_v46  ;;  %v1503_v1 = vadd.f32 %v5631_v39, %v5630_v63  ;;  %s5373_s11 = scalar_lea.hbm %s5431_s7, %s3022_s30 }
 0x4be   : > { %v2491_v13 = vsel %vm2488_vm3, %v2489_v22, %v2490_v3  ;;  %v2493_v56 = vsel %vm2488_vm3, %v2490_v3, %v2492_v44  ;;  %v1271_v62 = vadd.f32 %v1264_v41, %v1251_v31  ;;  %v1392_v29 = vadd.f32 %v1386_v34, %v1372_v19  ;;  %v5628_v34 = vld [vmem:[#allocation68_spill] sm:$0xff]  ;;  %v5633_v44 = vld [vmem:[#allocation70_spill] sm:$0xff] }
 0x4bf   : > { %v5054_v0 = vadd.f32 %v2491_v13, %v965_v37  ;;  %v5056_v5 = vadd.f32 %v2493_v56, %v966_v4  ;;  %2104 = vrot.lane.b32.xlu0 %v2096_v35, %s3308_s17  ;;  %2393 = vrot.lane.b32.xlu1 %v2387_v40, %s3309_s1  ;;  %v2174_v48 = vmul.f32 %v4559_v18, %v5068_v28  ;;  %v5632_v40 = vld [vmem:[#allocation53_spill] sm:$0xff]  ;;  %v5092_v22 = vstv %s3010_s13  ;;  %v5634_v37 = vld [vmem:[#allocation35_spill] sm:$0xff]  ;;  %v5636_v41 = vld [vmem:[#allocation72_spill] sm:$0xff]  ;;  %s3214_s13 = scalar_lea.vmem %s5379_s20, 1024 }
 0x4c0   : > { %v1291_v58 = vadd.f32 %v5623_v57, %v1271_v62  ;;  %v1412_v36 = vadd.f32 %v5628_v34, %v1392_v29  ;;  %v2176_v12 = vmul.f32 %v4769_v17, %v5068_v28  ;;  %v1450_v59 = vadd.f32 %v5633_v44, %v1430_v9  ;;  %v5637_v57 = vld [vmem:[#allocation78_spill] sm:$0xff]  ;;  %v5645_v44 = vld [vmem:[#allocation61_spill] sm:$0xff]  ;;  %p3215_p5 = scmp.ne.s32.totalorder %s5379_s20, %s3214_s13 }
 0x4c1   : > { %v1462_v8 = vpop.permute.xlu0 %1461  ;;  %v1304_v50 = vpop.permute.xlu1 %1303  ;;  %v1922_v3 = vmul.f32 %v4727_v43, %v4988_v27  ;;  %v2408_v4 = vmul.f32 %v5097_v47, %v5092_v22  ;;  %v5104_v13 = vstv %s2985_s0  ;;  %s3320_s0 = smov [#allocation12]  }
 0x4c2   : > { %v1311_v11 = vadd.f32 %v1304_v50, %v1291_v58  ;;  %v1432_v31 = vadd.f32 %v1426_v33, %v1412_v36  ;;  %v1505_v33 = vadd.f32 %v5635_v42, %v5634_v37  ;;  %v1470_v56 = vadd.f32 %v1462_v8, %v1450_v59  ;;  %p3216_p8 = pnand %p3215_p5, %p5736_p2 }
 0x4c3   : > { %1889 = vrot.lane.b32.xlu0 %v1882_v60, %s3309_s1  ;;  %2397 = vrot.lane.b32.xlu1 %v2389_v38, %s3309_s1  ;;  %v2388_v38 = vmul.f32 %v4727_v43, %v5024_v24  ;;  %v1961_v53 = vmul.f32 %v4559_v18, %v5104_v13  ;;  %v1963_v55 = vmul.f32 %v4769_v17, %v5104_v13 }
 0x4c4   : > { %v1331_v45 = vadd.f32 %v5626_v7, %v1311_v11  ;;  %v1452_v35 = vadd.f32 %v5636_v41, %v1432_v31  ;;  %v5639_v11 = vld [vmem:[#allocation32_spill] sm:$0xff]  ;;  %v2502_v7 = vrot.slane %v1470_v56, 2  ;;  %v5646_v41 = vld [vmem:[#allocation86_spill] sm:$0xff]  ;;  %p3217_p10 = pneg %p3216_p8 }
 0x4c5   : > { %v1466_v54 = vpop.permute.xlu0 %1465  ;;  %v1344_v6 = vpop.permute.xlu1 %1343  ;;  %v1504_v29 = vadd.f32 %v5640_v2, %v5639_v11 }
 0x4c6   : > { %v1351_v10 = vadd.f32 %v1344_v6, %v1331_v45  ;;  %v1472_v62 = vadd.f32 %v1466_v54, %v1452_v35  ;;  %v5641_v6 = vld [vmem:[#allocation80_spill] sm:$0xff] }
 0x4c7   : > { %2355 = vrot.lane.b32.xlu0 %v2348_v49, %s3308_s17  ;;  %2180 = vrot.lane.b32.xlu1 %v2174_v48, %s3310_s2  ;;  %s2998_s17 = sld [smem:[#allocation10 + $0x29]] }
 0x4c8   : > { %v1371_v15 = vadd.f32 %v5629_v61, %v1351_v10  ;;  %v2505_v45 = vrot.slane %v1472_v62, 2  ;;  %v2175_v10 = vmul.f32 %v4727_v43, %v5068_v28 }
 0x4c9   : > { %v1515_v20 = vpop.permute.xlu0 %1514  ;;  %v1384_v21 = vpop.permute.xlu1 %1383 }
 0x4ca   : > { %v1391_v52 = vadd.f32 %v1384_v21, %v1371_v15  ;;  %v1523_v14 = vadd.f32 %v1515_v20, %v1503_v1  ;;  %v5642_v20 = vld [vmem:[#allocation82_spill] sm:$0xff]  ;;  %v5643_v21 = vld [vmem:[#allocation59_spill] sm:$0xff]  ;;  %v3151_v1 = vld [vmem:[#allocation2] sm:$0xff] }
 0x4cb   : > { %2142 = vrot.lane.b32.xlu0 %v2135_v30, %s3309_s1  ;;  %2184 = vrot.lane.b32.xlu1 %v2176_v12, %s3310_s2  ;;  %v2407_v31 = vmul.f32 %v3151_v1, %v5092_v22 }
 0x4cc   : > { %v1411_v51 = vadd.f32 %v5632_v40, %v1391_v52  ;;  %v1543_v58 = vadd.f32 %v5637_v57, %v1523_v14  ;;  %v5644_v40 = vld [vmem:[#allocation84_spill] sm:$0xff]  ;;  %v1962_v57 = vmul.f32 %v4727_v43, %v5104_v13 }
 0x4cd   : > { %v1519_v23 = vpop.permute.xlu0 %1518  ;;  %v1424_v16 = vpop.permute.xlu1 %1423  ;;  %v2193_v12 = vstv %s2998_s17  ;;  %s3218_s17 = sshll.u32 %s3320_s0, 4  ;;  %s3219_s17 = int_to_ptr.vmem [resolvable:$false] %s3218_s17 }
 0x4ce   : > { %v1431_v25 = vadd.f32 %v1424_v16, %v1411_v51  ;;  %v1525_v27 = vadd.f32 %v1519_v23, %v1505_v33  ;;  %p3221_p4 = scmp.lt.s32.totalorder %s5379_s20, %s3219_s17 }
 0x4cf   : > { %1929 = vrot.lane.b32.xlu0 %v1922_v3, %s3310_s2  ;;  %2415 = vrot.lane.b32.xlu1 %v2408_v4, %s3310_s2  ;;  %v3152_v3 = vld [vmem:[#allocation2 + $0x10] sm:$0xff] }
 0x4d0   : > { %v1451_v26 = vadd.f32 %v5638_v32, %v1431_v25  ;;  %v1545_v24 = vadd.f32 %v5641_v6, %v1525_v27  ;;  %v2409_v4 = vmul.f32 %v3152_v3, %v5092_v22  ;;  %v5647_v25 = vld [vmem:[#allocation63_spill] sm:$0xff]  ;;  %v5648_v32 = vld [vmem:[#allocation88_spill] sm:$0xff] }
 0x4d1   : > { %v1555_v50 = vpop.permute.xlu0 %1554  ;;  %v1464_v60 = vpop.permute.xlu1 %1463 }
 0x4d2   : > { %v1563_v8 = vadd.f32 %v1555_v50, %v1543_v58  ;;  %v1471_v19 = vadd.f32 %v1464_v60, %v1451_v26  ;;  %v5649_v50 = vld [vmem:[#allocation65_spill] sm:$0xff] }
 0x4d3   : > { %2395 = vrot.lane.b32.xlu0 %v2388_v38, %s3309_s1  ;;  %1967 = vrot.lane.b32.xlu1 %v1961_v53, %s3311_s3  ;;  %s2999_s1 = sld [smem:[#allocation10 + $0x5a]] }
 0x4d4   : > { %v2503_v54 = vrot.slane %v1471_v19, 2  ;;  %v1583_v28 = vadd.f32 %v5642_v20, %v1563_v8  ;;  %v2194_v19 = vmul.f32 %v3151_v1, %v2193_v12  ;;  %v5654_v20 = vld [vmem:[#allocation92_spill] sm:$0xff] }
 0x4d5   : > { %v1559_v49 = vpop.permute.xlu0 %1558  ;;  %v1517_v48 = vpop.permute.xlu1 %1516 }
 0x4d6   : > { %v2504_v46 = vsel %vm2501_vm4, %v2502_v7, %v2503_v54  ;;  %v2506_v34 = vsel %vm2501_vm4, %v2503_v54, %v2505_v45  ;;  %v1565_v36 = vadd.f32 %v1559_v49, %v1545_v24  ;;  %v1524_v61 = vadd.f32 %v1517_v48, %v1504_v29  ;;  %v5650_v7 = vld [vmem:[#allocation90_spill] sm:$0xff]  ;;  %v5651_v54 = vld [vmem:[#allocation67_spill] sm:$0xff] }
 0x4d7   : > { %v5126_v15 = vadd.f32 %v2504_v46, %v5054_v0  ;;  %v5129_v9 = vadd.f32 %v2506_v34, %v5056_v5  ;;  %2182 = vrot.lane.b32.xlu0 %v2175_v10, %s3310_s2  ;;  %1971 = vrot.lane.b32.xlu1 %v1963_v55, %s3311_s3  ;;  %v2195_v0 = vmul.f32 %v5097_v47, %v2193_v12  ;;  %v2426_v5 = vstv %s5114_s28  ;;  %v5652_v34 = vld [vmem:[#allocation34_spill] sm:$0xff]  ;;  %s3220_s28 = scalar_lea.vmem %s3219_s17, 2048 }
 0x4d8   : > { %v1544_v30 = vadd.f32 %v5643_v21, %v1524_v61  ;;  %v1585_v51 = vadd.f32 %v5644_v40, %v1565_v36  ;;  %v2427_v37 = vmul.f32 %v4559_v18, %v2426_v5  ;;  %v2429_v22 = vmul.f32 %v4769_v17, %v2426_v5  ;;  %v5653_v36 = vld [vmem:[#allocation69_spill] sm:$0xff]  ;;  %p3222_p12 = scmp.lt.s32.totalorder %s3220_s28, %s3214_s13 }
 0x4d9   : > { %v1595_v63 = vpop.permute.xlu0 %1594  ;;  %v1557_v39 = vpop.permute.xlu1 %1556  ;;  %v2213_v38 = vstv %s2999_s1  ;;  %v2446_v29 = vstv %s3012_s10  ;;  %v2196_v48 = vmul.f32 %v3152_v3, %v2193_v12  ;;  %v1757_v61 = vadd.f32 %v5653_v36, %v5652_v34  ;;  %v5655_v12 = vld [vmem:[#allocation94_spill] sm:$0xff]  ;;  %v5668_v34 = vld [vmem:[#allocation116_spill] sm:$0xff] }
 0x4da   : > { %v1603_v52 = vadd.f32 %v1595_v63, %v1583_v28  ;;  %v1564_v14 = vadd.f32 %v1557_v39, %v1544_v30  ;;  %v2215_v11 = vmul.f32 %v4727_v43, %v2213_v38  ;;  %v2447_v10 = vmul.f32 %v3151_v1, %v2446_v29  ;;  %p3223_p0 = por %p3222_p12, %p3221_p4 }
 0x4db   : > { %2413 = vrot.lane.b32.xlu0 %v2407_v31, %s3310_s2  ;;  %2202 = vrot.lane.b32.xlu1 %v2195_v0, %s3311_s3  ;;  %v2428_v63 = vmul.f32 %v4727_v43, %v2426_v5  ;;  %v2449_v39 = vmul.f32 %v3152_v3, %v2446_v29  ;;  %v2466_v40 = vstv %s3013_s12 }
 0x4dc   : > { %v1584_v59 = vadd.f32 %v5645_v44, %v1564_v14  ;;  %v1623_v35 = vadd.f32 %v5646_v41, %v1603_v52  ;;  %v5656_v52 = vld [vmem:[#allocation71_spill] sm:$0xff]  ;;  %v5658_v41 = vld [vmem:[#allocation73_spill] sm:$0xff]  ;;  %p3224_p7 = pnand %p3223_p0, %p3217_p10 }
 0x4dd   : > { %v1599_v23 = vpop.permute.xlu0 %1598  ;;  %v1597_v16 = vpop.permute.xlu1 %1596 }
 0x4de   : > { %v1605_v42 = vadd.f32 %v1599_v23, %v1585_v51  ;;  %v1604_v33 = vadd.f32 %v1597_v16, %v1584_v59  ;;  %v3153_v59 = vld [vmem:[#allocation2 + $0x18] sm:$0xff]  ;;  %v2468_v16 = vmul.f32 %v4727_v43, %v2466_v40 }
 0x4df   : > { %2417 = vrot.lane.b32.xlu0 %v2409_v4, %s3310_s2  ;;  %2433 = vrot.lane.b32.xlu1 %v2427_v37, %s3310_s2  ;;  %v2214_v23 = vmul.f32 %v3153_v59, %v2213_v38 }
 0x4e0   : > { %v1624_v56 = vadd.f32 %v5647_v25, %v1604_v33  ;;  %v1625_v26 = vadd.f32 %v5648_v32, %v1605_v42  ;;  %v5657_v42 = vld [vmem:[#allocation96_spill] sm:$0xff] }
 0x4e1   : > { %v1635_v62 = vpop.permute.xlu0 %1634  ;;  %v1637_v27 = vpop.permute.xlu1 %1636 }
 0x4e2   : > { %v1643_v58 = vadd.f32 %v1635_v62, %v1623_v35  ;;  %v1644_v18 = vadd.f32 %v1637_v27, %v1624_v56  ;;  %v2216_v62 = vmul.f32 %v4769_v17, %v2213_v38  ;;  %v2448_v38 = vmul.f32 %v5097_v47, %v2446_v29  ;;  %v5667_v29 = vld [vmem:[#allocation40_spill] sm:$0xff] }
 0x4e3   : > { %1969 = vrot.lane.b32.xlu0 %v1962_v57, %s3311_s3  ;;  %2437 = vrot.lane.b32.xlu1 %v2429_v22, %s3310_s2  ;;  %v2264_v36 = vadd.f32 %v5668_v34, %v5667_v29  ;;  %v5685_v29 = vld [vmem:[#allocation79_spill] sm:$0xff] }
 0x4e4   : > { %v1664_v60 = vadd.f32 %v5649_v50, %v1644_v18  ;;  %v1663_v45 = vadd.f32 %v5650_v7, %v1643_v58  ;;  %v5659_v58 = vld [vmem:[#allocation36_spill] sm:$0xff]  ;;  %v5660_v18 = vld [vmem:[#allocation77_spill] sm:$0xff]  ;;  %v5662_v50 = vld [vmem:[#allocation98_spill] sm:$0xff] }
 0x4e5   : > { %v1639_v53 = vpop.permute.xlu0 %1638  ;;  %v1677_v8 = vpop.permute.xlu1 %1676  ;;  %v2010_v32 = vadd.f32 %v5660_v18, %v5659_v58  ;;  %v5663_v7 = vld [vmem:[#allocation38_spill] sm:$0xff] }
 0x4e6   : > { %v1645_v2 = vadd.f32 %v1639_v53, %v1625_v26  ;;  %v1684_v13 = vadd.f32 %v1677_v8, %v1664_v60  ;;  %v5661_v26 = vld [vmem:[#allocation28_spill] sm:$0xff] }
 0x4e7   : > { %2200 = vrot.lane.b32.xlu0 %v2194_v19, %s3311_s3  ;;  %2222 = vrot.lane.b32.xlu1 %v2215_v11, %s3311_s3  ;;  %v1756_v60 = vadd.f32 %v5662_v50, %v5661_v26 }
 0x4e8   : > { %v1704_v6 = vadd.f32 %v5651_v54, %v1684_v13  ;;  %v1665_v28 = vadd.f32 %v5654_v20, %v1645_v2 }
 0x4e9   : > { %v1675_v24 = vpop.permute.xlu0 %1674  ;;  %v1717_v49 = vpop.permute.xlu1 %1716 }
 0x4ea   : > { %v1683_v55 = vadd.f32 %v1675_v24, %v1663_v45  ;;  %v1724_v46 = vadd.f32 %v1717_v49, %v1704_v6  ;;  %v5664_v45 = vld [vmem:[#allocation100_spill] sm:$0xff]  ;;  %v5665_v6 = vld [vmem:[#allocation30_spill] sm:$0xff]  ;;  %v5666_v24 = vld [vmem:[#allocation115_spill] sm:$0xff] }
 0x4eb   : > { %2204 = vrot.lane.b32.xlu0 %v2196_v48, %s3311_s3  ;;  %2453 = vrot.lane.b32.xlu1 %v2447_v10, %s3311_s3  ;;  %v1758_v54 = vadd.f32 %v5664_v45, %v5663_v7  ;;  %v2262_v49 = vadd.f32 %v5666_v24, %v5665_v6  ;;  %v5681_v45 = vld [vmem:[#allocation39_spill] sm:$0xff] }
 0x4ec   : > { %v1703_v1 = vadd.f32 %v5655_v12, %v1683_v55  ;;  %v2516_v3 = vrot.slane %v1724_v46, 3  ;;  %v2467_v55 = vmul.f32 %v3153_v59, %v2466_v40  ;;  %v5683_v24 = vld [vmem:[#allocation123_spill] sm:$0xff] }
 0x4ed   : > { %v1679_v21 = vpop.permute.xlu0 %1678  ;;  %v1770_v30 = vpop.permute.xlu1 %1769 }
 0x4ee   : > { %v1685_v31 = vadd.f32 %v1679_v21, %v1665_v28  ;;  %v1777_v0 = vadd.f32 %v1770_v30, %v1757_v61  ;;  %v2469_v21 = vmul.f32 %v4769_v17, %v2466_v40  ;;  %v5674_v40 = vld [vmem:[#allocation108_spill] sm:$0xff] }
 0x4ef   : > { %2435 = vrot.lane.b32.xlu0 %v2428_v63, %s3310_s2  ;;  %2457 = vrot.lane.b32.xlu1 %v2449_v39, %s3311_s3  ;;  %v5670_v39 = vld [vmem:[#allocation104_spill] sm:$0xff]  ;;  %s2563_s2 = sld [smem:[#allocation4]] }
 0x4f0   : > { %v1797_v14 = vadd.f32 %v5656_v52, %v1777_v0  ;;  %v1705_v33 = vadd.f32 %v5657_v42, %v1685_v31  ;;  %v5671_v0 = vld [vmem:[#allocation118_spill] sm:$0xff]  ;;  %v5675_v42 = vld [vmem:[#allocation121_spill] sm:$0xff] }
 0x4f1   : > { %v1715_v51 = vpop.permute.xlu0 %1714  ;;  %v1810_v44 = vpop.permute.xlu1 %1809 }
 0x4f2   : > { %v1723_v4 = vadd.f32 %v1715_v51, %v1703_v1  ;;  %v1817_v5 = vadd.f32 %v1810_v44, %v1797_v14  ;;  %v5672_v44 = vld [vmem:[#allocation106_spill] sm:$0xff] }
 0x4f3   : > { %2220 = vrot.lane.b32.xlu0 %v2214_v23, %s3311_s3  ;;  %2475 = vrot.lane.b32.xlu1 %v2468_v16, %s3311_s3  ;;  %v5673_v23 = vld [vmem:[#allocation120_spill] sm:$0xff] }
 0x4f4   : > { %v2515_v37 = vrot.slane %v1723_v4, 3  ;;  %v1837_v35 = vadd.f32 %v5658_v41, %v1817_v5 }
 0x4f5   : > { %v1719_v25 = vpop.permute.xlu0 %1718  ;;  %v1850_v56 = vpop.permute.xlu1 %1849 }
 0x4f6   : > { %v2517_v27 = vsel %vm2514_vm5, %v2515_v37, %v2516_v3  ;;  %v1725_v43 = vadd.f32 %v1719_v25, %v1705_v33  ;;  %v5177_v57 = vadd.f32 %v1850_v56, %v1837_v35 }
 0x4f7   : > { %v5180_v22 = vadd.f32 %v2517_v27, %v5126_v15  ;;  %2224 = vrot.lane.b32.xlu0 %v2216_v62, %s3311_s3  ;;  %v5676_v62 = vld [vmem:[#allocation110_spill] sm:$0xff] }
 0x4f8   : > { %v2518_v53 = vrot.slane %v1725_v43, 3  ;;  %v5677_v43 = vld [vmem:[#allocation122_spill] sm:$0xff] }
 0x4f9   : > { %v1768_v8 = vpop.permute.xlu0 %1767  ;;  %v2023_v19 = vpop.permute.xlu1 %2022 }
 0x4fa   : > { %v2519_v11 = vsel %vm2514_vm5, %v2516_v3, %v2518_v53  ;;  %v1776_v2 = vadd.f32 %v1768_v8, %v1756_v60  ;;  %v2030_v13 = vadd.f32 %v2023_v19, %v2010_v32  ;;  %v5678_v60 = vld [vmem:[#allocation29_spill] sm:$0xff]  ;;  %v5680_v19 = vld [vmem:[#allocation112_spill] sm:$0xff] }
 0x4fb   : > { %v5190_v15 = vadd.f32 %v2519_v11, %v5129_v9  ;;  %2455 = vrot.lane.b32.xlu0 %v2448_v38, %s3311_s3  ;;  %v5669_v9 = vld [vmem:[#allocation102_spill] sm:$0xff]  ;;  %v5679_v53 = vld [vmem:[#allocation113_spill] sm:$0xff] }
 0x4fc   : > { %v1796_v61 = vadd.f32 %v5669_v9, %v1776_v2  ;;  %v2050_v12 = vadd.f32 %v5671_v0, %v2030_v13  ;;  %v2009_v8 = vadd.f32 %v5679_v53, %v5678_v60 }
 0x4fd   : > { %v1772_v48 = vpop.permute.xlu0 %1771  ;;  %v2274_v10 = vpop.permute.xlu1 %2273 }
 0x4fe   : > { %v1778_v46 = vadd.f32 %v1772_v48, %v1758_v54  ;;  %v2282_v47 = vadd.f32 %v2274_v10, %v2262_v49  ;;  %v5682_v54 = vld [vmem:[#allocation114_spill] sm:$0xff] }
 0x4ff   : > { %2473 = vrot.lane.b32.xlu0 %v2467_v55, %s3311_s3  ;;  %v2011_v6 = vadd.f32 %v5682_v54, %v5681_v45  ;;  %v5693_v54 = vld [vmem:[#allocation87_spill] sm:$0xff] }
 0x500   : > { %v1798_v31 = vadd.f32 %v5670_v39, %v1778_v46  ;;  %v2302_v16 = vadd.f32 %v5673_v23, %v2282_v47  ;;  %v5684_v47 = vld [vmem:[#allocation37_spill] sm:$0xff] }
 0x501   : > { %v1808_v20 = vpop.permute.xlu0 %1807  ;;  %v2278_v28 = vpop.permute.xlu1 %2277  ;;  %v2263_v34 = vadd.f32 %v5685_v29, %v5684_v47 }
 0x502   : > { %v1816_v30 = vadd.f32 %v1808_v20, %v1796_v61  ;;  %v2284_v63 = vadd.f32 %v2278_v28, %v2264_v36  ;;  %v5686_v36 = vld [vmem:[#allocation124_spill] sm:$0xff] }
 0x503   : > { %2477 = vrot.lane.b32.xlu0 %v2469_v21, %s3311_s3  ;;  %s3313_s3 = smov 16  }
 0x504   : > { %v1836_v59 = vadd.f32 %v5672_v44, %v1816_v30  ;;  %v2304_v33 = vadd.f32 %v5675_v42, %v2284_v63  ;;  %v5687_v42 = vld [vmem:[#allocation75_spill] sm:$0xff] }
 0x505   : > { %v1812_v1 = vpop.permute.xlu0 %1811  ;;  %v2063_v52 = vpop.permute.xlu1 %2062 }
 0x506   : > { %v1818_v14 = vadd.f32 %v1812_v1, %v1798_v31  ;;  %v2070_v51 = vadd.f32 %v2063_v52, %v2050_v12 }
 0x508   : > { %v1838_v37 = vadd.f32 %v5674_v40, %v1818_v14  ;;  %v2090_v58 = vadd.f32 %v5677_v43, %v2070_v51 }
 0x509   : > { %v1848_v4 = vpop.permute.xlu0 %1847  ;;  %v2314_v5 = vpop.permute.xlu1 %2313 }
 0x50a   : > { %v1856_v3 = vadd.f32 %v1848_v4, %v1836_v59  ;;  %v2322_v17 = vadd.f32 %v2314_v5, %v2302_v16 }
 0x50c   : > { %v1876_v27 = vadd.f32 %v5676_v62, %v1856_v3  ;;  %v2342_v49 = vadd.f32 %v5683_v24, %v2322_v17 }
 0x50d   : > { %v1852_v41 = vpop.permute.xlu0 %1851  ;;  %v2318_v35 = vpop.permute.xlu1 %2317 }
 0x50e   : > { %v1858_v25 = vadd.f32 %v1852_v41, %v1838_v37  ;;  %v2324_v56 = vadd.f32 %v2318_v35, %v2304_v33  ;;  %v1877_v33 = vadd.f32 %v5687_v42, %v5177_v57  ;;  %v5700_v42 = vld [vmem:[#allocation125_spill] sm:$0xff] }
 0x510   : > { %v1878_v38 = vadd.f32 %v5680_v19, %v1858_v25  ;;  %v2344_v9 = vadd.f32 %v5686_v36, %v2324_v56  ;;  %v5688_v56 = vld [vmem:[#allocation81_spill] sm:$0xff] }
 0x511   : > { %v1888_v18 = vpop.permute.xlu0 %1887  ;;  %v2103_v32 = vpop.permute.xlu1 %2102  ;;  %v5696_v36 = vld [vmem:[#allocation129_spill] sm:$0xff] }
 0x512   : > { %v1896_v26 = vadd.f32 %v1888_v18, %v1876_v27  ;;  %v5211_v50 = vadd.f32 %v2103_v32, %v2090_v58  ;;  %v5689_v27 = vld [vmem:[#allocation97_spill] sm:$0xff]  ;;  %v5690_v58 = vld [vmem:[#allocation99_spill] sm:$0xff] }
 0x514   : > { %v1916_v43 = vadd.f32 %v5689_v27, %v1896_v26 }
 0x515   : > { %v2021_v11 = vpop.permute.xlu0 %2020  ;;  %v1892_v2 = vpop.permute.xlu1 %1891 }
 0x516   : > { %v2029_v13 = vadd.f32 %v2021_v11, %v2009_v8  ;;  %v1898_v7 = vadd.f32 %v1892_v2, %v1878_v38  ;;  %v5691_v38 = vld [vmem:[#allocation126_spill] sm:$0xff]  ;;  %v5692_v2 = vld [vmem:[#allocation83_spill] sm:$0xff] }
 0x518   : > { %v2049_v62 = vadd.f32 %v5688_v56, %v2029_v13  ;;  %v1918_v18 = vadd.f32 %v5690_v58, %v1898_v7 }
 0x519   : > { %v2025_v48 = vpop.permute.xlu0 %2024  ;;  %v2354_v10 = vpop.permute.xlu1 %2353 }
 0x51a   : > { %v2031_v55 = vadd.f32 %v2025_v48, %v2011_v6  ;;  %v5219_v46 = vadd.f32 %v2354_v10, %v2342_v49  ;;  %v5694_v49 = vld [vmem:[#allocation109_spill] sm:$0xff]  ;;  %v5695_v48 = vld [vmem:[#allocation111_spill] sm:$0xff] }
 0x51c   : > { %v2051_v45 = vadd.f32 %v5692_v2, %v2031_v55  ;;  %v5703_v2 = vld [vmem:[#allocation128_spill] sm:$0xff] }
 0x51d   : > { %v2276_v61 = vpop.permute.xlu0 %2275  ;;  %v2358_v20 = vpop.permute.xlu1 %2357 }
 0x51e   : > { %v2283_v28 = vadd.f32 %v2276_v61, %v2263_v34  ;;  %v5224_v21 = vadd.f32 %v2358_v20, %v2344_v9  ;;  %v5697_v20 = vld [vmem:[#allocation89_spill] sm:$0xff] }
 0x521   : > { %v2061_v30 = vpop.permute.xlu0 %2060  ;;  %v5226_v63 = vpop.permute.xlu1 %2140 }
 0x522   : > { %v2069_v32 = vadd.f32 %v2061_v30, %v2049_v62 }
 0x524   : > { %v2089_v6 = vadd.f32 %v5693_v54, %v2069_v32  ;;  %v5701_v32 = vld [vmem:[#allocation95_spill] sm:$0xff]  ;;  %v5704_v54 = vld [vmem:[#allocation105_spill] sm:$0xff] }
 0x525   : > { %v2065_v39 = vpop.permute.xlu0 %2064  ;;  %v5228_v31 = vpop.permute.xlu1 %2144 }
 0x526   : > { %v2071_v26 = vadd.f32 %v2065_v39, %v2051_v45  ;;  %v2130_v39 = vadd.f32 %v5700_v42, %v5211_v50 }
 0x528   : > { %v2091_v55 = vadd.f32 %v5697_v20, %v2071_v26 }
 0x529   : > { %v2316_v0 = vpop.permute.xlu0 %2315  ;;  %v1928_v12 = vpop.permute.xlu1 %1927 }
 0x52a   : > { %v1936_v8 = vadd.f32 %v1928_v12, %v1916_v43  ;;  %v5698_v12 = vld [vmem:[#allocation85_spill] sm:$0xff] }
 0x52c   : > { %v1956_v7 = vadd.f32 %v5694_v49, %v1936_v8 }
 0x52d   : > { %v2101_v1 = vpop.permute.xlu0 %2100  ;;  %v1932_v52 = vpop.permute.xlu1 %1931 }
 0x52e   : > { %v1938_v19 = vadd.f32 %v1932_v52, %v1918_v18  ;;  %v2109_v47 = vadd.f32 %v2101_v1, %v2089_v6  ;;  %v2303_v52 = vadd.f32 %v5698_v12, %v2283_v28 }
 0x530   : > { %v1958_v10 = vadd.f32 %v5695_v48, %v1938_v19  ;;  %v2323_v62 = vadd.f32 %v2316_v0, %v2303_v52 }
 0x531   : > { %v2105_v14 = vpop.permute.xlu0 %2104  ;;  %v5230_v51 = vpop.permute.xlu1 %2393 }
 0x535   : > { %v1890_v44 = vpop.permute.xlu0 %1889  ;;  %v5232_v59 = vpop.permute.xlu1 %2397 }
 0x536   : > { %v1897_v25 = vadd.f32 %v1890_v44, %v1877_v33  ;;  %v5699_v44 = vld [vmem:[#allocation93_spill] sm:$0xff] }
 0x538   : > { %v1917_v11 = vadd.f32 %v5691_v38, %v1897_v25  ;;  %v2111_v25 = vadd.f32 %v2105_v14, %v2091_v55 }
 0x539   : > { %v2356_v23 = vpop.permute.xlu0 %2355  ;;  %v2181_v16 = vpop.permute.xlu1 %2180 }
 0x53a   : > { %v2131_v8 = vadd.f32 %v5701_v32, %v2111_v25 }
 0x53d   : > { %v2143_v4 = vpop.permute.xlu0 %2142  ;;  %v5234_v5 = vpop.permute.xlu1 %2184 }
 0x53e   : > { %v2150_v27 = vadd.f32 %v2143_v4, %v2130_v39  ;;  %v2151_v4 = vadd.f32 %v5228_v31, %v2131_v8  ;;  %v5707_v31 = vld [vmem:[#allocation101_spill] sm:$0xff] }
 0x540   : > { %v2170_v45 = vadd.f32 %v5703_v2, %v2150_v27 }
 0x541   : > { %v1930_v3 = vpop.permute.xlu0 %1929  ;;  %v5236_v17 = vpop.permute.xlu1 %2415 }
 0x542   : > { %v1937_v57 = vadd.f32 %v1930_v3, %v1917_v11  ;;  %v2129_v3 = vadd.f32 %v5699_v44, %v2109_v47  ;;  %v5702_v11 = vld [vmem:[#allocation91_spill] sm:$0xff] }
 0x543   : > { %v2343_v14 = vadd.f32 %v5702_v11, %v2323_v62 }
 0x544   : > { %v1957_v9 = vadd.f32 %v5696_v36, %v1937_v57  ;;  %v2149_v19 = vadd.f32 %v5226_v63, %v2129_v3 }
 0x545   : > { %v5238_v40 = vpop.permute.xlu0 %2395  ;;  %v1968_v37 = vpop.permute.xlu1 %1967  ;;  %v2363_v57 = vadd.f32 %v2356_v23, %v2343_v14 }
 0x546   : > { %v1976_v29 = vadd.f32 %v1968_v37, %v1956_v7  ;;  %v2169_v0 = vadd.f32 %v5704_v54, %v2149_v19  ;;  %v5705_v7 = vld [vmem:[#allocation107_spill] sm:$0xff]  ;;  %v2564_v19 = vstv %s2563_s2 }
 0x547   : > { %v2171_v48 = vadd.f32 %v5705_v7, %v2151_v4  ;;  %v3312_v4 = vmov 1966171168  }
 0x548   : > { %v2528_v56 = vrot.slane %v1976_v29, 4 }
 0x549   : > { %v2183_v41 = vpop.permute.xlu0 %2182  ;;  %v1972_v35 = vpop.permute.xlu1 %1971  ;;  %v2191_v36 = vadd.f32 %v5234_v5, %v2171_v48 }
 0x54a   : > { %v1978_v34 = vadd.f32 %v1972_v35, %v1958_v10  ;;  %v2190_v6 = vadd.f32 %v2183_v41, %v2170_v45  ;;  %v5706_v10 = vld [vmem:[#allocation127_spill] sm:$0xff]  ;;  %v2382_v41 = vadd.f32 %v5707_v31, %v5219_v46 }
 0x54b   : > { %v2383_v63 = vadd.f32 %v5706_v10, %v2363_v57 }
 0x54c   : > { %v2531_v1 = vrot.slane %v1978_v34, 4 }
 0x54d   : > { %v5245_v60 = vpop.permute.xlu0 %2413  ;;  %v2203_v53 = vpop.permute.xlu1 %2202  ;;  %v2403_v23 = vadd.f32 %v5238_v40, %v2383_v63  ;;  %v5708_v40 = vld [vmem:[#allocation103_spill] sm:$0xff] }
 0x54e   : > { %v2210_v49 = vadd.f32 %v2203_v53, %v2190_v6  ;;  %v2384_v3 = vadd.f32 %v5708_v40, %v5224_v21  ;;  %v2586_v6 = vunpack.c.l.s4 %v3312_v4 }
 0x54f   : > { %v2423_v12 = vadd.f32 %v5236_v17, %v2403_v23 }
 0x551   : > { %v5250_v24 = vpop.permute.xlu0 %2417  ;;  %v5252_v13 = vpop.permute.xlu1 %2433 }
 0x555   : > { %v1970_v61 = vpop.permute.xlu0 %1969  ;;  %v2438_v33 = vpop.permute.xlu1 %2437 }
 0x556   : > { %v1977_v30 = vadd.f32 %v1970_v61, %v1957_v9 }
 0x558   : > { %v2529_v37 = vrot.slane %v1977_v30, 4  ;;  %v2402_v30 = vadd.f32 %v5230_v51, %v2382_v41 }
 0x559   : > { %v2201_v35 = vpop.permute.xlu0 %2200  ;;  %v2223_v50 = vpop.permute.xlu1 %2222 }
 0x55a   : > { %v2530_v43 = vsel %vm2527_vm6, %v2528_v56, %v2529_v37  ;;  %v2532_v58 = vsel %vm2527_vm6, %v2529_v37, %v2531_v1  ;;  %v2230_v29 = vadd.f32 %v2223_v50, %v2210_v49  ;;  %v2422_v42 = vadd.f32 %v5245_v60, %v2402_v30 }
 0x55b   : > { %v2535_v18 = vadd.f32 %v2530_v43, %v5180_v22  ;;  %v2536_v28 = vadd.f32 %v2532_v58, %v5190_v15  ;;  %v2189_v22 = vadd.f32 %v2181_v16, %v2169_v0  ;;  %v2404_v56 = vadd.f32 %v5232_v59, %v2384_v3 }
 0x55c   : > { %v2542_v61 = vrot.slane %v2230_v29, 5  ;;  %v2442_v1 = vadd.f32 %v5252_v13, %v2422_v42  ;;  %v2579_v0 = vlaneseq  ;;  %v2587_v49 = vunpack.c.0.s8 %v2586_v6  ;;  %v5729_v6 = vld [vmem:[#allocation24_spill] sm:$0xff] }
 0x55d   : > { %v2205_v38 = vpop.permute.xlu0 %2204  ;;  %v2454_v15 = vpop.permute.xlu1 %2453  ;;  %v2209_v47 = vadd.f32 %v2201_v35, %v2189_v22  ;;  %v2424_v62 = vadd.f32 %v5250_v24, %v2404_v56 }
 0x55e   : > { %v2211_v16 = vadd.f32 %v2205_v38, %v2191_v36  ;;  %v2462_v27 = vadd.f32 %v2454_v15, %v2442_v1  ;;  %v5287_v15 = vshrl.u32 %v2579_v0, 7  ;;  %vm2581_vm9 = vcmp.lt.s32.totalorder %v2579_v0, 16 }
 0x55f   : > { %v2444_v58 = vadd.f32 %v2438_v33, %v2424_v62  ;;  %vm2610_vm10 = vcmp.ge.s32.totalorder %v2579_v0, 16  ;;  %vm2611_vm11 = vcmp.lt.s32.totalorder %v2579_v0, 32  ;;  %vm5296_vm13 = vcmp.ge.s32.totalorder %v2579_v0, 32 }
 0x560   : > { %v2590_v7 = vsub.s32 %v2587_v49, %v5287_v15  ;;  %vm2612_vm12 = vmand %vm2610_vm10, %vm2611_vm11  ;;  %vm2619_vm14 = vcmp.lt.s32.totalorder %v2579_v0, 48  ;;  %vm5304_vm0 = vcmp.ge.s32.totalorder %v2579_v0, 48  ;;  %vm5309_vm1 = vcmp.lt.s32.totalorder %v2579_v0, 64 }
 0x561   : > { %v2436_v26 = vpop.permute.xlu0 %2435  ;;  %v2458_v20 = vpop.permute.xlu1 %2457  ;;  %vm2620_vm15 = vmand %vm5296_vm13, %vm2619_vm14  ;;  %vm5314_vm2 = vcmp.ge.s32.totalorder %v2579_v0, 64  ;;  %vm5319_vm3 = vcmp.lt.s32.totalorder %v2579_v0, 80  ;;  %vm5332_vm6 = vcmp.ge.s32.totalorder %v2579_v0, 80  ;;  %vm5351_vm10 = vcmp.lt.s32.totalorder %v2579_v0, 112 }
 0x562   : > { %v2443_v39 = vadd.f32 %v2436_v26, %v2423_v12  ;;  %vm2628_vm4 = vmand %vm5304_vm0, %vm5309_vm1  ;;  %vm2680_vm13 = vcmp.lt.s32.totalorder %v2579_v0, 128 }
 0x563   : > { %vm2650_vm5 = vmand %vm5314_vm2, %vm5319_vm3 }
 0x565   : > { %v2221_v34 = vpop.permute.xlu0 %2220  ;;  %v2476_v17 = vpop.permute.xlu1 %2475 }
 0x566   : > { %v2229_v9 = vadd.f32 %v2221_v34, %v2209_v47 }
 0x568   : > { %v2541_v53 = vrot.slane %v2229_v9, 5 }
 0x569   : > { %v2225_v55 = vpop.permute.xlu0 %2224 }
 0x56a   : > { %v2543_v52 = vsel %vm2540_vm7, %v2541_v53, %v2542_v61  ;;  %v2231_v44 = vadd.f32 %v2225_v55, %v2211_v16 }
 0x56b   : > { %v2548_v5 = vadd.f32 %v2543_v52, %v2535_v18  ;;  %v2464_v18 = vadd.f32 %v2458_v20, %v2444_v58 }
 0x56c   : > { %v2544_v46 = vrot.slane %v2231_v44, 5 }
 0x56d   : > { %v2456_v25 = vpop.permute.xlu0 %2455 }
 0x56e   : > { %v2545_v51 = vsel %vm2540_vm7, %v2542_v61, %v2544_v46  ;;  %v2463_v37 = vadd.f32 %v2456_v25, %v2443_v39  ;;  %vm5337_vm7 = vcmp.lt.s32.totalorder %v2579_v0, 96 }
 0x56f   : > { %v2549_v35 = vadd.f32 %v2545_v51, %v2536_v28 }
 0x570   : > { %v2483_v43 = vadd.f32 %v2476_v17, %v2463_v37 }
 0x571   : > { %v2474_v21 = vpop.permute.xlu0 %2473 }
 0x572   : > { %v2482_v60 = vadd.f32 %v2474_v21, %v2462_v27  ;;  %v2555_v32 = vrot.slane %v2483_v43, 6 }
 0x574   : > { %v2554_v8 = vrot.slane %v2482_v60, 6 }
 0x575   : > { %v2478_v59 = vpop.permute.xlu0 %2477 }
 0x576   : > { %v2556_v13 = vsel %vm2553_vm8, %v2554_v8, %v2555_v32  ;;  %v2484_v50 = vadd.f32 %v2478_v59, %v2464_v18 }
 0x577   : > { %v2561_v38 = vadd.f32 %v2556_v13, %v2548_v5 }
 0x578   : > { %v2557_v11 = vrot.slane %v2484_v50, 6 }
 0x579   : > { %v2565_v14 = vadd.f32 %v2564_v19, %v2561_v38 }
 0x57a   : > { %v2558_v2 = vsel %vm2553_vm8, %v2555_v32, %v2557_v11  ;;  %vm2665_vm8 = vmand %vm5332_vm6, %vm5337_vm7 }
 0x57b   : > { %v3014_v28 = vmul.f32 -1.442695, %v2565_v14  ;;  %v2562_v45 = vadd.f32 %v2558_v2, %v2549_v35 }
 0x57d   : > { %3139 = vpow2.f32 %v3014_v28  ;;  %v2566_v24 = vadd.f32 %v2564_v19, %v2562_v45  ;;  %v2766_v45 = vsub.s32 0, %v5287_v15 }
 0x57f   : > { %v3015_v57 = vmul.f32 -1.442695, %v2566_v24  ;;  %v2770_v24 = vsub.s32 1, %v5287_v15  ;;  %v5732_v15 = vld [vmem:[#allocation21_spill] sm:$0xff] }
 0x581   : > { %3141 = vpow2.f32 %v3015_v57 }
 0x587   : > { %v3140_v33 = vpop.eup %3139 }
 0x588   : > { %v2573_v54 = vadd.f32 1.0, %v3140_v33 }
 0x58a   : > { %3143 = vrcp.f32 %v2573_v54 }
 0x58b   : > { %v3142_v26 = vpop.eup %3141 }
 0x58c   : > { %v2574_v22 = vadd.f32 1.0, %v3142_v26 }
 0x58e   : > { %3145 = vrcp.f32 %v2574_v22  ;;  %v5730_v22 = vld [vmem:[#allocation19_spill] sm:$0xff] }
 0x594   : > { %v3144_v48 = vpop.eup %3143 }
 0x595   : > { %v2591_v10 = vrot.slane %v3144_v48, %v2590_v7  ;;  %2583 = vst.msk [vmem:[#allocation3] sm:$0x1] %vm2581_vm9, %v3144_v48  ;;  %v2630_v29 = vcombine.high %v3144_v48, %v3144_v48 }
 0x597   : > { %v2592_v63 = vcombine.high %v2591_v10, %v2591_v10  ;;  %v2599_v23 = vrot.slane %v2591_v10, %v2590_v7  ;;  %v2637_v31 = vrot.slane %v2630_v29, %v2590_v7  ;;  %v5734_v29 = vld [vmem:[#allocation22_spill] sm:$0xff] }
 0x598   : > { %v3146_v47 = vpop.eup %3145 }
 0x599   : > { %v2606_v34 = vrot.slane %v2592_v63, %v2590_v7  ;;  %v2691_v36 = vrot.slane %v3146_v47, %v2590_v7  ;;  %2683 = vst.msk [vmem:[#allocation3 + $0x1] sm:$0x1] %vm2581_vm9, %v3146_v47  ;;  %v2614_v61 = vcombine.high %v2599_v23, %v2599_v23  ;;  %v2721_v53 = vcombine.high %v3146_v47, %v3146_v47  ;;  %v5733_v63 = vld [vmem:[#allocation25_spill] sm:$0xff] }
 0x59a   : > { %v2644_v55 = vrot.slane %v2637_v31, %v2590_v7  ;;  %v2652_v44 = vcombine.high %v2637_v31, %v2637_v31  ;;  %vm5346_vm9 = vcmp.ge.s32.totalorder %v2579_v0, 96 }
 0x59b   : > { %2607 = vrot.lane.b32.xlu1 %v2606_v34, %s3313_s3  ;;  %v2692_v9 = vcombine.high %v2691_v36, %v2691_v36  ;;  %v2699_v16 = vrot.slane %v2691_v36, %v2590_v7  ;;  %v2728_v30 = vrot.slane %v2721_v53, %v2590_v7  ;;  %v2622_v52 = vcombine.high %v2606_v34, %v2606_v34  ;;  %vm2673_vm11 = vmand %vm5346_vm9, %vm5351_vm10  ;;  %v5735_v36 = vld [vmem:[#allocation26_spill] sm:$0xff] }
 0x59c   : > { %v2659_v40 = vrot.slane %v2652_v44, %v2590_v7  ;;  %v2667_v39 = vcombine.high %v2644_v55, %v2644_v55 }
 0x59d   : > { %v2706_v41 = vrot.slane %v2692_v9, %v2590_v7  ;;  %v2711_v20 = vcombine.high %v2699_v16, %v2699_v16  ;;  %v2735_v12 = vrot.slane %v2728_v30, %v2590_v7  ;;  %v2740_v3 = vcombine.high %v2728_v30, %v2728_v30 }
 0x59e   : > { %v2675_v25 = vcombine.high %v2659_v40, %v2659_v40 }
 0x59f   : > { %2707 = vrot.lane.b32.xlu0 %v2706_v41, %s3313_s3  ;;  %2615 = vrot.lane.b32.xlu1 %v2614_v61, %s3314_s25  ;;  %v2716_v5 = vcombine.high %v2706_v41, %v2706_v41  ;;  %v2747_v42 = vrot.slane %v2740_v3, %v2590_v7  ;;  %v2752_v46 = vcombine.high %v2735_v12, %v2735_v12  ;;  %v5731_v7 = vld [vmem:[#allocation23_spill] sm:$0xff] }
 0x5a1   : > { %v2757_v56 = vcombine.high %v2747_v42, %v2747_v42 }
 0x5a3   : > { %2712 = vrot.lane.b32.xlu0 %v2711_v20, %s3314_s25  ;;  %2645 = vrot.lane.b32.xlu1 %v2644_v55, %s3315_s21 }
 0x5a7   : > { %2736 = vrot.lane.b32.xlu0 %v2735_v12, %s3315_s21  ;;  %2623 = vrot.lane.b32.xlu1 %v2622_v52, %s3316_s9 }
 0x5ab   : > { %2717 = vrot.lane.b32.xlu0 %v2716_v5, %s3316_s9  ;;  %2660 = vrot.lane.b32.xlu1 %v2659_v40, %s3317_s22 }
 0x5af   : > { %2748 = vrot.lane.b32.xlu0 %v2747_v42, %s3317_s22  ;;  %2668 = vrot.lane.b32.xlu1 %v2667_v39, %s3318_s23 }
 0x5b3   : > { %2753 = vrot.lane.b32.xlu0 %v2752_v46, %s3318_s23  ;;  %2676 = vrot.lane.b32.xlu1 %v2675_v25, %s3319_s5 }
 0x5b7   : > { %2758 = vrot.lane.b32.xlu0 %v2757_v56, %s3319_s5 }
 0x60d   : > { %v2608_v51 = vpop.permute.xlu1 %2607 }
 0x60e   : > { %2613 = vst.msk [vmem:[#allocation3] sm:$0x1] %vm2612_vm12, %v2608_v51 }
 0x611   : > { %v2708_v37 = vpop.permute.xlu0 %2707  ;;  %v2616_v17 = vpop.permute.xlu1 %2615 }
 0x612   : > { %2710 = vst.msk [vmem:[#allocation3 + $0x1] sm:$0x1] %vm2612_vm12, %v2708_v37  ;;  %vm2679_vm12 = vcmp.ge.s32.totalorder %v2579_v0, 112  ;;  %v5728_v0 = vld [vmem:[#allocation20_spill] sm:$0xff] }
 0x613   : > { %2621 = vst.msk [vmem:[#allocation3] sm:$0x1] %vm2620_vm15, %v2616_v17  ;;  %vm2681_vm14 = vmand %vm2679_vm12, %vm2680_vm13 }
 0x615   : > { %v2713_v27 = vpop.permute.xlu0 %2712  ;;  %v2646_v43 = vpop.permute.xlu1 %2645 }
 0x616   : > { %2715 = vst.msk [vmem:[#allocation3 + $0x1] sm:$0x1] %vm2620_vm15, %v2713_v27 }
 0x619   : > { %v2737_v32 = vpop.permute.xlu0 %2736  ;;  %v2624_v8 = vpop.permute.xlu1 %2623 }
 0x61a   : > { %2629 = vst.msk [vmem:[#allocation3] sm:$0x1] %vm2628_vm4, %v2624_v8 }
 0x61b   : > { %2651 = vst.msk [vmem:[#allocation3] sm:$0x1] %vm2650_vm5, %v2646_v43 }
 0x61d   : > { %v2718_v13 = vpop.permute.xlu0 %2717  ;;  %v2661_v50 = vpop.permute.xlu1 %2660 }
 0x61e   : > { %2720 = vst.msk [vmem:[#allocation3 + $0x1] sm:$0x1] %vm2628_vm4, %v2718_v13 }
 0x61f   : > { %2666 = vst.msk [vmem:[#allocation3] sm:$0x1] %vm2665_vm8, %v2661_v50 }
 0x620   : > { %2739 = vst.msk [vmem:[#allocation3 + $0x1] sm:$0x1] %vm2650_vm5, %v2737_v32 }
 0x621   : > { %v2749_v38 = vpop.permute.xlu0 %2748  ;;  %v2669_v11 = vpop.permute.xlu1 %2668 }
 0x622   : > { %2751 = vst.msk [vmem:[#allocation3 + $0x1] sm:$0x1] %vm2665_vm8, %v2749_v38 }
 0x623   : > { %2674 = vst.msk [vmem:[#allocation3] sm:$0x1] %vm2673_vm11, %v2669_v11 }
 0x625   : > { %v2754_v14 = vpop.permute.xlu0 %2753  ;;  %v2677_v2 = vpop.permute.xlu1 %2676 }
 0x626   : > { %2756 = vst.msk [vmem:[#allocation3 + $0x1] sm:$0x1] %vm2673_vm11, %v2754_v14 }
 0x627   : > { %2682 = vst.msk [vmem:[#allocation3] sm:$0x1] %vm2681_vm14, %v2677_v2 }
 0x629   : > { %v2759_v28 = vpop.permute.xlu0 %2758 }
 0x62a   : > { %2761 = vst.msk [vmem:[#allocation3 + $0x1] sm:$0x1] %vm2681_vm14, %v2759_v28 }
 0x631   : > { %v2762_v57 = vld [vmem:[#allocation3] sm:$0x3] }
 0x632   : > { %v2767_v33 = vrot.slane %v2762_v57, %v2766_v45  ;;  %v2771_v54 = vrot.slane %v2762_v57, %v2770_v24 }
 0x634   : > { %v2774_v4 = vmul.f32 %v2767_v33, %v5728_v0  ;;  %v2775_v26 = vmul.f32 %v2771_v54, %v5729_v6  ;;  %v2776_v49 = vmul.f32 %v2767_v33, %v5730_v22  ;;  %v2777_v48 = vmul.f32 %v2771_v54, %v5731_v7 }
 0x635   : > { %v2778_v10 = vmul.f32 %v2767_v33, %v5732_v15  ;;  %v2779_v47 = vmul.f32 %v2771_v54, %v5733_v63  ;;  %v2780_v34 = vmul.f32 %v2767_v33, %v5734_v29  ;;  %v2781_v23 = vmul.f32 %v2771_v54, %v5735_v36 }
 0x636   : > { %2782 = vst [vmem:[%s324_s24] sm:$0xff] %v2774_v4  ;;  %2783 = vst [vmem:[%s324_s24 + $0x8] sm:$0xff] %v2775_v26 }
 0x637   : > { %2784 = vst [vmem:[%s324_s24 + $0x10] sm:$0xff] %v2776_v49  ;;  %2785 = vst [vmem:[%s324_s24 + $0x18] sm:$0xff] %v2777_v48 }
 0x638   : > { %2786 = vst [vmem:[%s324_s24 + $0x20] sm:$0xff] %v2778_v10  ;;  %2787 = vst [vmem:[%s324_s24 + $0x28] sm:$0xff] %v2779_v47 }
 0x639   : > { %2788 = vst [vmem:[%s324_s24 + $0x30] sm:$0xff] %v2780_v34  ;;  %2789 = vst [vmem:[%s324_s24 + $0x38] sm:$0xff] %v2781_v23 }
 0x63a   : > { %3227 = shalt.err (!%p3224_p7)
}
 0x63b   : > { %s3228_s1 = scalar_lea.hbm %s5373_s11, 1024  ;;  %s3232_s2 = scalar_lea.hbm %s5431_s7, 2048 }
 0x63c   : > { %p3229_p11 = scmp.ne.s32.totalorder %s5373_s11, %s3228_s1  ;;  %p3233_p3 = scmp.lt.u32.totalorder %s5373_s11, %s5431_s7 }
 0x63d   : > { %p3234_p9 = scmp.lt.u32.totalorder %s3232_s2, %s3228_s1  ;;  %p3236_p5 = scmp.lt.u32.totalorder %s3228_s1, %s5373_s11 }
 0x63e   : > { %p3230_p13 = pnand %p3229_p11, %p5736_p2 }
 0x63f   : > { %p3235_p1 = por %p3234_p9, %p3233_p3 }
 0x640   : > { %p3231_p6 = pneg %p3230_p13 }
 0x641   : > { %p3237_p8 = por %p3236_p5, %p3235_p1 }
 0x643   : > { %p3238_p10 = pnand %p3237_p8, %p3231_p6 }
 0x645   : > { %3241 = shalt.err (!%p3238_p10)
}
 0x646   : > { %s3321_s9 = smov 256  }
 0x647   : > { %3033 = dma.vmem_to_hbm [thread:$0]  (%p5736_p2), %s5379_s20, 1024, %s5373_s11, %s2791_s6, %s3321_s9, %s3321_s9, %s3313_s3  }
 0x648 PF: > { %s2819_s22 = sand.u32 1, %s3276_s26   ;;  %p5737_p4 = scmp.ne.s32.totalorder %s5468_s15, 0 }
 0x649   : > { %p5738_p12 = scmp.ge.s32.totalorder %s3288_s29, 2  ;;  %s2820_s23 = scalar_lea.sflag [#allocation7], %s2819_s22 }
 0x64b   : > { %p3047_p0 = pnand %p5738_p12, %p5737_p4 }
 0x64d   : > { %3271 = dma.done.wait (!%p3047_p0), %s2820_s23, 1024  }
 0x64e   : > { %3273 = vsyncadd (!%p3047_p0), %s2820_s23, 4294966272  ;;  %s5739_s14 = sld [smem:[#allocation17_spill]]  ;;  %s5740_s28 = sld [smem:[#allocation18_spill]] }
 0x64f   : > { %p23_p7 = scmp.ge.s32.totalorder %s3390_s8, 4   ;;  %s5741_s26 = smov %s3280_s27 }
 0x650   : > { %s5743_s29 = smov %s3390_s8 }
 0x651   :  { %25 = sbr.rel (!%p23_p7) target bundleno = 15 (0xf), region = 103 }
 0x654   : > { %s5742_s27 = smov %s5739_s14 }
 0x658   :  { %2825 = vsyncpa [#allocation6], 1 }
 0x659   :  { %2827 = vsyncpa [#allocation6 + $0x1], 1 }
 0x65a   :  { %2828 = vsyncpa [#allocation7], 1 }
 0x65b   :  { %2830 = vsyncpa [#allocation7 + $0x1], 1 }
 0x65c   :  { %2831 = vsyncpa [#allocation8], 1 }
 0x65d   :  { %2833 = vsyncpa [#allocation8 + $0x1], 1 }
 0x65e   :  { %2834 = vsyncpa [#allocation11], 1 }

</bundles_post_ra>
